<compile_context>
chip_gen: v6e
topology: v6e:2x2x1
jax: 0.10.0
libtpu: 0.0.40
codegen_flags: <defaults>
</compile_context>

<pallas_src>
import functools

import jax
import jax.numpy as jnp
from jax.experimental import pallas as pl
from jax.experimental.pallas import tpu as pltpu

# ----- WaveNetModel hyper-parameters (synthetic, small) ----------------------
LAYERS = 3            # layers per block
BLOCKS = 2            # number of blocks
KERNEL_SIZE = 2
RESIDUAL_CH = 32
DILATION_CH = 32
SKIP_CH = 32
END_CH = 32
CLASSES = 16          # in_classes == classes
DILATIONS = tuple(2 ** l for _ in range(BLOCKS) for l in range(LAYERS))   # (1,2,4,1,2,4)
N_LAYERS = LAYERS * BLOCKS
RECEPTIVE_FIELD = 1 + (KERNEL_SIZE - 1) * sum(DILATIONS)                  # = 15
HALO = 128            # per-tile halo / left-pad columns (multiple of 128)
MAX_TILE_T = 2048     # lane tile, multiple of 128; safe for v7x 64 MiB VMEM
                      # (could be 4096 on v5e/v6e per the perf review)

# The roll/garbage trick and the 128-column class-0 pad are only exact because
# the halo covers the full receptive field: emitted columns start at HALO and
# pollution / pad influence is confined to window columns < RECEPTIVE_FIELD.
assert HALO % 128 == 0 and HALO >= RECEPTIVE_FIELD == 1 + sum(DILATIONS)


# ----------------------------- Pallas kernel --------------------------------
def _wavenet_kernel(ids_ref, w_start_ref, b_start_ref,
                    w_gate_ref, b_gate_ref, w_rs_ref, b_rs_ref,
                    we1_ref, be1_ref, we2_ref, be2_ref,
                    out_ref, *, dilations, tile_t):
    """Grid step = (batch b, time tile j).

    ids_ref : (1, 1, t_pad + HALO) int32 padded class ids for this batch row
              (block index independent of j -> resident across time tiles).
    out_ref : (1, CLASSES, tile_t) f32 -- lane-dense [C, T] output tile.
    Activations are [channels, time]: channels on sublanes, time on lanes.
    """
    win = tile_t + HALO                                   # static, multiple of 128
    j = pl.program_id(1)
    start = pl.multiple_of(j * tile_t, 128)               # 128-aligned window start

    # Build the one-hot in VMEM from int ids (ids stay int32 in HBM).
    ids = ids_ref[0, :, pl.ds(start, win)]                # (1, win) int32
    iota = jax.lax.broadcasted_iota(jnp.int32, (CLASSES, win), 0)
    one_hot = (iota == ids).astype(jnp.bfloat16)          # (CLASSES, win), exact in bf16

    # start 1x1 conv: (R, CLASSES) @ (CLASSES, win), bf16 MXU, f32 accumulate.
    h = jnp.dot(w_start_ref[...], one_hot,
                preferred_element_type=jnp.float32) + b_start_ref[...]
    skip = jnp.zeros((SKIP_CH, win), jnp.float32)

    # TODO(synk): pytorch-wavenet's dilate() reshape trick zero-pads the time
    # axis to a multiple of the dilation before folding; as in the previous
    # port we implement the equivalent standard causal dilated conv, which is
    # identical on the emitted (fully valid) output columns.
    for i, d in enumerate(dilations):
        # tap at (t - d): lane rotation (XLU).  Wrapped columns are garbage,
        # confined to window columns < 14 which are never emitted.
        h_shift = pltpu.roll(h, shift=d, axis=1).astype(jnp.bfloat16)
        h_bf = h.astype(jnp.bfloat16)

        # split fused filter+gate matmul (no sublane concat):
        # rows [:D] -> tanh, rows [D:] -> sigmoid;
        # weight cols [:R] act on the shifted tap, cols [R:] on the current tap.
        gates = (jnp.dot(w_gate_ref[i, :, :RESIDUAL_CH], h_shift,
                         preferred_element_type=jnp.float32)
                 + jnp.dot(w_gate_ref[i, :, RESIDUAL_CH:], h_bf,
                           preferred_element_type=jnp.float32)
                 + b_gate_ref[i])
        z = jnp.tanh(gates[:DILATION_CH]) * jax.nn.sigmoid(gates[DILATION_CH:])

        # fused residual|skip matmul: rows [:R] = residual, rows [R:] = skip.
        rs = jnp.dot(w_rs_ref[i], z.astype(jnp.bfloat16),
                     preferred_element_type=jnp.float32) + b_rs_ref[i]
        h = h + rs[:RESIDUAL_CH]
        skip = skip + rs[RESIDUAL_CH:]

    # head: relu -> 1x1 -> relu -> 1x1, only on this tile's emitted columns.
    # HALO is a multiple of 128 -> the slice is vreg-aligned (no XLU shift).
    s = jax.nn.relu(skip[:, HALO:HALO + tile_t]).astype(jnp.bfloat16)
    o = jax.nn.relu(jnp.dot(we1_ref[...], s,
                            preferred_element_type=jnp.float32) + be1_ref[...])
    o = jnp.dot(we2_ref[...], o.astype(jnp.bfloat16),
                preferred_element_type=jnp.float32) + be2_ref[...]
    out_ref[0] = o                                        # (CLASSES, tile_t)


# ------------------------------- wrapper -------------------------------------
def init_params(key):
    ks = jax.random.split(key, 14)
    w = lambda k, shape: 0.1 * jax.random.normal(k, shape, dtype=jnp.float32)
    return dict(
        w_start=w(ks[0], (CLASSES, RESIDUAL_CH)),
        b_start=w(ks[1], (1, RESIDUAL_CH)),
        wf=w(ks[2], (N_LAYERS, KERNEL_SIZE, RESIDUAL_CH, DILATION_CH)),
        bf=w(ks[3], (N_LAYERS, DILATION_CH)),
        wg=w(ks[4], (N_LAYERS, KERNEL_SIZE, RESIDUAL_CH, DILATION_CH)),
        bg=w(ks[5], (N_LAYERS, DILATION_CH)),
        wr=w(ks[6], (N_LAYERS, DILATION_CH, RESIDUAL_CH)),
        br=w(ks[7], (N_LAYERS, RESIDUAL_CH)),
        ws=w(ks[8], (N_LAYERS, DILATION_CH, SKIP_CH)),
        bs=w(ks[9], (N_LAYERS, SKIP_CH)),
        we1=w(ks[10], (SKIP_CH, END_CH)),
        be1=w(ks[11], (1, END_CH)),
        we2=w(ks[12], (END_CH, CLASSES)),
        be2=w(ks[13], (1, CLASSES)),
    )


def _fuse_weights(p):
    """Transpose weights to [out_ch, in_ch] (column-vector activations), fuse
    the per-layer filter/gate and residual/skip matmuls, and cast matmul
    weights to bf16 (biases stay f32 -- added after f32 accumulation)."""
    bf = jnp.bfloat16
    wf_t = jnp.swapaxes(p['wf'], -1, -2)                  # (N, 2, D, R)
    wg_t = jnp.swapaxes(p['wg'], -1, -2)
    w_gate = jnp.concatenate(
        [jnp.concatenate([wf_t[:, 0], wf_t[:, 1]], axis=-1),     # filter rows
         jnp.concatenate([wg_t[:, 0], wg_t[:, 1]], axis=-1)],    # gate rows
        axis=1).astype(bf)                                        # (N, 2D, 2R)
    b_gate = jnp.concatenate([p['bf'], p['bg']], axis=-1)[..., None]     # (N, 2D, 1)
    w_rs = jnp.concatenate([jnp.swapaxes(p['wr'], -1, -2),
                            jnp.swapaxes(p['ws'], -1, -2)],
                           axis=1).astype(bf)                            # (N, R+S, D)
    b_rs = jnp.concatenate([p['br'], p['bs']], axis=-1)[..., None]       # (N, R+S, 1)
    return [p['w_start'].T.astype(bf), p['b_start'].T, w_gate, b_gate, w_rs, b_rs,
            p['we1'].T.astype(bf), p['be1'].T, p['we2'].T.astype(bf), p['be2'].T]


def _round_up(x, m):
    return (x + m - 1) // m * m


@jax.jit
def wavenet_encoder(input_ids, params):
    """input_ids: int32 [B, T] class ids (0..CLASSES-1). Returns f32 [B, CLASSES, T]."""
    B, T = input_ids.shape
    tile_t = min(MAX_TILE_T, _round_up(T, 128))
    if B < 2:
        # Ensure >= 2 time tiles so both v7x TensorCores get work on B == 1.
        tile_t = min(tile_t, max(128, _round_up(pl.cdiv(T, 2), 128)))
    t_pad = _round_up(T, tile_t)
    nt = t_pad // tile_t
    win = tile_t + HALO
    total = t_pad + HALO

    # F.pad(input, (receptive_field, 0)) with value 0 -> pad columns one-hot
    # to class 0.  Left-padding by HALO = 128 class-0 columns instead of 15 is
    # value-equivalent (receptive field is 15 columns; all pad columns are
    # identical class-0 one-hots) and keeps every slice/store 128-aligned.
    padded = jnp.pad(input_ids, ((0, 0), (HALO, t_pad - T)))[:, None, :]  # (B,1,total)

    weights = _fuse_weights(params)
    kernel = functools.partial(_wavenet_kernel, dilations=DILATIONS, tile_t=tile_t)

    out = pl.pallas_call(
        kernel,
        out_shape=jax.ShapeDtypeStruct((B, CLASSES, t_pad), jnp.float32),
        grid=(B, nt),
        in_specs=[pl.BlockSpec((1, 1, total), lambda b, j: (b, 0, 0))]
                 + [pl.BlockSpec(a.shape, lambda b, j, n=a.ndim: (0,) * n)
                    for a in weights],
        out_specs=pl.BlockSpec((1, CLASSES, tile_t), lambda b, j: (b, 0, j)),
        compiler_params=pltpu.CompilerParams(
            dimension_semantics=("parallel", "parallel")),
    )(padded, *weights)

    # kernel already writes the PyTorch layout [B, C, T]; just drop time padding.
    return out[:, :, :T]


if __name__ == "__main__":
    key = jax.random.PRNGKey(0)
    pkey, xkey = jax.random.split(key)
    params = init_params(pkey)

    B, T = 2, 8
    input_ids = jax.random.randint(xkey, (B, T), 0, CLASSES, dtype=jnp.int32)

    out = wavenet_encoder(input_ids, params)
    jax.block_until_ready(out)
    assert out.shape == (B, CLASSES, T), out.shape
    assert out.dtype == jnp.float32
    assert bool(jnp.all(jnp.isfinite(out)))
    print("KERNEL_OK")
</pallas_src>

<mosaic_0001>
module attributes {stable_mosaic.version = 11 : i64} {
  func.func @_wavenet_kernel(%arg0: i32, %arg1: i32, %arg2: memref<1x1x256xi32, #tpu.memory_space<vmem>>, %arg3: memref<32x16xbf16, #tpu.memory_space<vmem>>, %arg4: memref<32x1xf32, #tpu.memory_space<vmem>>, %arg5: memref<6x64x64xbf16, #tpu.memory_space<vmem>>, %arg6: memref<6x64x1xf32, #tpu.memory_space<vmem>>, %arg7: memref<6x64x32xbf16, #tpu.memory_space<vmem>>, %arg8: memref<6x64x1xf32, #tpu.memory_space<vmem>>, %arg9: memref<32x32xbf16, #tpu.memory_space<vmem>>, %arg10: memref<32x1xf32, #tpu.memory_space<vmem>>, %arg11: memref<16x32xbf16, #tpu.memory_space<vmem>>, %arg12: memref<16x1xf32, #tpu.memory_space<vmem>>, %arg13: memref<1x16x128xf32, #tpu.memory_space<vmem>>) attributes {dimension_semantics = [#tpu.dimension_semantics<parallel>, #tpu.dimension_semantics<parallel>], iteration_bounds = array<i64: 2, 1>, scalar_prefetch = 0 : i64, scratch_operands = 0 : i64, tpu.core_type = #tpu.core_type<tc>, window_params = [{transform_indices = @transform_0, window_bounds = array<i64: 1, 1, 256>}, {pipeline_mode = #tpu.pipeline_mode<synchronous>, transform_indices = @transform_1, window_bounds = array<i64: 32, 16>}, {pipeline_mode = #tpu.pipeline_mode<synchronous>, transform_indices = @transform_2, window_bounds = array<i64: 32, 1>}, {pipeline_mode = #tpu.pipeline_mode<synchronous>, transform_indices = @transform_3, window_bounds = array<i64: 6, 64, 64>}, {pipeline_mode = #tpu.pipeline_mode<synchronous>, transform_indices = @transform_4, window_bounds = array<i64: 6, 64, 1>}, {pipeline_mode = #tpu.pipeline_mode<synchronous>, transform_indices = @transform_5, window_bounds = array<i64: 6, 64, 32>}, {pipeline_mode = #tpu.pipeline_mode<synchronous>, transform_indices = @transform_6, window_bounds = array<i64: 6, 64, 1>}, {pipeline_mode = #tpu.pipeline_mode<synchronous>, transform_indices = @transform_7, window_bounds = array<i64: 32, 32>}, {pipeline_mode = #tpu.pipeline_mode<synchronous>, transform_indices = @transform_8, window_bounds = array<i64: 32, 1>}, {pipeline_mode = #tpu.pipeline_mode<synchronous>, transform_indices = @transform_9, window_bounds = array<i64: 16, 32>}, {pipeline_mode = #tpu.pipeline_mode<synchronous>, transform_indices = @transform_10, window_bounds = array<i64: 16, 1>}, {transform_indices = @transform_11, window_bounds = array<i64: 1, 16, 128>}]} {
    %c128_i32 = arith.constant 128 : i32
    %0 = arith.muli %arg1, %c128_i32 : i32
    %1 = tpu.assume_multiple %0, 128 : i32
    %c0 = arith.constant 0 : index
    %c0_0 = arith.constant 0 : index
    %2 = arith.index_cast %1 : i32 to index
    %3 = vector.load %arg2[%c0, %c0_0, %2] : memref<1x1x256xi32, #tpu.memory_space<vmem>>, vector<1x1x256xi32>
    %4 = vector.shape_cast %3 : vector<1x1x256xi32> to vector<1x256xi32>
    %5 = tpu.iota {dimensions = array<i32: 0>} : vector<16x256xi32>
    %6 = vector.broadcast %4 : vector<1x256xi32> to vector<16x256xi32>
    %7 = arith.cmpi eq, %5, %6 : vector<16x256xi32>
    %8 = arith.extui %7 : vector<16x256xi1> to vector<16x256xi32>
    %9 = arith.sitofp %8 : vector<16x256xi32> to vector<16x256xf32>
    %10 = arith.truncf %9 : vector<16x256xf32> to vector<16x256xbf16>
    %c0_1 = arith.constant 0 : index
    %c0_2 = arith.constant 0 : index
    %11 = vector.load %arg3[%c0_1, %c0_2] : memref<32x16xbf16, #tpu.memory_space<vmem>>, vector<32x16xbf16>
    %cst = arith.constant dense<0.000000e+00> : vector<32x256xf32>
    %12 = tpu.matmul %11, %10, %cst {dimension_numbers = #tpu.dot_dimension_numbers<[1], [0], [0], [1], [0, 0, 1, 1], [], []>} : vector<32x16xbf16>, vector<16x256xbf16>, vector<32x256xf32> -> vector<32x256xf32>
    %c0_3 = arith.constant 0 : index
    %c0_4 = arith.constant 0 : index
    %13 = vector.load %arg4[%c0_3, %c0_4] : memref<32x1xf32, #tpu.memory_space<vmem>>, vector<32x1xf32>
    %14 = vector.broadcast %13 : vector<32x1xf32> to vector<32x256xf32>
    %15 = arith.addf %12, %14 : vector<32x256xf32>
    %cst_5 = arith.constant 0.000000e+00 : f32
    %16 = vector.broadcast %cst_5 : f32 to vector<32x256xf32>
    %c1_i32 = arith.constant 1 : i32
    %17 = tpu.dynamic_rotate %15 by %c1_i32 dim 1 : vector<32x256xf32>, i32 -> vector<32x256xf32>
    %18 = arith.truncf %17 : vector<32x256xf32> to vector<32x256xbf16>
    %19 = arith.truncf %15 : vector<32x256xf32> to vector<32x256xbf16>
    %c0_6 = arith.constant 0 : index
    %c0_7 = arith.constant 0 : index
    %c0_8 = arith.constant 0 : index
    %20 = vector.load %arg5[%c0_6, %c0_7, %c0_8] : memref<6x64x64xbf16, #tpu.memory_space<vmem>>, vector<1x64x32xbf16>
    %21 = vector.shape_cast %20 : vector<1x64x32xbf16> to vector<64x32xbf16>
    %cst_9 = arith.constant dense<0.000000e+00> : vector<64x256xf32>
    %22 = tpu.matmul %21, %18, %cst_9 {dimension_numbers = #tpu.dot_dimension_numbers<[1], [0], [0], [1], [0, 0, 1, 1], [], []>} : vector<64x32xbf16>, vector<32x256xbf16>, vector<64x256xf32> -> vector<64x256xf32>
    %c0_10 = arith.constant 0 : index
    %c0_11 = arith.constant 0 : index
    %c32 = arith.constant 32 : index
    %23 = vector.load %arg5[%c0_10, %c0_11, %c32] : memref<6x64x64xbf16, #tpu.memory_space<vmem>>, vector<1x64x32xbf16>
    %24 = vector.shape_cast %23 : vector<1x64x32xbf16> to vector<64x32xbf16>
    %cst_12 = arith.constant dense<0.000000e+00> : vector<64x256xf32>
    %25 = tpu.matmul %24, %19, %cst_12 {dimension_numbers = #tpu.dot_dimension_numbers<[1], [0], [0], [1], [0, 0, 1, 1], [], []>} : vector<64x32xbf16>, vector<32x256xbf16>, vector<64x256xf32> -> vector<64x256xf32>
    %26 = arith.addf %22, %25 : vector<64x256xf32>
    %c0_13 = arith.constant 0 : index
    %c0_14 = arith.constant 0 : index
    %c0_15 = arith.constant 0 : index
    %27 = vector.load %arg6[%c0_13, %c0_14, %c0_15] : memref<6x64x1xf32, #tpu.memory_space<vmem>>, vector<1x64x1xf32>
    %28 = vector.shape_cast %27 : vector<1x64x1xf32> to vector<64x1xf32>
    %29 = vector.broadcast %28 : vector<64x1xf32> to vector<64x256xf32>
    %30 = arith.addf %26, %29 : vector<64x256xf32>
    %31 = vector.extract_strided_slice %30 {offsets = [0, 0], sizes = [32, 256], strides = [1, 1]} : vector<64x256xf32> to vector<32x256xf32>
    %32 = math.tanh %31 : vector<32x256xf32>
    %33 = vector.extract_strided_slice %30 {offsets = [32, 0], sizes = [32, 256], strides = [1, 1]} : vector<64x256xf32> to vector<32x256xf32>
    %34 = arith.negf %33 : vector<32x256xf32>
    %35 = math.exp %34 : vector<32x256xf32>
    %cst_16 = arith.constant 1.000000e+00 : f32
    %36 = vector.broadcast %cst_16 : f32 to vector<32x256xf32>
    %37 = arith.addf %36, %35 : vector<32x256xf32>
    %38 = arith.divf %36, %37 : vector<32x256xf32>
    %39 = arith.mulf %32, %38 : vector<32x256xf32>
    %c0_17 = arith.constant 0 : index
    %c0_18 = arith.constant 0 : index
    %c0_19 = arith.constant 0 : index
    %40 = vector.load %arg7[%c0_17, %c0_18, %c0_19] : memref<6x64x32xbf16, #tpu.memory_space<vmem>>, vector<1x64x32xbf16>
    %41 = vector.shape_cast %40 : vector<1x64x32xbf16> to vector<64x32xbf16>
    %42 = arith.truncf %39 : vector<32x256xf32> to vector<32x256xbf16>
    %cst_20 = arith.constant dense<0.000000e+00> : vector<64x256xf32>
    %43 = tpu.matmul %41, %42, %cst_20 {dimension_numbers = #tpu.dot_dimension_numbers<[1], [0], [0], [1], [0, 0, 1, 1], [], []>} : vector<64x32xbf16>, vector<32x256xbf16>, vector<64x256xf32> -> vector<64x256xf32>
    %c0_21 = arith.constant 0 : index
    %c0_22 = arith.constant 0 : index
    %c0_23 = arith.constant 0 : index
    %44 = vector.load %arg8[%c0_21, %c0_22, %c0_23] : memref<6x64x1xf32, #tpu.memory_space<vmem>>, vector<1x64x1xf32>
    %45 = vector.shape_cast %44 : vector<1x64x1xf32> to vector<64x1xf32>
    %46 = vector.broadcast %45 : vector<64x1xf32> to vector<64x256xf32>
    %47 = arith.addf %43, %46 : vector<64x256xf32>
    %48 = vector.extract_strided_slice %47 {offsets = [0, 0], sizes = [32, 256], strides = [1, 1]} : vector<64x256xf32> to vector<32x256xf32>
    %49 = arith.addf %15, %48 : vector<32x256xf32>
    %50 = vector.extract_strided_slice %47 {offsets = [32, 0], sizes = [32, 256], strides = [1, 1]} : vector<64x256xf32> to vector<32x256xf32>
    %51 = arith.addf %16, %50 : vector<32x256xf32>
    %c2_i32 = arith.constant 2 : i32
    %52 = tpu.dynamic_rotate %49 by %c2_i32 dim 1 : vector<32x256xf32>, i32 -> vector<32x256xf32>
    %53 = arith.truncf %52 : vector<32x256xf32> to vector<32x256xbf16>
    %54 = arith.truncf %49 : vector<32x256xf32> to vector<32x256xbf16>
    %c1 = arith.constant 1 : index
    %c0_24 = arith.constant 0 : index
    %c0_25 = arith.constant 0 : index
    %55 = vector.load %arg5[%c1, %c0_24, %c0_25] : memref<6x64x64xbf16, #tpu.memory_space<vmem>>, vector<1x64x32xbf16>
    %56 = vector.shape_cast %55 : vector<1x64x32xbf16> to vector<64x32xbf16>
    %cst_26 = arith.constant dense<0.000000e+00> : vector<64x256xf32>
    %57 = tpu.matmul %56, %53, %cst_26 {dimension_numbers = #tpu.dot_dimension_numbers<[1], [0], [0], [1], [0, 0, 1, 1], [], []>} : vector<64x32xbf16>, vector<32x256xbf16>, vector<64x256xf32> -> vector<64x256xf32>
    %c1_27 = arith.constant 1 : index
    %c0_28 = arith.constant 0 : index
    %c32_29 = arith.constant 32 : index
    %58 = vector.load %arg5[%c1_27, %c0_28, %c32_29] : memref<6x64x64xbf16, #tpu.memory_space<vmem>>, vector<1x64x32xbf16>
    %59 = vector.shape_cast %58 : vector<1x64x32xbf16> to vector<64x32xbf16>
    %cst_30 = arith.constant dense<0.000000e+00> : vector<64x256xf32>
    %60 = tpu.matmul %59, %54, %cst_30 {dimension_numbers = #tpu.dot_dimension_numbers<[1], [0], [0], [1], [0, 0, 1, 1], [], []>} : vector<64x32xbf16>, vector<32x256xbf16>, vector<64x256xf32> -> vector<64x256xf32>
    %61 = arith.addf %57, %60 : vector<64x256xf32>
    %c1_31 = arith.constant 1 : index
    %c0_32 = arith.constant 0 : index
    %c0_33 = arith.constant 0 : index
    %62 = vector.load %arg6[%c1_31, %c0_32, %c0_33] : memref<6x64x1xf32, #tpu.memory_space<vmem>>, vector<1x64x1xf32>
    %63 = vector.shape_cast %62 : vector<1x64x1xf32> to vector<64x1xf32>
    %64 = vector.broadcast %63 : vector<64x1xf32> to vector<64x256xf32>
    %65 = arith.addf %61, %64 : vector<64x256xf32>
    %66 = vector.extract_strided_slice %65 {offsets = [0, 0], sizes = [32, 256], strides = [1, 1]} : vector<64x256xf32> to vector<32x256xf32>
    %67 = math.tanh %66 : vector<32x256xf32>
    %68 = vector.extract_strided_slice %65 {offsets = [32, 0], sizes = [32, 256], strides = [1, 1]} : vector<64x256xf32> to vector<32x256xf32>
    %69 = arith.negf %68 : vector<32x256xf32>
    %70 = math.exp %69 : vector<32x256xf32>
    %cst_34 = arith.constant 1.000000e+00 : f32
    %71 = vector.broadcast %cst_34 : f32 to vector<32x256xf32>
    %72 = arith.addf %71, %70 : vector<32x256xf32>
    %73 = arith.divf %71, %72 : vector<32x256xf32>
    %74 = arith.mulf %67, %73 : vector<32x256xf32>
    %c1_35 = arith.constant 1 : index
    %c0_36 = arith.constant 0 : index
    %c0_37 = arith.constant 0 : index
    %75 = vector.load %arg7[%c1_35, %c0_36, %c0_37] : memref<6x64x32xbf16, #tpu.memory_space<vmem>>, vector<1x64x32xbf16>
    %76 = vector.shape_cast %75 : vector<1x64x32xbf16> to vector<64x32xbf16>
    %77 = arith.truncf %74 : vector<32x256xf32> to vector<32x256xbf16>
    %cst_38 = arith.constant dense<0.000000e+00> : vector<64x256xf32>
    %78 = tpu.matmul %76, %77, %cst_38 {dimension_numbers = #tpu.dot_dimension_numbers<[1], [0], [0], [1], [0, 0, 1, 1], [], []>} : vector<64x32xbf16>, vector<32x256xbf16>, vector<64x256xf32> -> vector<64x256xf32>
    %c1_39 = arith.constant 1 : index
    %c0_40 = arith.constant 0 : index
    %c0_41 = arith.constant 0 : index
    %79 = vector.load %arg8[%c1_39, %c0_40, %c0_41] : memref<6x64x1xf32, #tpu.memory_space<vmem>>, vector<1x64x1xf32>
    %80 = vector.shape_cast %79 : vector<1x64x1xf32> to vector<64x1xf32>
    %81 = vector.broadcast %80 : vector<64x1xf32> to vector<64x256xf32>
    %82 = arith.addf %78, %81 : vector<64x256xf32>
    %83 = vector.extract_strided_slice %82 {offsets = [0, 0], sizes = [32, 256], strides = [1, 1]} : vector<64x256xf32> to vector<32x256xf32>
    %84 = arith.addf %49, %83 : vector<32x256xf32>
    %85 = vector.extract_strided_slice %82 {offsets = [32, 0], sizes = [32, 256], strides = [1, 1]} : vector<64x256xf32> to vector<32x256xf32>
    %86 = arith.addf %51, %85 : vector<32x256xf32>
    %c4_i32 = arith.constant 4 : i32
    %87 = tpu.dynamic_rotate %84 by %c4_i32 dim 1 : vector<32x256xf32>, i32 -> vector<32x256xf32>
    %88 = arith.truncf %87 : vector<32x256xf32> to vector<32x256xbf16>
    %89 = arith.truncf %84 : vector<32x256xf32> to vector<32x256xbf16>
    %c2 = arith.constant 2 : index
    %c0_42 = arith.constant 0 : index
    %c0_43 = arith.constant 0 : index
    %90 = vector.load %arg5[%c2, %c0_42, %c0_43] : memref<6x64x64xbf16, #tpu.memory_space<vmem>>, vector<1x64x32xbf16>
    %91 = vector.shape_cast %90 : vector<1x64x32xbf16> to vector<64x32xbf16>
    %cst_44 = arith.constant dense<0.000000e+00> : vector<64x256xf32>
    %92 = tpu.matmul %91, %88, %cst_44 {dimension_numbers = #tpu.dot_dimension_numbers<[1], [0], [0], [1], [0, 0, 1, 1], [], []>} : vector<64x32xbf16>, vector<32x256xbf16>, vector<64x256xf32> -> vector<64x256xf32>
    %c2_45 = arith.constant 2 : index
    %c0_46 = arith.constant 0 : index
    %c32_47 = arith.constant 32 : index
    %93 = vector.load %arg5[%c2_45, %c0_46, %c32_47] : memref<6x64x64xbf16, #tpu.memory_space<vmem>>, vector<1x64x32xbf16>
    %94 = vector.shape_cast %93 : vector<1x64x32xbf16> to vector<64x32xbf16>
    %cst_48 = arith.constant dense<0.000000e+00> : vector<64x256xf32>
    %95 = tpu.matmul %94, %89, %cst_48 {dimension_numbers = #tpu.dot_dimension_numbers<[1], [0], [0], [1], [0, 0, 1, 1], [], []>} : vector<64x32xbf16>, vector<32x256xbf16>, vector<64x256xf32> -> vector<64x256xf32>
    %96 = arith.addf %92, %95 : vector<64x256xf32>
    %c2_49 = arith.constant 2 : index
    %c0_50 = arith.constant 0 : index
    %c0_51 = arith.constant 0 : index
    %97 = vector.load %arg6[%c2_49, %c0_50, %c0_51] : memref<6x64x1xf32, #tpu.memory_space<vmem>>, vector<1x64x1xf32>
    %98 = vector.shape_cast %97 : vector<1x64x1xf32> to vector<64x1xf32>
    %99 = vector.broadcast %98 : vector<64x1xf32> to vector<64x256xf32>
    %100 = arith.addf %96, %99 : vector<64x256xf32>
    %101 = vector.extract_strided_slice %100 {offsets = [0, 0], sizes = [32, 256], strides = [1, 1]} : vector<64x256xf32> to vector<32x256xf32>
    %102 = math.tanh %101 : vector<32x256xf32>
    %103 = vector.extract_strided_slice %100 {offsets = [32, 0], sizes = [32, 256], strides = [1, 1]} : vector<64x256xf32> to vector<32x256xf32>
    %104 = arith.negf %103 : vector<32x256xf32>
    %105 = math.exp %104 : vector<32x256xf32>
    %cst_52 = arith.constant 1.000000e+00 : f32
    %106 = vector.broadcast %cst_52 : f32 to vector<32x256xf32>
    %107 = arith.addf %106, %105 : vector<32x256xf32>
    %108 = arith.divf %106, %107 : vector<32x256xf32>
    %109 = arith.mulf %102, %108 : vector<32x256xf32>
    %c2_53 = arith.constant 2 : index
    %c0_54 = arith.constant 0 : index
    %c0_55 = arith.constant 0 : index
    %110 = vector.load %arg7[%c2_53, %c0_54, %c0_55] : memref<6x64x32xbf16, #tpu.memory_space<vmem>>, vector<1x64x32xbf16>
    %111 = vector.shape_cast %110 : vector<1x64x32xbf16> to vector<64x32xbf16>
    %112 = arith.truncf %109 : vector<32x256xf32> to vector<32x256xbf16>
    %cst_56 = arith.constant dense<0.000000e+00> : vector<64x256xf32>
    %113 = tpu.matmul %111, %112, %cst_56 {dimension_numbers = #tpu.dot_dimension_numbers<[1], [0], [0], [1], [0, 0, 1, 1], [], []>} : vector<64x32xbf16>, vector<32x256xbf16>, vector<64x256xf32> -> vector<64x256xf32>
    %c2_57 = arith.constant 2 : index
    %c0_58 = arith.constant 0 : index
    %c0_59 = arith.constant 0 : index
    %114 = vector.load %arg8[%c2_57, %c0_58, %c0_59] : memref<6x64x1xf32, #tpu.memory_space<vmem>>, vector<1x64x1xf32>
    %115 = vector.shape_cast %114 : vector<1x64x1xf32> to vector<64x1xf32>
    %116 = vector.broadcast %115 : vector<64x1xf32> to vector<64x256xf32>
    %117 = arith.addf %113, %116 : vector<64x256xf32>
    %118 = vector.extract_strided_slice %117 {offsets = [0, 0], sizes = [32, 256], strides = [1, 1]} : vector<64x256xf32> to vector<32x256xf32>
    %119 = arith.addf %84, %118 : vector<32x256xf32>
    %120 = vector.extract_strided_slice %117 {offsets = [32, 0], sizes = [32, 256], strides = [1, 1]} : vector<64x256xf32> to vector<32x256xf32>
    %121 = arith.addf %86, %120 : vector<32x256xf32>
    %c1_i32_60 = arith.constant 1 : i32
    %122 = tpu.dynamic_rotate %119 by %c1_i32_60 dim 1 : vector<32x256xf32>, i32 -> vector<32x256xf32>
    %123 = arith.truncf %122 : vector<32x256xf32> to vector<32x256xbf16>
    %124 = arith.truncf %119 : vector<32x256xf32> to vector<32x256xbf16>
    %c3 = arith.constant 3 : index
    %c0_61 = arith.constant 0 : index
    %c0_62 = arith.constant 0 : index
    %125 = vector.load %arg5[%c3, %c0_61, %c0_62] : memref<6x64x64xbf16, #tpu.memory_space<vmem>>, vector<1x64x32xbf16>
    %126 = vector.shape_cast %125 : vector<1x64x32xbf16> to vector<64x32xbf16>
    %cst_63 = arith.constant dense<0.000000e+00> : vector<64x256xf32>
    %127 = tpu.matmul %126, %123, %cst_63 {dimension_numbers = #tpu.dot_dimension_numbers<[1], [0], [0], [1], [0, 0, 1, 1], [], []>} : vector<64x32xbf16>, vector<32x256xbf16>, vector<64x256xf32> -> vector<64x256xf32>
    %c3_64 = arith.constant 3 : index
    %c0_65 = arith.constant 0 : index
    %c32_66 = arith.constant 32 : index
    %128 = vector.load %arg5[%c3_64, %c0_65, %c32_66] : memref<6x64x64xbf16, #tpu.memory_space<vmem>>, vector<1x64x32xbf16>
    %129 = vector.shape_cast %128 : vector<1x64x32xbf16> to vector<64x32xbf16>
    %cst_67 = arith.constant dense<0.000000e+00> : vector<64x256xf32>
    %130 = tpu.matmul %129, %124, %cst_67 {dimension_numbers = #tpu.dot_dimension_numbers<[1], [0], [0], [1], [0, 0, 1, 1], [], []>} : vector<64x32xbf16>, vector<32x256xbf16>, vector<64x256xf32> -> vector<64x256xf32>
    %131 = arith.addf %127, %130 : vector<64x256xf32>
    %c3_68 = arith.constant 3 : index
    %c0_69 = arith.constant 0 : index
    %c0_70 = arith.constant 0 : index
    %132 = vector.load %arg6[%c3_68, %c0_69, %c0_70] : memref<6x64x1xf32, #tpu.memory_space<vmem>>, vector<1x64x1xf32>
    %133 = vector.shape_cast %132 : vector<1x64x1xf32> to vector<64x1xf32>
    %134 = vector.broadcast %133 : vector<64x1xf32> to vector<64x256xf32>
    %135 = arith.addf %131, %134 : vector<64x256xf32>
    %136 = vector.extract_strided_slice %135 {offsets = [0, 0], sizes = [32, 256], strides = [1, 1]} : vector<64x256xf32> to vector<32x256xf32>
    %137 = math.tanh %136 : vector<32x256xf32>
    %138 = vector.extract_strided_slice %135 {offsets = [32, 0], sizes = [32, 256], strides = [1, 1]} : vector<64x256xf32> to vector<32x256xf32>
    %139 = arith.negf %138 : vector<32x256xf32>
    %140 = math.exp %139 : vector<32x256xf32>
    %cst_71 = arith.constant 1.000000e+00 : f32
    %141 = vector.broadcast %cst_71 : f32 to vector<32x256xf32>
    %142 = arith.addf %141, %140 : vector<32x256xf32>
    %143 = arith.divf %141, %142 : vector<32x256xf32>
    %144 = arith.mulf %137, %143 : vector<32x256xf32>
    %c3_72 = arith.constant 3 : index
    %c0_73 = arith.constant 0 : index
    %c0_74 = arith.constant 0 : index
    %145 = vector.load %arg7[%c3_72, %c0_73, %c0_74] : memref<6x64x32xbf16, #tpu.memory_space<vmem>>, vector<1x64x32xbf16>
    %146 = vector.shape_cast %145 : vector<1x64x32xbf16> to vector<64x32xbf16>
    %147 = arith.truncf %144 : vector<32x256xf32> to vector<32x256xbf16>
    %cst_75 = arith.constant dense<0.000000e+00> : vector<64x256xf32>
    %148 = tpu.matmul %146, %147, %cst_75 {dimension_numbers = #tpu.dot_dimension_numbers<[1], [0], [0], [1], [0, 0, 1, 1], [], []>} : vector<64x32xbf16>, vector<32x256xbf16>, vector<64x256xf32> -> vector<64x256xf32>
    %c3_76 = arith.constant 3 : index
    %c0_77 = arith.constant 0 : index
    %c0_78 = arith.constant 0 : index
    %149 = vector.load %arg8[%c3_76, %c0_77, %c0_78] : memref<6x64x1xf32, #tpu.memory_space<vmem>>, vector<1x64x1xf32>
    %150 = vector.shape_cast %149 : vector<1x64x1xf32> to vector<64x1xf32>
    %151 = vector.broadcast %150 : vector<64x1xf32> to vector<64x256xf32>
    %152 = arith.addf %148, %151 : vector<64x256xf32>
    %153 = vector.extract_strided_slice %152 {offsets = [0, 0], sizes = [32, 256], strides = [1, 1]} : vector<64x256xf32> to vector<32x256xf32>
    %154 = arith.addf %119, %153 : vector<32x256xf32>
    %155 = vector.extract_strided_slice %152 {offsets = [32, 0], sizes = [32, 256], strides = [1, 1]} : vector<64x256xf32> to vector<32x256xf32>
    %156 = arith.addf %121, %155 : vector<32x256xf32>
    %c2_i32_79 = arith.constant 2 : i32
    %157 = tpu.dynamic_rotate %154 by %c2_i32_79 dim 1 : vector<32x256xf32>, i32 -> vector<32x256xf32>
    %158 = arith.truncf %157 : vector<32x256xf32> to vector<32x256xbf16>
    %159 = arith.truncf %154 : vector<32x256xf32> to vector<32x256xbf16>
    %c4 = arith.constant 4 : index
    %c0_80 = arith.constant 0 : index
    %c0_81 = arith.constant 0 : index
    %160 = vector.load %arg5[%c4, %c0_80, %c0_81] : memref<6x64x64xbf16, #tpu.memory_space<vmem>>, vector<1x64x32xbf16>
    %161 = vector.shape_cast %160 : vector<1x64x32xbf16> to vector<64x32xbf16>
    %cst_82 = arith.constant dense<0.000000e+00> : vector<64x256xf32>
    %162 = tpu.matmul %161, %158, %cst_82 {dimension_numbers = #tpu.dot_dimension_numbers<[1], [0], [0], [1], [0, 0, 1, 1], [], []>} : vector<64x32xbf16>, vector<32x256xbf16>, vector<64x256xf32> -> vector<64x256xf32>
    %c4_83 = arith.constant 4 : index
    %c0_84 = arith.constant 0 : index
    %c32_85 = arith.constant 32 : index
    %163 = vector.load %arg5[%c4_83, %c0_84, %c32_85] : memref<6x64x64xbf16, #tpu.memory_space<vmem>>, vector<1x64x32xbf16>
    %164 = vector.shape_cast %163 : vector<1x64x32xbf16> to vector<64x32xbf16>
    %cst_86 = arith.constant dense<0.000000e+00> : vector<64x256xf32>
    %165 = tpu.matmul %164, %159, %cst_86 {dimension_numbers = #tpu.dot_dimension_numbers<[1], [0], [0], [1], [0, 0, 1, 1], [], []>} : vector<64x32xbf16>, vector<32x256xbf16>, vector<64x256xf32> -> vector<64x256xf32>
    %166 = arith.addf %162, %165 : vector<64x256xf32>
    %c4_87 = arith.constant 4 : index
    %c0_88 = arith.constant 0 : index
    %c0_89 = arith.constant 0 : index
    %167 = vector.load %arg6[%c4_87, %c0_88, %c0_89] : memref<6x64x1xf32, #tpu.memory_space<vmem>>, vector<1x64x1xf32>
    %168 = vector.shape_cast %167 : vector<1x64x1xf32> to vector<64x1xf32>
    %169 = vector.broadcast %168 : vector<64x1xf32> to vector<64x256xf32>
    %170 = arith.addf %166, %169 : vector<64x256xf32>
    %171 = vector.extract_strided_slice %170 {offsets = [0, 0], sizes = [32, 256], strides = [1, 1]} : vector<64x256xf32> to vector<32x256xf32>
    %172 = math.tanh %171 : vector<32x256xf32>
    %173 = vector.extract_strided_slice %170 {offsets = [32, 0], sizes = [32, 256], strides = [1, 1]} : vector<64x256xf32> to vector<32x256xf32>
    %174 = arith.negf %173 : vector<32x256xf32>
    %175 = math.exp %174 : vector<32x256xf32>
    %cst_90 = arith.constant 1.000000e+00 : f32
    %176 = vector.broadcast %cst_90 : f32 to vector<32x256xf32>
    %177 = arith.addf %176, %175 : vector<32x256xf32>
    %178 = arith.divf %176, %177 : vector<32x256xf32>
    %179 = arith.mulf %172, %178 : vector<32x256xf32>
    %c4_91 = arith.constant 4 : index
    %c0_92 = arith.constant 0 : index
    %c0_93 = arith.constant 0 : index
    %180 = vector.load %arg7[%c4_91, %c0_92, %c0_93] : memref<6x64x32xbf16, #tpu.memory_space<vmem>>, vector<1x64x32xbf16>
    %181 = vector.shape_cast %180 : vector<1x64x32xbf16> to vector<64x32xbf16>
    %182 = arith.truncf %179 : vector<32x256xf32> to vector<32x256xbf16>
    %cst_94 = arith.constant dense<0.000000e+00> : vector<64x256xf32>
    %183 = tpu.matmul %181, %182, %cst_94 {dimension_numbers = #tpu.dot_dimension_numbers<[1], [0], [0], [1], [0, 0, 1, 1], [], []>} : vector<64x32xbf16>, vector<32x256xbf16>, vector<64x256xf32> -> vector<64x256xf32>
    %c4_95 = arith.constant 4 : index
    %c0_96 = arith.constant 0 : index
    %c0_97 = arith.constant 0 : index
    %184 = vector.load %arg8[%c4_95, %c0_96, %c0_97] : memref<6x64x1xf32, #tpu.memory_space<vmem>>, vector<1x64x1xf32>
    %185 = vector.shape_cast %184 : vector<1x64x1xf32> to vector<64x1xf32>
    %186 = vector.broadcast %185 : vector<64x1xf32> to vector<64x256xf32>
    %187 = arith.addf %183, %186 : vector<64x256xf32>
    %188 = vector.extract_strided_slice %187 {offsets = [0, 0], sizes = [32, 256], strides = [1, 1]} : vector<64x256xf32> to vector<32x256xf32>
    %189 = arith.addf %154, %188 : vector<32x256xf32>
    %190 = vector.extract_strided_slice %187 {offsets = [32, 0], sizes = [32, 256], strides = [1, 1]} : vector<64x256xf32> to vector<32x256xf32>
    %191 = arith.addf %156, %190 : vector<32x256xf32>
    %c4_i32_98 = arith.constant 4 : i32
    %192 = tpu.dynamic_rotate %189 by %c4_i32_98 dim 1 : vector<32x256xf32>, i32 -> vector<32x256xf32>
    %193 = arith.truncf %192 : vector<32x256xf32> to vector<32x256xbf16>
    %194 = arith.truncf %189 : vector<32x256xf32> to vector<32x256xbf16>
    %c5 = arith.constant 5 : index
    %c0_99 = arith.constant 0 : index
    %c0_100 = arith.constant 0 : index
    %195 = vector.load %arg5[%c5, %c0_99, %c0_100] : memref<6x64x64xbf16, #tpu.memory_space<vmem>>, vector<1x64x32xbf16>
    %196 = vector.shape_cast %195 : vector<1x64x32xbf16> to vector<64x32xbf16>
    %cst_101 = arith.constant dense<0.000000e+00> : vector<64x256xf32>
    %197 = tpu.matmul %196, %193, %cst_101 {dimension_numbers = #tpu.dot_dimension_numbers<[1], [0], [0], [1], [0, 0, 1, 1], [], []>} : vector<64x32xbf16>, vector<32x256xbf16>, vector<64x256xf32> -> vector<64x256xf32>
    %c5_102 = arith.constant 5 : index
    %c0_103 = arith.constant 0 : index
    %c32_104 = arith.constant 32 : index
    %198 = vector.load %arg5[%c5_102, %c0_103, %c32_104] : memref<6x64x64xbf16, #tpu.memory_space<vmem>>, vector<1x64x32xbf16>
    %199 = vector.shape_cast %198 : vector<1x64x32xbf16> to vector<64x32xbf16>
    %cst_105 = arith.constant dense<0.000000e+00> : vector<64x256xf32>
    %200 = tpu.matmul %199, %194, %cst_105 {dimension_numbers = #tpu.dot_dimension_numbers<[1], [0], [0], [1], [0, 0, 1, 1], [], []>} : vector<64x32xbf16>, vector<32x256xbf16>, vector<64x256xf32> -> vector<64x256xf32>
    %201 = arith.addf %197, %200 : vector<64x256xf32>
    %c5_106 = arith.constant 5 : index
    %c0_107 = arith.constant 0 : index
    %c0_108 = arith.constant 0 : index
    %202 = vector.load %arg6[%c5_106, %c0_107, %c0_108] : memref<6x64x1xf32, #tpu.memory_space<vmem>>, vector<1x64x1xf32>
    %203 = vector.shape_cast %202 : vector<1x64x1xf32> to vector<64x1xf32>
    %204 = vector.broadcast %203 : vector<64x1xf32> to vector<64x256xf32>
    %205 = arith.addf %201, %204 : vector<64x256xf32>
    %206 = vector.extract_strided_slice %205 {offsets = [0, 0], sizes = [32, 256], strides = [1, 1]} : vector<64x256xf32> to vector<32x256xf32>
    %207 = math.tanh %206 : vector<32x256xf32>
    %208 = vector.extract_strided_slice %205 {offsets = [32, 0], sizes = [32, 256], strides = [1, 1]} : vector<64x256xf32> to vector<32x256xf32>
    %209 = arith.negf %208 : vector<32x256xf32>
    %210 = math.exp %209 : vector<32x256xf32>
    %cst_109 = arith.constant 1.000000e+00 : f32
    %211 = vector.broadcast %cst_109 : f32 to vector<32x256xf32>
    %212 = arith.addf %211, %210 : vector<32x256xf32>
    %213 = arith.divf %211, %212 : vector<32x256xf32>
    %214 = arith.mulf %207, %213 : vector<32x256xf32>
    %c5_110 = arith.constant 5 : index
    %c0_111 = arith.constant 0 : index
    %c0_112 = arith.constant 0 : index
    %215 = vector.load %arg7[%c5_110, %c0_111, %c0_112] : memref<6x64x32xbf16, #tpu.memory_space<vmem>>, vector<1x64x32xbf16>
    %216 = vector.shape_cast %215 : vector<1x64x32xbf16> to vector<64x32xbf16>
    %217 = arith.truncf %214 : vector<32x256xf32> to vector<32x256xbf16>
    %cst_113 = arith.constant dense<0.000000e+00> : vector<64x256xf32>
    %218 = tpu.matmul %216, %217, %cst_113 {dimension_numbers = #tpu.dot_dimension_numbers<[1], [0], [0], [1], [0, 0, 1, 1], [], []>} : vector<64x32xbf16>, vector<32x256xbf16>, vector<64x256xf32> -> vector<64x256xf32>
    %c5_114 = arith.constant 5 : index
    %c0_115 = arith.constant 0 : index
    %c0_116 = arith.constant 0 : index
    %219 = vector.load %arg8[%c5_114, %c0_115, %c0_116] : memref<6x64x1xf32, #tpu.memory_space<vmem>>, vector<1x64x1xf32>
    %220 = vector.shape_cast %219 : vector<1x64x1xf32> to vector<64x1xf32>
    %221 = vector.broadcast %220 : vector<64x1xf32> to vector<64x256xf32>
    %222 = arith.addf %218, %221 : vector<64x256xf32>
    %223 = vector.extract_strided_slice %222 {offsets = [32, 0], sizes = [32, 256], strides = [1, 1]} : vector<64x256xf32> to vector<32x256xf32>
    %224 = arith.addf %191, %223 : vector<32x256xf32>
    %225 = vector.extract_strided_slice %224 {offsets = [0, 128], sizes = [32, 128], strides = [1, 1]} : vector<32x256xf32> to vector<32x128xf32>
    %cst_117 = arith.constant 0.000000e+00 : f32
    %226 = vector.broadcast %cst_117 : f32 to vector<32x128xf32>
    %227 = arith.maximumf %225, %226 : vector<32x128xf32>
    %228 = arith.truncf %227 : vector<32x128xf32> to vector<32x128xbf16>
    %c0_118 = arith.constant 0 : index
    %c0_119 = arith.constant 0 : index
    %229 = vector.load %arg9[%c0_118, %c0_119] : memref<32x32xbf16, #tpu.memory_space<vmem>>, vector<32x32xbf16>
    %cst_120 = arith.constant dense<0.000000e+00> : vector<32x128xf32>
    %230 = tpu.matmul %229, %228, %cst_120 {dimension_numbers = #tpu.dot_dimension_numbers<[1], [0], [0], [1], [0, 0, 1, 1], [], []>} : vector<32x32xbf16>, vector<32x128xbf16>, vector<32x128xf32> -> vector<32x128xf32>
    %c0_121 = arith.constant 0 : index
    %c0_122 = arith.constant 0 : index
    %231 = vector.load %arg10[%c0_121, %c0_122] : memref<32x1xf32, #tpu.memory_space<vmem>>, vector<32x1xf32>
    %232 = vector.broadcast %231 : vector<32x1xf32> to vector<32x128xf32>
    %233 = arith.addf %230, %232 : vector<32x128xf32>
    %cst_123 = arith.constant 0.000000e+00 : f32
    %234 = vector.broadcast %cst_123 : f32 to vector<32x128xf32>
    %235 = arith.maximumf %233, %234 : vector<32x128xf32>
    %c0_124 = arith.constant 0 : index
    %c0_125 = arith.constant 0 : index
    %236 = vector.load %arg11[%c0_124, %c0_125] : memref<16x32xbf16, #tpu.memory_space<vmem>>, vector<16x32xbf16>
    %237 = arith.truncf %235 : vector<32x128xf32> to vector<32x128xbf16>
    %cst_126 = arith.constant dense<0.000000e+00> : vector<16x128xf32>
    %238 = tpu.matmul %236, %237, %cst_126 {dimension_numbers = #tpu.dot_dimension_numbers<[1], [0], [0], [1], [0, 0, 1, 1], [], []>} : vector<16x32xbf16>, vector<32x128xbf16>, vector<16x128xf32> -> vector<16x128xf32>
    %c0_127 = arith.constant 0 : index
    %c0_128 = arith.constant 0 : index
    %239 = vector.load %arg12[%c0_127, %c0_128] : memref<16x1xf32, #tpu.memory_space<vmem>>, vector<16x1xf32>
    %240 = vector.broadcast %239 : vector<16x1xf32> to vector<16x128xf32>
    %241 = arith.addf %238, %240 : vector<16x128xf32>
    %c0_129 = arith.constant 0 : index
    %c0_130 = arith.constant 0 : index
    %c0_131 = arith.constant 0 : index
    %242 = vector.load %arg13[%c0_129, %c0_130, %c0_131] : memref<1x16x128xf32, #tpu.memory_space<vmem>>, vector<1x16x128xf32>
    %243 = vector.shape_cast %242 : vector<1x16x128xf32> to vector<16x128xf32>
    %244 = vector.shape_cast %241 : vector<16x128xf32> to vector<1x16x128xf32>
    tpu.vector_store %arg13[%c0_129, %c0_130, %c0_131], %244 {strides = array<i32>} : memref<1x16x128xf32, #tpu.memory_space<vmem>>, vector<1x16x128xf32>,
    return
  }
  func.func @transform_0(%arg0: i32, %arg1: i32) -> (i32, i32, i32) {
    %c0_i32 = arith.constant 0 : i32
    %c0_i32_0 = arith.constant 0 : i32
    %c0_i32_1 = arith.constant 0 : i32
    return %arg0, %c0_i32, %c0_i32_0 : i32, i32, i32
  }
  func.func @transform_1(%arg0: i32, %arg1: i32) -> (i32, i32) {
    %c0_i32 = arith.constant 0 : i32
    %c0_i32_0 = arith.constant 0 : i32
    %c0_i32_1 = arith.constant 0 : i32
    return %c0_i32, %c0_i32_0 : i32, i32
  }
  func.func @transform_2(%arg0: i32, %arg1: i32) -> (i32, i32) {
    %c0_i32 = arith.constant 0 : i32
    %c0_i32_0 = arith.constant 0 : i32
    %c0_i32_1 = arith.constant 0 : i32
    return %c0_i32, %c0_i32_0 : i32, i32
  }
  func.func @transform_3(%arg0: i32, %arg1: i32) -> (i32, i32, i32) {
    %c0_i32 = arith.constant 0 : i32
    %c0_i32_0 = arith.constant 0 : i32
    %c0_i32_1 = arith.constant 0 : i32
    %c0_i32_2 = arith.constant 0 : i32
    return %c0_i32, %c0_i32_0, %c0_i32_1 : i32, i32, i32
  }
  func.func @transform_4(%arg0: i32, %arg1: i32) -> (i32, i32, i32) {
    %c0_i32 = arith.constant 0 : i32
    %c0_i32_0 = arith.constant 0 : i32
    %c0_i32_1 = arith.constant 0 : i32
    %c0_i32_2 = arith.constant 0 : i32
    return %c0_i32, %c0_i32_0, %c0_i32_1 : i32, i32, i32
  }
  func.func @transform_5(%arg0: i32, %arg1: i32) -> (i32, i32, i32) {
    %c0_i32 = arith.constant 0 : i32
    %c0_i32_0 = arith.constant 0 : i32
    %c0_i32_1 = arith.constant 0 : i32
    %c0_i32_2 = arith.constant 0 : i32
    return %c0_i32, %c0_i32_0, %c0_i32_1 : i32, i32, i32
  }
  func.func @transform_6(%arg0: i32, %arg1: i32) -> (i32, i32, i32) {
    %c0_i32 = arith.constant 0 : i32
    %c0_i32_0 = arith.constant 0 : i32
    %c0_i32_1 = arith.constant 0 : i32
    %c0_i32_2 = arith.constant 0 : i32
    return %c0_i32, %c0_i32_0, %c0_i32_1 : i32, i32, i32
  }
  func.func @transform_7(%arg0: i32, %arg1: i32) -> (i32, i32) {
    %c0_i32 = arith.constant 0 : i32
    %c0_i32_0 = arith.constant 0 : i32
    %c0_i32_1 = arith.constant 0 : i32
    return %c0_i32, %c0_i32_0 : i32, i32
  }
  func.func @transform_8(%arg0: i32, %arg1: i32) -> (i32, i32) {
    %c0_i32 = arith.constant 0 : i32
    %c0_i32_0 = arith.constant 0 : i32
    %c0_i32_1 = arith.constant 0 : i32
    return %c0_i32, %c0_i32_0 : i32, i32
  }
  func.func @transform_9(%arg0: i32, %arg1: i32) -> (i32, i32) {
    %c0_i32 = arith.constant 0 : i32
    %c0_i32_0 = arith.constant 0 : i32
    %c0_i32_1 = arith.constant 0 : i32
    return %c0_i32, %c0_i32_0 : i32, i32
  }
  func.func @transform_10(%arg0: i32, %arg1: i32) -> (i32, i32) {
    %c0_i32 = arith.constant 0 : i32
    %c0_i32_0 = arith.constant 0 : i32
    %c0_i32_1 = arith.constant 0 : i32
    return %c0_i32, %c0_i32_0 : i32, i32
  }
  func.func @transform_11(%arg0: i32, %arg1: i32) -> (i32, i32, i32) {
    %c0_i32 = arith.constant 0 : i32
    %c0_i32_0 = arith.constant 0 : i32
    return %arg0, %c0_i32, %arg1 : i32, i32, i32
  }
}

</mosaic_0001>

<bundles_post_ra>
// kernel: wavenet_encoder.1
= control target key start
LH: loop header
LB: loop body
LE: loop exit
PB: predicated region body
PF: predicated region fallthrough
CT: control target
= control target key end

     0   :  { %s4988_s17 = smov 0   ;;  %s4990_s18 = smov 0   ;;  %s6328_s0 = inlined_call_operand.vmem [shape: s32[2,1,256], index: 0, kind: input, shape index: {}]   ;;  %s6329_s1 = inlined_call_operand.vmem [shape: bf16[32,16], index: 1, kind: input, shape index: {}]   ;;  %s6330_s2 = inlined_call_operand.vmem [shape: f32[32,1], index: 2, kind: input, shape index: {}]   ;;  %s6331_s3 = inlined_call_operand.vmem [shape: bf16[6,64,64], index: 3, kind: input, shape index: {}]   ;;  %s6332_s4 = inlined_call_operand.vmem [shape: f32[6,64,1], index: 4, kind: input, shape index: {}]   ;;  %s6333_s5 = inlined_call_operand.vmem [shape: bf16[6,64,32], index: 5, kind: input, shape index: {}]   ;;  %s6334_s6 = inlined_call_operand.vmem [shape: f32[6,64,1], index: 6, kind: input, shape index: {}]   ;;  %s6335_s7 = inlined_call_operand.vmem [shape: bf16[32,32], index: 7, kind: input, shape index: {}]   ;;  %s6336_s8 = inlined_call_operand.vmem [shape: f32[32,1], index: 8, kind: input, shape index: {}]   ;;  %s6337_s9 = inlined_call_operand.vmem [shape: bf16[16,32], index: 9, kind: input, shape index: {}]   ;;  %s6338_s10 = inlined_call_operand.vmem [shape: f32[16,1], index: 10, kind: input, shape index: {}]   ;;  %s6339_s11 = inlined_call_operand.vmem [shape: f32[2,16,128], index: 11, kind: output, shape index: {}]  }
   0x1   :  { %s4992_s19 = smov 0  }
   0x2 LB: > { %s33_s20 = sadd.s32 1, %s4914_s18  ;;  %p4025_p0 = scmp.ge.s32.totalorder %s4918_s19, 1  ;;  %s4918_s19 = sphi %s4992_s19, %s21_s19   ;;  %s4914_s18 = sphi %s4990_s18, %s6358_s18   ;;  %s4910_s17 = sphi %s4988_s17, %s6357_s17  }
   0x3   : > { %p35_p1 = scmp.ge.s32.totalorder %s33_s20, 2  ;;  %p350_p2 = scmp.lt.s32.totalorder %s4918_s19, 3 }
   0x5   : > { %s6360_s20 = smov (%p35_p1, %s33_s20), 0  ;;  %p351_p3 = pnand %p4025_p0, %p350_p2 }
   0x7   : > { %354 = sbr.rel (%p351_p3) target bundleno = 4351 (0x10ff), region = 64 }
   0xc   : > { %p392_p4 = scmp.lt.s32.totalorder %s4910_s17, 1  ;;  %v410_v0 = vlaneseq  ;;  %v6340_v1 = vmov 0   ;;  %v439_v3 = vld [vmem:[%s6330_s2] sm:$0xff]  ;;  %v441_v4 = vld [vmem:[%s6330_s2 + $0x10] sm:$0xff]  ;;  %v440_v7 = vld [vmem:[%s6330_s2 + $0x8] sm:$0xff]  ;;  %vm473_vm6 = vcmask 130048  }
   0xd   : > { %512 = vmatprep.mubr.bf16.mxu0 %v6340_v1  ;;  %4434 = vset.pattern.permute.xlu1 %v6340_v1  ;;  %v442_v9 = vld [vmem:[%s6330_s2 + $0x18] sm:$0xff]  ;;  %v4555_v13 = vld [vmem:[%s6329_s1] sm:$0xff]   ;;  %v4921_v14 = vmov 1.0|1.0   ;;  %v4556_v15 = vld [vmem:[%s6329_s1 + $0x8] sm:$0xff]   ;;  %s4922_s22 = smov 1  }
   0xe   : > { %s6362_s17 = smov (!%p392_p4, %s4910_s17), 1  ;;  %v411_v2 = vshrl.u32 %v410_v0, 7  ;;  %4433 = vset.pattern.permute.xlu0 %v6340_v1  ;;  %649 = vmatprep.mubr.bf16.mxu1 %v6340_v1  ;;  %v5073_v43 = vld [vmem:[%s6331_s3] sm:$0xff]   ;;  %v5081_v45 = vld [vmem:[%s6331_s3 + $0x8] sm:$0xff]   ;;  %s4923_s27 = smov 96   ;;  %v5088_v46 = vld [vmem:[%s6331_s3 + $0x10] sm:$0xff]  }
   0xf   : > { %s4026_s25 = sshll.u32 %s6362_s17, 1  ;;  %445 = vperm.xlu1 %4434, %v439_v3   ;;  %455 = vperm.xlu0 %4433, %v441_v4   ;;  %v5095_v47 = vld [vmem:[%s6331_s3 + $0x18] sm:$0xff]   ;;  %v781_v48 = vld [vmem:[%s6332_s4 + $0x30] sm:$0xff]  ;;  %v779_v50 = vld [vmem:[%s6332_s4 + $0x20] sm:$0xff]  ;;  %v5138_v60 = vand.u32 127, %v410_v0  ;;  %vm604_vm8 = vcmask 261120  }
  0x10   : > { %v412_v5 = vadd.s32 8, %v411_v2  ;;  %v419_v6 = vsub.s32 1, %v411_v2  ;;  %s395_s30 = scalar_lea.vmem %s6328_s0, %s4026_s25  ;;  %v415_v8 = vsub.s32 0, %v411_v2  ;;  %v782_v49 = vld [vmem:[%s6332_s4 + $0x38] sm:$0xff]  ;;  %v780_v51 = vld [vmem:[%s6332_s4 + $0x28] sm:$0xff]  ;;  %v777_v52 = vld [vmem:[%s6332_s4 + $0x10] sm:$0xff] }
  0x11   : > { %v409_v10 = vld [vmem:[%s395_s30] sm:$0x3]  ;;  %v778_v53 = vld [vmem:[%s6332_s4 + $0x18] sm:$0xff]  ;;  %v776_v55 = vld [vmem:[%s6332_s4 + $0x8] sm:$0xff]  ;;  %vm551_vm7 = vcmp.lt.s32.totalorder %v5138_v60, 1  ;;  %s4924_s24 = smov 2  }
  0x12   : > { %v420_v11 = vrot.slane %v409_v10, %v419_v6  ;;  %v416_v12 = vrot.slane %v409_v10, %v415_v8  ;;  %v775_v54 = vld [vmem:[%s6332_s4] sm:$0xff]  ;;  %v917_v56 = vld [vmem:[%s6334_s6 + $0x10] sm:$0xff]  ;;  %v918_v57 = vld [vmem:[%s6334_s6 + $0x18] sm:$0xff]  ;;  %vm1092_vm9 = vcmp.lt.s32.totalorder %v5138_v60, 2  ;;  %s4925_s30 = smov 4   ;;  %vm1636_vm10 = vcmp.lt.s32.totalorder %v5138_v60, 4 }
  0x13   : > { %450 = vperm.xlu1 %4434, %v440_v7   ;;  %460 = vperm.xlu0 %4433, %v442_v9   ;;  %v915_v58 = vld [vmem:[%s6334_s6] sm:$0xff]  ;;  %v916_v59 = vld [vmem:[%s6334_s6 + $0x8] sm:$0xff]  ;;  %vm4927_vm11 = vmmov 0  }
  0x14   : > { %vm422_vm0 = vcmp.eq.s32.totalorder %v411_v2, %v420_v11  ;;  %vm424_vm1 = vcmp.eq.s32.totalorder %v412_v5, %v420_v11  ;;  %vm421_vm2 = vcmp.eq.s32.totalorder %v411_v2, %v416_v12  ;;  %vm423_vm3 = vcmp.eq.s32.totalorder %v412_v5, %v416_v12 }
  0x15   : > { %vm4035_vm4 = vmpackc.low %vm424_vm1, %vm422_vm0 }
  0x16   : > { %4036 = vmatprep.subr.msk.bf16.mxu0 %vm4035_vm4, %v4921_v14  ;;  %vm4037_vm5 = vmpackc.low %vm423_vm3, %vm421_vm2 }
  0x17   : > { %4038 = vmatpush1.bf16.msk.msra.mxu0 %vm4037_vm5, %v4921_v14 }
  0x1a   : > { %4039 = vmatmul.mubr.msk.bf16.vlgmr.msra.gmra.mxu0 %vm473_vm6, %v4555_v13 }
  0x1b   : > { %522 = vmatprep.mubr.bf16.mxu0 %v6340_v1 }
  0x22   : > { %4040 = vmatmul.mubr.msk.bf16.gmra.mxu0 %vm473_vm6, %v4556_v15 }
  0x23   : > { %734 = vmatprep.mubr.bf16.mxu0 %v6340_v1 }
  0x8a   : > { %v446_v19 = vpop.permute.xlu1 %445  ;;  %v456_v20 = vpop.permute.xlu0 %455 }
  0x8e   : > { %v451_v24 = vpop.permute.xlu1 %450  ;;  %v461_v25 = vpop.permute.xlu0 %460 }
  0xda   : > { %v514_v16 = vpop.f32.mrf.mxu0 }
  0xdb   : > { %v5051_v35 = vadd.f32 %v514_v16, %v446_v19 }
  0xdc   : > { %v516_v17 = vpop.f32.mrf.mxu0 }
  0xdd   : > { %v5053_v36 = vadd.f32 %v516_v17, %v446_v19 }
  0xde   : > { %v518_v18 = vpop.f32.mrf.mxu0 }
  0xdf   : > { %v5041_v29 = vadd.f32 %v518_v18, %v451_v24 }
  0xe0   : > { %v520_v21 = vpop.f32.mrf.mxu0 }
  0xe1   : > { %v5043_v31 = vadd.f32 %v520_v21, %v451_v24  ;;  %v4440_v41 = vpack.i.bf16 %v5041_v29, %v5051_v35  ;;  %v564_v44 = vpack.c.bf16 %v5041_v29, %v5051_v35 }
  0xe2   : > { %v524_v22 = vpop.f32.mrf.mxu0 }
  0xe3   : > { %v5037_v27 = vadd.f32 %v524_v22, %v456_v20  ;;  %v565_v40 = vpack.c.bf16 %v5043_v31, %v5053_v36  ;;  %v4450_v42 = vpack.i.bf16 %v5043_v31, %v5053_v36 }
  0xe4   : > { %v526_v23 = vpop.f32.mrf.mxu0 }
  0xe5   : > { %v5045_v32 = vadd.f32 %v526_v23, %v456_v20 }
  0xe6   : > { %v528_v26 = vpop.f32.mrf.mxu0 }
  0xe7   : > { %v5039_v28 = vadd.f32 %v528_v26, %v461_v25 }
  0xe8   : > { %v530_v30 = vpop.f32.mrf.mxu0 }
  0xe9   : > { %v5047_v33 = vadd.f32 %v530_v30, %v461_v25  ;;  %v4435_v34 = vpack.i.bf16 %v5039_v28, %v5037_v27  ;;  %v566_v39 = vpack.c.bf16 %v5039_v28, %v5037_v27 }
  0xeb   : > { %4436 = vrot.lane.b32.xlu0 %v4435_v34, %s4922_s22  ;;  %v4445_v37 = vpack.i.bf16 %v5047_v33, %v5045_v32  ;;  %v567_v38 = vpack.c.bf16 %v5047_v33, %v5045_v32 }
  0xed   : > { %4446 = vrot.lane.b32.xlu1 %v4445_v37, %s4922_s22  ;;  %629 = vmatprep.subr.bf16.mxu1 %v567_v38 }
  0xee   : > { %630 = vmatpush1.bf16.msra.mxu1 %v566_v39 }
  0xef   : > { %631 = vmatprep.subr.bf16.mxu1 %v565_v40  ;;  %4441 = vrot.lane.b32.xlu0 %v4440_v41, %s4922_s22 }
  0xf1   : > { %4451 = vrot.lane.b32.xlu1 %v4450_v42, %s4922_s22 }
  0xf2   : > { %632 = vmatpush1.bf16.msra.mxu1 %v564_v44 }
  0xf3   : > { %596 = vrot.lane.b32.xlu0 %v5073_v43, %s4923_s27 }
  0xf5   : > { %598 = vrot.lane.b32.xlu1 %v5081_v45, %s4923_s27 }
  0xf7   : > { %600 = vrot.lane.b32.xlu0 %v5088_v46, %s4923_s27 }
  0xf9   : > { %602 = vrot.lane.b32.xlu1 %v5095_v47, %s4923_s27 }
  0xfb   : > { %815 = vperm.xlu0 %4433, %v781_v48  }
  0xfd   : > { %820 = vperm.xlu1 %4434, %v782_v49  }
  0xff   : > { %805 = vperm.xlu0 %4433, %v779_v50  }
 0x101   : > { %810 = vperm.xlu1 %4434, %v780_v51  }
 0x103   : > { %795 = vperm.xlu0 %4433, %v777_v52  }
 0x105   : > { %800 = vperm.xlu1 %4434, %v778_v53  }
 0x107   : > { %785 = vperm.xlu0 %4433, %v775_v54  }
 0x109   : > { %790 = vperm.xlu1 %4434, %v776_v55  }
 0x10b   : > { %935 = vperm.xlu0 %4433, %v917_v56  }
 0x10d   : > { %940 = vperm.xlu1 %4434, %v918_v57  }
 0x10f   : > { %925 = vperm.xlu0 %4433, %v915_v58  }
 0x111   : > { %930 = vperm.xlu1 %4434, %v916_v59  }
 0x15d   : > { %v4437_v61 = vpop.permute.xlu0 %4436 }
 0x15e   : > { %v4439_v63 = vunpack.i.h.bf16 %v4437_v61  ;;  %v4438_v2 = vunpack.i.l.bf16 %v4437_v61 }
 0x15f   : > { %v4447_v62 = vpop.permute.xlu1 %4446 }
 0x160   : > { %v4449_v3 = vunpack.i.h.bf16 %v4447_v62  ;;  %v4448_v4 = vunpack.i.l.bf16 %v4447_v62 }
 0x161   : > { %v4442_v5 = vpop.permute.xlu0 %4441 }
 0x162   : > { %v558_v6 = vsel %vm551_vm7, %v4448_v4, %v4438_v2  ;;  %v559_v7 = vsel %vm551_vm7, %v4449_v3, %v4439_v63  ;;  %v4444_v8 = vunpack.i.h.bf16 %v4442_v5  ;;  %v554_v0 = vsel %vm551_vm7, %v4438_v2, %v4448_v4 }
 0x163   : > { %v4452_v9 = vpop.permute.xlu1 %4451  ;;  %v555_v10 = vsel %vm551_vm7, %v4439_v63, %v4449_v3  ;;  %v562_v11 = vpack.c.bf16 %v559_v7, %v558_v6  ;;  %v4443_v12 = vunpack.i.l.bf16 %v4442_v5 }
 0x164   : > { %v4454_v13 = vunpack.i.h.bf16 %v4452_v9  ;;  %v4453_v14 = vunpack.i.l.bf16 %v4452_v9  ;;  %v563_v15 = vpack.c.bf16 %v555_v10, %v554_v0 }
 0x165   : > { %v597_v16 = vpop.permute.xlu0 %596 }
 0x166   : > { %v556_v17 = vsel %vm551_vm7, %v4453_v14, %v4443_v12  ;;  %v557_v18 = vsel %vm551_vm7, %v4454_v13, %v4444_v8  ;;  %714 = vmatprep.subr.bf16.mxu0 %v563_v15  ;;  %4045 = vmatmul.mubr.msk.bf16.vlgmr.msra.gmra.mxu1 %vm604_vm8, %v597_v16  ;;  %v552_v19 = vsel %vm551_vm7, %v4443_v12, %v4453_v14 }
 0x167   : > { %715 = vmatpush1.bf16.msra.mxu0 %v562_v11  ;;  %v553_v20 = vsel %vm551_vm7, %v4444_v8, %v4454_v13  ;;  %v560_v21 = vpack.c.bf16 %v557_v18, %v556_v17  ;;  %659 = vmatprep.mubr.bf16.mxu1 %v6340_v1  ;;  %v599_v23 = vpop.permute.xlu1 %598 }
 0x168   : > { %v561_v22 = vpack.c.bf16 %v553_v20, %v552_v19 }
 0x169   : > { %v601_v24 = vpop.permute.xlu0 %600 }
 0x16a   : > { %716 = vmatprep.subr.bf16.mxu0 %v561_v22 }
 0x16b   : > { %717 = vmatpush1.bf16.msra.mxu0 %v560_v21  ;;  %v603_v25 = vpop.permute.xlu1 %602 }
 0x16e   : > { %4049 = vmatmul.mubr.msk.bf16.vlgmr.msra.gmra.mxu0 %vm604_vm8, %v5073_v43  ;;  %4046 = vmatmul.mubr.msk.bf16.gmra.mxu1 %vm604_vm8, %v599_v23 }
 0x16f   : > { %744 = vmatprep.mubr.bf16.mxu0 %v6340_v1  ;;  %669 = vmatprep.mubr.bf16.mxu1 %v6340_v1 }
 0x176   : > { %4050 = vmatmul.mubr.msk.bf16.gmra.mxu0 %vm604_vm8, %v5081_v45  ;;  %4047 = vmatmul.mubr.msk.bf16.gmra.mxu1 %vm604_vm8, %v601_v24  ;;  %v816_v52 = vpop.permute.xlu0 %815 }
 0x177   : > { %754 = vmatprep.mubr.bf16.mxu0 %v6340_v1  ;;  %679 = vmatprep.mubr.bf16.mxu1 %v6340_v1 }
 0x178   : > { %v821_v56 = vpop.permute.xlu1 %820 }
 0x17a   : > { %v806_v61 = vpop.permute.xlu0 %805 }
 0x17c   : > { %v811_v6 = vpop.permute.xlu1 %810 }
 0x17e   : > { %4051 = vmatmul.mubr.msk.bf16.gmra.mxu0 %vm604_vm8, %v5088_v46  ;;  %4048 = vmatmul.mubr.msk.bf16.gmra.mxu1 %vm604_vm8, %v603_v25  ;;  %v796_v25 = vpop.permute.xlu0 %795 }
 0x17f   : > { %764 = vmatprep.mubr.bf16.mxu0 %v6340_v1  ;;  %1027 = vmatprep.mubr.bf16.mxu1 %v6340_v1 }
 0x186   : > { %4052 = vmatmul.mubr.msk.bf16.gmra.mxu0 %vm604_vm8, %v5095_v47 }
 0x187   : > { %1190 = vmatprep.mubr.bf16.mxu0 %v6340_v1 }
 0x226   : > { %v5177_v26 = vpop.f32.mrf.mxu1 }
 0x228   : > { %v5179_v30 = vpop.f32.mrf.mxu1 }
 0x22a   : > { %v5181_v34 = vpop.f32.mrf.mxu1 }
 0x22c   : > { %v5183_v37 = vpop.f32.mrf.mxu1 }
 0x22e   : > { %v5185_v38 = vpop.f32.mrf.mxu0  ;;  %v5187_v39 = vpop.f32.mrf.mxu1 }
 0x230   : > { %v738_v40 = vpop.f32.mrf.mxu0  ;;  %v5189_v41 = vpop.f32.mrf.mxu1 }
 0x232   : > { %v5191_v42 = vpop.f32.mrf.mxu0  ;;  %v5193_v43 = vpop.f32.mrf.mxu1 }
 0x234   : > { %v742_v44 = vpop.f32.mrf.mxu0  ;;  %v5195_v45 = vpop.f32.mrf.mxu1 }
 0x236   : > { %v746_v46 = vpop.f32.mrf.mxu0  ;;  %v671_v47 = vpop.f32.mrf.mxu1 }
 0x238   : > { %v748_v48 = vpop.f32.mrf.mxu0  ;;  %v673_v49 = vpop.f32.mrf.mxu1 }
 0x23a   : > { %v750_v50 = vpop.f32.mrf.mxu0  ;;  %v675_v51 = vpop.f32.mrf.mxu1 }
 0x23c   : > { %v752_v53 = vpop.f32.mrf.mxu0  ;;  %v677_v54 = vpop.f32.mrf.mxu1 }
 0x23e   : > { %v756_v55 = vpop.f32.mrf.mxu0  ;;  %v681_v57 = vpop.f32.mrf.mxu1 }
 0x23f   : > { %v757_v7 = vadd.f32 %v756_v55, %v671_v47 }
 0x240   : > { %v758_v58 = vpop.f32.mrf.mxu0  ;;  %v683_v2 = vpop.f32.mrf.mxu1 }
 0x241   : > { %v759_v59 = vadd.f32 %v758_v58, %v673_v49  ;;  %v831_v17 = vadd.f32 %v806_v61, %v757_v7 }
 0x242   : > { %v760_v62 = vpop.f32.mrf.mxu0  ;;  %v685_v12 = vpop.f32.mrf.mxu1 }
 0x243   : > { %v832_v63 = vadd.f32 %v806_v61, %v759_v59  ;;  %v761_v3 = vadd.f32 %v760_v62, %v675_v51  ;;  %v4053_v55 = vmul.f32 -1.442695, %v831_v17  ;;  %v739_v59 = vadd.f32 %v738_v40, %v5179_v30 }
 0x244   : > { %v762_v4 = vpop.f32.mrf.mxu0  ;;  %v687_v23 = vpop.f32.mrf.mxu1  ;;  %v743_v61 = vadd.f32 %v742_v44, %v5183_v37  ;;  %v747_v62 = vadd.f32 %v746_v46, %v5187_v39 }
 0x245   : > { %v763_v5 = vadd.f32 %v762_v4, %v677_v54  ;;  %v4054_v8 = vmul.f32 -1.442695, %v832_v63  ;;  %v833_v11 = vadd.f32 %v811_v6, %v761_v3  ;;  %v801_v54 = vpop.permute.xlu1 %800  ;;  %v786_v63 = vpop.permute.xlu0 %785 }
 0x246   : > { %v766_v9 = vpop.f32.mrf.mxu0  ;;  %v824_v4 = vadd.f32 %v786_v63, %v739_v59  ;;  %v827_v30 = vadd.f32 %v796_v25, %v747_v62 }
 0x247   : > { %v834_v0 = vadd.f32 %v811_v6, %v763_v5  ;;  %v767_v10 = vadd.f32 %v766_v9, %v681_v57  ;;  %4608 = vpow2.f32 %v4054_v8  ;;  %v4055_v22 = vmul.f32 -1.442695, %v833_v11 }
 0x248   : > { %v768_v13 = vpop.f32.mrf.mxu0  ;;  %v751_v5 = vadd.f32 %v750_v50, %v5193_v43  ;;  %v741_v43 = vadd.f32 %v5191_v42, %v5181_v34 }
 0x249   : > { %v4056_v14 = vmul.f32 -1.442695, %v834_v0  ;;  %v835_v15 = vadd.f32 %v816_v52, %v767_v10  ;;  %v769_v16 = vadd.f32 %v768_v13, %v683_v2  ;;  %v749_v2 = vadd.f32 %v748_v48, %v5189_v41  ;;  %v791_v3 = vpop.permute.xlu1 %790 }
 0x24a   : > { %v770_v18 = vpop.f32.mrf.mxu0  ;;  %v826_v6 = vadd.f32 %v791_v3, %v743_v61  ;;  %v829_v44 = vadd.f32 %v801_v54, %v751_v5 }
 0x24b   : > { %4610 = vpow2.f32 %v4056_v14  ;;  %v4057_v19 = vmul.f32 -1.442695, %v835_v15  ;;  %v836_v20 = vadd.f32 %v816_v52, %v769_v16  ;;  %v771_v21 = vadd.f32 %v770_v18, %v685_v12 }
 0x24c   : > { %v772_v24 = vpop.f32.mrf.mxu0  ;;  %v828_v7 = vadd.f32 %v796_v25, %v749_v2  ;;  %v737_v12 = vadd.f32 %v5185_v38, %v5177_v26  ;;  %v825_v14 = vadd.f32 %v791_v3, %v741_v43 }
 0x24d   : > { %v4058_v47 = vmul.f32 -1.442695, %v836_v20  ;;  %v837_v49 = vadd.f32 %v821_v56, %v771_v21  ;;  %v773_v51 = vadd.f32 %v772_v24, %v687_v23  ;;  %4612 = vpow2.f32 %v4057_v19 }
 0x24e   : > { %v823_v34 = vadd.f32 %v786_v63, %v737_v12 }
 0x24f   : > { %4614 = vpow2.f32 %v4058_v47  ;;  %v4059_v57 = vmul.f32 -1.442695, %v837_v49  ;;  %v838_v58 = vadd.f32 %v821_v56, %v773_v51  ;;  %v753_v56 = vadd.f32 %v752_v53, %v5195_v45 }
 0x250   : > { %4616 = vpow2.f32 %v4055_v22 }
 0x251   : > { %4618 = vpow2.f32 %v4059_v57  ;;  %v4060_v52 = vmul.f32 -1.442695, %v838_v58  ;;  %v830_v39 = vadd.f32 %v801_v54, %v753_v56  ;;  %v4562_v56 = vld [vmem:[%s6333_s5 + $0x8] sm:$0xff]  }
 0x252   : > { %4620 = vpow2.f32 %v4053_v55 }
 0x253   : > { %4622 = vpow2.f32 %v4060_v52 }
 0x254   : > { %v4609_v40 = vpop.eup %4608  ;;  %4624 = vtanh.f32 %v824_v4 }
 0x255   : > { %4626 = vtanh.f32 %v826_v6  ;;  %v872_v46 = vadd.f32 1.0, %v4609_v40  ;;  %v4561_v6 = vld [vmem:[%s6333_s5] sm:$0xff]  }
 0x256   : > { %4628 = vtanh.f32 %v827_v30  ;;  %v4567_v30 = vld [vmem:[%s6333_s5 + $0x10] sm:$0xff]  }
 0x257   : > { %4630 = vtanh.f32 %v828_v7 }
 0x258   : > { %v4611_v37 = vpop.eup %4610  ;;  %4632 = vtanh.f32 %v829_v44  ;;  %v941_v44 = vpop.permute.xlu1 %940 }
 0x259   : > { %v874_v41 = vadd.f32 1.0, %v4611_v37  ;;  %4634 = vtanh.f32 %v830_v39  ;;  %v4568_v39 = vld [vmem:[%s6333_s5 + $0x18] sm:$0xff]  }
 0x25a   : > { %v4613_v8 = vpop.eup %4612  ;;  %4636 = vrcp.f32 %v872_v46 }
 0x25b   : > { %v875_v53 = vadd.f32 1.0, %v4613_v8  ;;  %4638 = vrcp.f32 %v874_v41  ;;  %v936_v8 = vpop.permute.xlu0 %935 }
 0x25c   : > { %v4615_v48 = vpop.eup %4614 }
 0x25d   : > { %v4617_v9 = vpop.eup %4616  ;;  %v876_v45 = vadd.f32 1.0, %v4615_v48 }
 0x25e   : > { %v4619_v50 = vpop.eup %4618  ;;  %v873_v13 = vadd.f32 1.0, %v4617_v9  ;;  %v931_v9 = vpop.permute.xlu1 %930 }
 0x25f   : > { %v4621_v0 = vpop.eup %4620  ;;  %v877_v10 = vadd.f32 1.0, %v4619_v50  ;;  %4640 = vrcp.f32 %v876_v45 }
 0x260   : > { %v4623_v11 = vpop.eup %4622  ;;  %v871_v16 = vadd.f32 1.0, %v4621_v0 }
 0x261   : > { %4642 = vrcp.f32 %v877_v10  ;;  %v878_v15 = vadd.f32 1.0, %v4623_v11  ;;  %v4625_v42 = vpop.eup %4624 }
 0x262   : > { %4644 = vrcp.f32 %v875_v53  ;;  %v4627_v17 = vpop.eup %4626  ;;  %v926_v53 = vpop.permute.xlu0 %925 }
 0x263   : > { %4646 = vrcp.f32 %v878_v15  ;;  %v4629_v18 = vpop.eup %4628 }
 0x264   : > { %4648 = vrcp.f32 %v873_v13  ;;  %v4631_v19 = vpop.eup %4630 }
 0x265   : > { %4650 = vtanh.f32 %v825_v14  ;;  %v4633_v20 = vpop.eup %4632 }
 0x266   : > { %4652 = vrcp.f32 %v871_v16  ;;  %v4635_v21 = vpop.eup %4634 }
 0x267   : > { %4654 = vtanh.f32 %v823_v34  ;;  %v4637_v26 = vpop.eup %4636 }
 0x268   : > { %v4639_v38 = vpop.eup %4638  ;;  %v896_v52 = vmul.f32 %v4637_v26, %v4625_v42 }
 0x269   : > { %v898_v55 = vmul.f32 %v4639_v38, %v4627_v17  ;;  %v5279_v38 = vld [vmem:[%s6331_s3 + $0x28] sm:$0xff]  }
 0x26b   : > { %v912_v3 = vpack.c.bf16 %v898_v55, %v896_v52  ;;  %v4089_v55 = vld [vmem:[%s6332_s4 + $0x40] sm:$0xff]  ;;  %v4114_v52 = vld [vmem:[%s6334_s6 + $0x48] sm:$0xff] }
 0x26c   : > { %v4641_v22 = vpop.eup %4640 }
 0x26d   : > { %v900_v51 = vmul.f32 %v4641_v22, %v4631_v19  ;;  %v5286_v22 = vld [vmem:[%s6331_s3 + $0x30] sm:$0xff]  }
 0x26e   : > { %v4643_v23 = vpop.eup %4642 }
 0x26f   : > { %v4645_v24 = vpop.eup %4644  ;;  %v901_v47 = vmul.f32 %v4643_v23, %v4633_v20  ;;  %v5293_v23 = vld [vmem:[%s6331_s3 + $0x38] sm:$0xff]  }
 0x270   : > { %v4647_v25 = vpop.eup %4646  ;;  %v899_v58 = vmul.f32 %v4645_v24, %v4629_v18  ;;  %v4095_v24 = vld [vmem:[%s6332_s4 + $0x70] sm:$0xff] }
 0x271   : > { %v4649_v49 = vpop.eup %4648  ;;  %v902_v54 = vmul.f32 %v4647_v25, %v4635_v21  ;;  %v5271_v21 = vld [vmem:[%s6331_s3 + $0x20] sm:$0xff]   ;;  %v4096_v25 = vld [vmem:[%s6332_s4 + $0x78] sm:$0xff] }
 0x272   : > { %v4651_v57 = vpop.eup %4650  ;;  %v913_v62 = vpack.c.bf16 %v901_v47, %v899_v58  ;;  %v4093_v47 = vld [vmem:[%s6332_s4 + $0x60] sm:$0xff]  ;;  %v4115_v58 = vld [vmem:[%s6334_s6 + $0x50] sm:$0xff] }
 0x273   : > { %v4653_v59 = vpop.eup %4652  ;;  %v914_v61 = vpack.c.bf16 %v902_v54, %v900_v51  ;;  %v897_v63 = vmul.f32 %v4651_v57, %v4649_v49  ;;  %v4094_v49 = vld [vmem:[%s6332_s4 + $0x68] sm:$0xff]  ;;  %v4091_v51 = vld [vmem:[%s6332_s4 + $0x50] sm:$0xff]  ;;  %v4092_v54 = vld [vmem:[%s6332_s4 + $0x58] sm:$0xff] }
 0x274   : > { %v4655_v2 = vpop.eup %4654  ;;  %v4090_v57 = vld [vmem:[%s6332_s4 + $0x48] sm:$0xff] }
 0x275   : > { %1007 = vmatprep.subr.bf16.mxu1 %v914_v61  ;;  %v895_v4 = vmul.f32 %v4655_v2, %v4653_v59  ;;  %v4116_v59 = vld [vmem:[%s6334_s6 + $0x58] sm:$0xff]  ;;  %v4113_v61 = vld [vmem:[%s6334_s6 + $0x40] sm:$0xff] }
 0x276   : > { %1008 = vmatpush1.bf16.msra.mxu1 %v913_v62 }
 0x277   : > { %1009 = vmatprep.subr.bf16.mxu1 %v912_v3  ;;  %v911_v5 = vpack.c.bf16 %v897_v63, %v895_v4 }
 0x27a   : > { %1010 = vmatpush1.bf16.msra.mxu1 %v911_v5 }
 0x27d   : > { %4065 = vmatmul.mubr.msk.bf16.vlgmr.msra.gmra.mxu1 %vm604_vm8, %v4561_v6 }
 0x27e   : > { %1037 = vmatprep.mubr.bf16.mxu1 %v6340_v1 }
 0x285   : > { %4066 = vmatmul.mubr.msk.bf16.gmra.mxu1 %vm604_vm8, %v4562_v56 }
 0x286   : > { %1047 = vmatprep.mubr.bf16.mxu1 %v6340_v1 }
 0x28d   : > { %4067 = vmatmul.mubr.msk.bf16.gmra.mxu1 %vm604_vm8, %v4567_v30 }
 0x28e   : > { %1055 = vmatprep.mubr.bf16.mxu1 %v6340_v1 }
 0x295   : > { %4068 = vmatmul.mubr.msk.bf16.gmra.mxu1 %vm604_vm8, %v4568_v39 }
 0x296   : > { %1275 = vmatprep.mubr.bf16.mxu1 %v6340_v1 }
 0x33d   : > { %v1029_v40 = vpop.f32.mrf.mxu1 }
 0x33e   : > { %v1030_v12 = vadd.f32 %v1029_v40, %v926_v53 }
 0x33f   : > { %v1031_v7 = vpop.f32.mrf.mxu1 }
 0x340   : > { %v1032_v14 = vadd.f32 %v1031_v7, %v926_v53  ;;  %v5248_v20 = vadd.f32 %v1030_v12, %v5051_v35 }
 0x341   : > { %v1033_v37 = vpop.f32.mrf.mxu1 }
 0x342   : > { %v1034_v45 = vadd.f32 %v1033_v37, %v931_v9 }
 0x343   : > { %v1035_v46 = vpop.f32.mrf.mxu1 }
 0x344   : > { %v1036_v0 = vadd.f32 %v1035_v46, %v931_v9  ;;  %v5234_v42 = vadd.f32 %v1034_v45, %v5041_v29 }
 0x345   : > { %v1039_v41 = vpop.f32.mrf.mxu1 }
 0x346   : > { %v1040_v43 = vadd.f32 %v1039_v41, %v936_v8  ;;  %v5237_v17 = vadd.f32 %v1036_v0, %v5043_v31  ;;  %v4460_v35 = vpack.i.bf16 %v5234_v42, %v5248_v20  ;;  %v1105_v26 = vpack.c.bf16 %v5234_v42, %v5248_v20 }
 0x347   : > { %v1041_v48 = vpop.f32.mrf.mxu1 }
 0x348   : > { %v1042_v10 = vadd.f32 %v1041_v48, %v936_v8  ;;  %v5228_v15 = vadd.f32 %v1040_v43, %v5037_v27 }
 0x349   : > { %v1043_v50 = vpop.f32.mrf.mxu1 }
 0x34a   : > { %v1044_v11 = vadd.f32 %v1043_v50, %v941_v44  ;;  %v5240_v18 = vadd.f32 %v1042_v10, %v5045_v32 }
 0x34b   : > { %v1045_v13 = vpop.f32.mrf.mxu1 }
 0x34c   : > { %v5231_v16 = vadd.f32 %v1044_v11, %v5039_v28  ;;  %v1046_v34 = vadd.f32 %v1045_v13, %v941_v44  ;;  %v5251_v28 = vadd.f32 %v1032_v14, %v5053_v36 }
 0x34d   : > { %v1049_v62 = vpop.f32.mrf.mxu1 }
 0x34e   : > { %v5243_v19 = vadd.f32 %v1046_v34, %v5047_v33  ;;  %v4455_v27 = vpack.i.bf16 %v5231_v16, %v5228_v15  ;;  %v1107_v32 = vpack.c.bf16 %v5231_v16, %v5228_v15  ;;  %v1106_v33 = vpack.c.bf16 %v5237_v17, %v5251_v28 }
 0x34f   : > { %v4470_v36 = vpack.i.bf16 %v5237_v17, %v5251_v28  ;;  %v5335_v63 = vpop.f32.mrf.mxu1 }
 0x350   : > { %4456 = vrot.lane.b32.xlu0 %v4455_v27, %s4924_s24  ;;  %v4465_v29 = vpack.i.bf16 %v5243_v19, %v5240_v18  ;;  %v1108_v31 = vpack.c.bf16 %v5243_v19, %v5240_v18  ;;  %6342 = vst [vmem:[#allocation2_spill] sm:$0xff] %v5335_v63 }
 0x351   : > { %v1052_v2 = vpop.f32.mrf.mxu1 }
 0x352   : > { %4466 = vrot.lane.b32.xlu1 %v4465_v29, %s4924_s24  ;;  %1170 = vmatprep.subr.bf16.mxu0 %v1108_v31 }
 0x353   : > { %1171 = vmatpush1.bf16.msra.mxu0 %v1107_v32  ;;  %v5374_v29 = vpop.f32.mrf.mxu1 }
 0x354   : > { %1172 = vmatprep.subr.bf16.mxu0 %v1106_v33  ;;  %4461 = vrot.lane.b32.xlu0 %v4460_v35, %s4924_s24 }
 0x355   : > { %v1057_v31 = vpop.f32.mrf.mxu1 }
 0x356   : > { %4471 = vrot.lane.b32.xlu1 %v4470_v36, %s4924_s24 }
 0x357   : > { %1173 = vmatpush1.bf16.msra.mxu0 %v1105_v26  ;;  %v5376_v32 = vpop.f32.mrf.mxu1 }
 0x358   : > { %1138 = vrot.lane.b32.xlu0 %v5271_v21, %s4923_s27 }
 0x359   : > { %v1060_v33 = vpop.f32.mrf.mxu1 }
 0x35a   : > { %1140 = vrot.lane.b32.xlu1 %v5279_v38, %s4923_s27 }
 0x35b   : > { %v5384_v26 = vpop.f32.mrf.mxu1 }
 0x35c   : > { %1142 = vrot.lane.b32.xlu0 %v5286_v22, %s4923_s27 }
 0x35e   : > { %1144 = vrot.lane.b32.xlu1 %v5293_v23, %s4923_s27 }
 0x360   : > { %1357 = vperm.xlu0 %4433, %v4095_v24  }
 0x362   : > { %1362 = vperm.xlu1 %4434, %v4096_v25  }
 0x364   : > { %1347 = vperm.xlu0 %4433, %v4093_v47  }
 0x366   : > { %1352 = vperm.xlu1 %4434, %v4094_v49  }
 0x368   : > { %1337 = vperm.xlu0 %4433, %v4091_v51  }
 0x36a   : > { %1342 = vperm.xlu1 %4434, %v4092_v54  }
 0x36c   : > { %1327 = vperm.xlu0 %4433, %v4089_v55  }
 0x36e   : > { %1332 = vperm.xlu1 %4434, %v4090_v57  }
 0x370   : > { %1479 = vperm.xlu0 %4433, %v4115_v58  }
 0x372   : > { %1484 = vperm.xlu1 %4434, %v4116_v59  }
 0x374   : > { %1469 = vperm.xlu0 %4433, %v4113_v61  }
 0x376   : > { %1474 = vperm.xlu1 %4434, %v4114_v52  }
 0x3c2   : > { %v4457_v3 = vpop.permute.xlu0 %4456 }
 0x3c3   : > { %v4459_v5 = vunpack.i.h.bf16 %v4457_v3  ;;  %v4458_v6 = vunpack.i.l.bf16 %v4457_v3 }
 0x3c4   : > { %v4467_v4 = vpop.permute.xlu1 %4466 }
 0x3c5   : > { %v4469_v56 = vunpack.i.h.bf16 %v4467_v4  ;;  %v4468_v30 = vunpack.i.l.bf16 %v4467_v4 }
 0x3c6   : > { %v4462_v40 = vpop.permute.xlu0 %4461 }
 0x3c7   : > { %v1099_v7 = vsel %vm1092_vm9, %v4468_v30, %v4458_v6  ;;  %v1100_v37 = vsel %vm1092_vm9, %v4469_v56, %v4459_v5  ;;  %v4464_v44 = vunpack.i.h.bf16 %v4462_v40  ;;  %v1095_v46 = vsel %vm1092_vm9, %v4458_v6, %v4468_v30 }
 0x3c8   : > { %v4472_v39 = vpop.permute.xlu1 %4471  ;;  %v1096_v8 = vsel %vm1092_vm9, %v4459_v5, %v4469_v56  ;;  %v1103_v41 = vpack.c.bf16 %v1100_v37, %v1099_v7  ;;  %v4463_v48 = vunpack.i.l.bf16 %v4462_v40 }
 0x3c9   : > { %v4474_v9 = vunpack.i.h.bf16 %v4472_v39  ;;  %v4473_v43 = vunpack.i.l.bf16 %v4472_v39  ;;  %v1104_v45 = vpack.c.bf16 %v1096_v8, %v1095_v46 }
 0x3ca   : > { %v1139_v50 = vpop.permute.xlu0 %1138 }
 0x3cb   : > { %v1097_v53 = vsel %vm1092_vm9, %v4473_v43, %v4463_v48  ;;  %v1098_v0 = vsel %vm1092_vm9, %v4474_v9, %v4464_v44  ;;  %1255 = vmatprep.subr.bf16.mxu1 %v1104_v45  ;;  %4081 = vmatmul.mubr.msk.bf16.vlgmr.msra.gmra.mxu0 %vm604_vm8, %v1139_v50  ;;  %v1093_v10 = vsel %vm1092_vm9, %v4463_v48, %v4473_v43 }
 0x3cc   : > { %1256 = vmatpush1.bf16.msra.mxu1 %v1103_v41  ;;  %v1094_v11 = vsel %vm1092_vm9, %v4464_v44, %v4474_v9  ;;  %v1101_v12 = vpack.c.bf16 %v1098_v0, %v1097_v53  ;;  %1200 = vmatprep.mubr.bf16.mxu0 %v6340_v1  ;;  %v1141_v14 = vpop.permute.xlu1 %1140 }
 0x3cd   : > { %v1102_v13 = vpack.c.bf16 %v1094_v11, %v1093_v10 }
 0x3ce   : > { %v1143_v34 = vpop.permute.xlu0 %1142 }
 0x3cf   : > { %1257 = vmatprep.subr.bf16.mxu1 %v1102_v13 }
 0x3d0   : > { %1258 = vmatpush1.bf16.msra.mxu1 %v1101_v12  ;;  %v1145_v27 = vpop.permute.xlu1 %1144 }
 0x3d3   : > { %4085 = vmatmul.mubr.msk.bf16.vlgmr.msra.gmra.mxu1 %vm604_vm8, %v5271_v21  ;;  %4082 = vmatmul.mubr.msk.bf16.gmra.mxu0 %vm604_vm8, %v1141_v14 }
 0x3d4   : > { %1285 = vmatprep.mubr.bf16.mxu1 %v6340_v1  ;;  %1210 = vmatprep.mubr.bf16.mxu0 %v6340_v1 }
 0x3db   : > { %4086 = vmatmul.mubr.msk.bf16.gmra.mxu1 %vm604_vm8, %v5279_v38  ;;  %4083 = vmatmul.mubr.msk.bf16.gmra.mxu0 %vm604_vm8, %v1143_v34  ;;  %v1358_v62 = vpop.permute.xlu0 %1357 }
 0x3dc   : > { %1295 = vmatprep.mubr.bf16.mxu1 %v6340_v1  ;;  %1220 = vmatprep.mubr.bf16.mxu0 %v6340_v1 }
 0x3dd   : > { %v1363_v5 = vpop.permute.xlu1 %1362 }
 0x3df   : > { %v1348_v40 = vpop.permute.xlu0 %1347 }
 0x3e1   : > { %v1353_v41 = vpop.permute.xlu1 %1352 }
 0x3e3   : > { %4087 = vmatmul.mubr.msk.bf16.gmra.mxu1 %vm604_vm8, %v5286_v22  ;;  %4084 = vmatmul.mubr.msk.bf16.gmra.mxu0 %vm604_vm8, %v1145_v27 }
 0x3e4   : > { %1305 = vmatprep.mubr.bf16.mxu1 %v6340_v1  ;;  %1571 = vmatprep.mubr.bf16.mxu0 %v6340_v1 }
 0x3eb   : > { %4088 = vmatmul.mubr.msk.bf16.gmra.mxu1 %vm604_vm8, %v5293_v23 }
 0x3ec   : > { %1734 = vmatprep.mubr.bf16.mxu1 %v6340_v1 }
 0x48b   : > { %v5378_v35 = vpop.f32.mrf.mxu0 }
 0x48d   : > { %v5380_v36 = vpop.f32.mrf.mxu0 }
 0x48f   : > { %v5382_v21 = vpop.f32.mrf.mxu0 }
 0x491   : > { %v5386_v38 = vpop.f32.mrf.mxu0 }
 0x493   : > { %v5388_v22 = vpop.f32.mrf.mxu1  ;;  %v5390_v23 = vpop.f32.mrf.mxu0 }
 0x495   : > { %v1279_v24 = vpop.f32.mrf.mxu1  ;;  %v5392_v25 = vpop.f32.mrf.mxu0 }
 0x497   : > { %v5394_v47 = vpop.f32.mrf.mxu1  ;;  %v5396_v49 = vpop.f32.mrf.mxu0 }
 0x499   : > { %v1283_v51 = vpop.f32.mrf.mxu1  ;;  %v5398_v54 = vpop.f32.mrf.mxu0 }
 0x49b   : > { %v1287_v55 = vpop.f32.mrf.mxu1  ;;  %v1212_v57 = vpop.f32.mrf.mxu0 }
 0x49d   : > { %v1289_v58 = vpop.f32.mrf.mxu1  ;;  %v1214_v59 = vpop.f32.mrf.mxu0 }
 0x49f   : > { %v1291_v61 = vpop.f32.mrf.mxu1  ;;  %v1216_v52 = vpop.f32.mrf.mxu0 }
 0x4a1   : > { %v1293_v2 = vpop.f32.mrf.mxu1  ;;  %v1218_v3 = vpop.f32.mrf.mxu0 }
 0x4a3   : > { %v1297_v4 = vpop.f32.mrf.mxu1  ;;  %v1222_v6 = vpop.f32.mrf.mxu0 }
 0x4a4   : > { %v1298_v48 = vadd.f32 %v1297_v4, %v1212_v57 }
 0x4a5   : > { %v1299_v56 = vpop.f32.mrf.mxu1  ;;  %v1224_v44 = vpop.f32.mrf.mxu0 }
 0x4a6   : > { %v1300_v30 = vadd.f32 %v1299_v56, %v1214_v59  ;;  %v1373_v14 = vadd.f32 %v1348_v40, %v1298_v48 }
 0x4a7   : > { %v1301_v7 = vpop.f32.mrf.mxu1  ;;  %v1226_v0 = vpop.f32.mrf.mxu0 }
 0x4a8   : > { %v1374_v37 = vadd.f32 %v1348_v40, %v1300_v30  ;;  %v1302_v39 = vadd.f32 %v1301_v7, %v1216_v52  ;;  %v1343_v30 = vpop.permute.xlu1 %1342  ;;  %v4097_v7 = vmul.f32 -1.442695, %v1373_v14  ;;  %v1280_v40 = vadd.f32 %v1279_v24, %v5380_v36 }
 0x4a9   : > { %v1303_v46 = vpop.f32.mrf.mxu1  ;;  %v1228_v52 = vpop.f32.mrf.mxu0 }
 0x4aa   : > { %v1304_v8 = vadd.f32 %v1303_v46, %v1218_v3  ;;  %v4098_v9 = vmul.f32 -1.442695, %v1374_v37  ;;  %v1375_v53 = vadd.f32 %v1353_v41, %v1302_v39  ;;  %v1338_v3 = vpop.permute.xlu0 %1337  ;;  %v1284_v39 = vadd.f32 %v1283_v51, %v5386_v38 }
 0x4ab   : > { %v1307_v43 = vpop.f32.mrf.mxu1  ;;  %v1288_v46 = vadd.f32 %v1287_v55, %v5390_v23 }
 0x4ac   : > { %v1376_v45 = vadd.f32 %v1353_v41, %v1304_v8  ;;  %v1308_v50 = vadd.f32 %v1307_v43, %v1222_v6  ;;  %4656 = vpow2.f32 %v4098_v9  ;;  %v4099_v59 = vmul.f32 -1.442695, %v1375_v53  ;;  %v1333_v48 = vpop.permute.xlu1 %1332 }
 0x4ad   : > { %v1309_v10 = vpop.f32.mrf.mxu1  ;;  %v1290_v41 = vadd.f32 %v1289_v58, %v5392_v25  ;;  %v1292_v43 = vadd.f32 %v1291_v61, %v5396_v49  ;;  %v1369_v36 = vadd.f32 %v1338_v3, %v1288_v46  ;;  %v1282_v49 = vadd.f32 %v5394_v47, %v5382_v21 }
 0x4ae   : > { %v4100_v11 = vmul.f32 -1.442695, %v1376_v45  ;;  %v1377_v12 = vadd.f32 %v1358_v62, %v1308_v50  ;;  %v1310_v13 = vadd.f32 %v1309_v10, %v1224_v44  ;;  %v1328_v8 = vpop.permute.xlu0 %1327  ;;  %v1368_v45 = vadd.f32 %v1333_v48, %v1284_v39 }
 0x4af   : > { %v1311_v34 = vpop.f32.mrf.mxu1  ;;  %v1366_v9 = vadd.f32 %v1328_v8, %v1280_v40  ;;  %v1370_v50 = vadd.f32 %v1338_v3, %v1290_v41  ;;  %v1371_v51 = vadd.f32 %v1343_v30, %v1292_v43 }
 0x4b0   : > { %4658 = vpow2.f32 %v4100_v11  ;;  %v4101_v27 = vmul.f32 -1.442695, %v1377_v12  ;;  %v1378_v31 = vadd.f32 %v1358_v62, %v1310_v13  ;;  %v1312_v33 = vadd.f32 %v1311_v34, %v1226_v0 }
 0x4b1   : > { %v1313_v57 = vpop.f32.mrf.mxu1  ;;  %v1278_v13 = vadd.f32 %v5388_v22, %v5378_v35  ;;  %v1367_v34 = vadd.f32 %v1333_v48, %v1282_v49 }
 0x4b2   : > { %v4102_v4 = vmul.f32 -1.442695, %v1378_v31  ;;  %v1379_v56 = vadd.f32 %v1363_v5, %v1312_v33  ;;  %v1314_v6 = vadd.f32 %v1313_v57, %v1228_v52  ;;  %4660 = vpow2.f32 %v4101_v27  ;;  %v1480_v49 = vpop.permute.xlu0 %1479 }
 0x4b3   : > { %v1365_v21 = vadd.f32 %v1328_v8, %v1278_v13 }
 0x4b4   : > { %4662 = vpow2.f32 %v4102_v4  ;;  %v4103_v37 = vmul.f32 -1.442695, %v1379_v56  ;;  %v1380_v44 = vadd.f32 %v1363_v5, %v1314_v6  ;;  %v1294_v5 = vadd.f32 %v1293_v2, %v5398_v54 }
 0x4b5   : > { %4664 = vpow2.f32 %v4099_v59 }
 0x4b6   : > { %4666 = vpow2.f32 %v4103_v37  ;;  %v4104_v62 = vmul.f32 -1.442695, %v1380_v44  ;;  %v1372_v23 = vadd.f32 %v1343_v30, %v1294_v5  ;;  %v1470_v13 = vpop.permute.xlu0 %1469 }
 0x4b7   : > { %4668 = vpow2.f32 %v4097_v7 }
 0x4b8   : > { %4670 = vpow2.f32 %v4104_v62 }
 0x4b9   : > { %v4657_v24 = vpop.eup %4656  ;;  %4672 = vtanh.f32 %v1366_v9 }
 0x4ba   : > { %4674 = vtanh.f32 %v1368_v45  ;;  %v1414_v55 = vadd.f32 1.0, %v4657_v24 }
 0x4bb   : > { %4676 = vtanh.f32 %v1369_v36 }
 0x4bc   : > { %4678 = vtanh.f32 %v1370_v50  ;;  %v4569_v50 = vld [vmem:[%s6333_s5 + $0x20] sm:$0xff]  }
 0x4bd   : > { %v4659_v38 = vpop.eup %4658  ;;  %4680 = vtanh.f32 %v1371_v51  ;;  %v4575_v51 = vld [vmem:[%s6333_s5 + $0x30] sm:$0xff]  }
 0x4be   : > { %v1416_v25 = vadd.f32 1.0, %v4659_v38  ;;  %4682 = vtanh.f32 %v1372_v23  ;;  %v4570_v38 = vld [vmem:[%s6333_s5 + $0x28] sm:$0xff]  }
 0x4bf   : > { %v4661_v53 = vpop.eup %4660  ;;  %4684 = vrcp.f32 %v1414_v55 }
 0x4c0   : > { %v1417_v2 = vadd.f32 1.0, %v4661_v53  ;;  %4686 = vrcp.f32 %v1416_v25  ;;  %v1485_v25 = vpop.permute.xlu1 %1484 }
 0x4c1   : > { %v4663_v58 = vpop.eup %4662 }
 0x4c2   : > { %v4665_v0 = vpop.eup %4664  ;;  %v1418_v54 = vadd.f32 1.0, %v4663_v58  ;;  %v4576_v58 = vld [vmem:[%s6333_s5 + $0x38] sm:$0xff]  }
 0x4c3   : > { %v4667_v61 = vpop.eup %4666  ;;  %v1415_v14 = vadd.f32 1.0, %v4665_v0 }
 0x4c4   : > { %v4669_v10 = vpop.eup %4668  ;;  %v1419_v11 = vadd.f32 1.0, %v4667_v61  ;;  %4688 = vrcp.f32 %v1418_v54 }
 0x4c5   : > { %v4671_v12 = vpop.eup %4670  ;;  %v1413_v31 = vadd.f32 1.0, %v4669_v10 }
 0x4c6   : > { %4690 = vrcp.f32 %v1419_v11  ;;  %v1420_v27 = vadd.f32 1.0, %v4671_v12  ;;  %v4673_v47 = vpop.eup %4672 }
 0x4c7   : > { %4692 = vrcp.f32 %v1417_v2  ;;  %v4675_v33 = vpop.eup %4674  ;;  %v1475_v2 = vpop.permute.xlu1 %1474 }
 0x4c8   : > { %4694 = vrcp.f32 %v1420_v27  ;;  %v4677_v59 = vpop.eup %4676 }
 0x4c9   : > { %4696 = vrcp.f32 %v1415_v14  ;;  %v4679_v52 = vpop.eup %4678 }
 0x4ca   : > { %4698 = vtanh.f32 %v1367_v34  ;;  %v4681_v57 = vpop.eup %4680 }
 0x4cb   : > { %4700 = vrcp.f32 %v1413_v31  ;;  %v4683_v3 = vpop.eup %4682 }
 0x4cc   : > { %4702 = vtanh.f32 %v1365_v21  ;;  %v4685_v35 = vpop.eup %4684 }
 0x4cd   : > { %v4687_v22 = vpop.eup %4686  ;;  %v1438_v48 = vmul.f32 %v4685_v35, %v4673_v47 }
 0x4ce   : > { %v1440_v39 = vmul.f32 %v4687_v22, %v4675_v33 }
 0x4d0   : > { %v1455_v5 = vpack.c.bf16 %v1440_v39, %v1438_v48  ;;  %v4153_v39 = vld [vmem:[%s6332_s4 + $0xa0] sm:$0xff]  ;;  %v4150_v48 = vld [vmem:[%s6332_s4 + $0x88] sm:$0xff] }
 0x4d1   : > { %v4689_v4 = vpop.eup %4688 }
 0x4d2   : > { %v1442_v44 = vmul.f32 %v4689_v4, %v4679_v52 }
 0x4d3   : > { %v4691_v56 = vpop.eup %4690 }
 0x4d4   : > { %v4693_v6 = vpop.eup %4692  ;;  %v1443_v7 = vmul.f32 %v4691_v56, %v4681_v57  ;;  %v5474_v56 = vld [vmem:[%s6331_s3 + $0x40] sm:$0xff]  }
 0x4d5   : > { %v4695_v30 = vpop.eup %4694  ;;  %v1441_v46 = vmul.f32 %v4693_v6, %v4677_v59 }
 0x4d6   : > { %v4697_v37 = vpop.eup %4696  ;;  %v1444_v40 = vmul.f32 %v4695_v30, %v4683_v3  ;;  %v5482_v30 = vld [vmem:[%s6331_s3 + $0x48] sm:$0xff]  }
 0x4d7   : > { %v4699_v62 = vpop.eup %4698  ;;  %v1456_v9 = vpack.c.bf16 %v1443_v7, %v1441_v46  ;;  %v5489_v7 = vld [vmem:[%s6331_s3 + $0x50] sm:$0xff]  }
 0x4d8   : > { %v4701_v8 = vpop.eup %4700  ;;  %v1457_v41 = vpack.c.bf16 %v1444_v40, %v1442_v44  ;;  %v1439_v43 = vmul.f32 %v4699_v62, %v4697_v37  ;;  %v5496_v37 = vld [vmem:[%s6331_s3 + $0x58] sm:$0xff]   ;;  %v4155_v44 = vld [vmem:[%s6332_s4 + $0xb0] sm:$0xff]  ;;  %v4154_v62 = vld [vmem:[%s6332_s4 + $0xa8] sm:$0xff] }
 0x4d9   : > { %v4703_v45 = vpop.eup %4702  ;;  %v4156_v40 = vld [vmem:[%s6332_s4 + $0xb8] sm:$0xff]  ;;  %v4151_v46 = vld [vmem:[%s6332_s4 + $0x90] sm:$0xff] }
 0x4da   : > { %1551 = vmatprep.subr.bf16.mxu0 %v1457_v41  ;;  %v1437_v36 = vmul.f32 %v4703_v45, %v4701_v8  ;;  %v4152_v8 = vld [vmem:[%s6332_s4 + $0x98] sm:$0xff]  ;;  %v4149_v41 = vld [vmem:[%s6332_s4 + $0x80] sm:$0xff] }
 0x4db   : > { %1552 = vmatpush1.bf16.msra.mxu0 %v1456_v9  ;;  %v4175_v9 = vld [vmem:[%s6334_s6 + $0x90] sm:$0xff]  ;;  %v4173_v45 = vld [vmem:[%s6334_s6 + $0x80] sm:$0xff] }
 0x4dc   : > { %1553 = vmatprep.subr.bf16.mxu0 %v1455_v5  ;;  %v1454_v24 = vpack.c.bf16 %v1439_v43, %v1437_v36  ;;  %v4176_v43 = vld [vmem:[%s6334_s6 + $0x98] sm:$0xff]  ;;  %v4174_v5 = vld [vmem:[%s6334_s6 + $0x88] sm:$0xff] }
 0x4df   : > { %1554 = vmatpush1.bf16.msra.mxu0 %v1454_v24 }
 0x4e2   : > { %4125 = vmatmul.mubr.msk.bf16.vlgmr.msra.gmra.mxu0 %vm604_vm8, %v4569_v50 }
 0x4e3   : > { %1581 = vmatprep.mubr.bf16.mxu0 %v6340_v1 }
 0x4ea   : > { %4126 = vmatmul.mubr.msk.bf16.gmra.mxu0 %vm604_vm8, %v4570_v38 }
 0x4eb   : > { %1591 = vmatprep.mubr.bf16.mxu0 %v6340_v1 }
 0x4f2   : > { %4127 = vmatmul.mubr.msk.bf16.gmra.mxu0 %vm604_vm8, %v4575_v51 }
 0x4f3   : > { %1599 = vmatprep.mubr.bf16.mxu0 %v6340_v1 }
 0x4fa   : > { %4128 = vmatmul.mubr.msk.bf16.gmra.mxu0 %vm604_vm8, %v4576_v58 }
 0x4fb   : > { %1819 = vmatprep.mubr.bf16.mxu0 %v6340_v1 }
 0x5a2   : > { %v1573_v23 = vpop.f32.mrf.mxu0 }
 0x5a3   : > { %v1574_v31 = vadd.f32 %v1573_v23, %v1470_v13 }
 0x5a4   : > { %v1575_v55 = vpop.f32.mrf.mxu0 }
 0x5a5   : > { %v1576_v47 = vadd.f32 %v1575_v55, %v1470_v13  ;;  %v5451_v4 = vadd.f32 %v1574_v31, %v5248_v20 }
 0x5a6   : > { %v1577_v53 = vpop.f32.mrf.mxu0 }
 0x5a7   : > { %v1578_v11 = vadd.f32 %v1577_v53, %v1475_v2 }
 0x5a8   : > { %v1579_v0 = vpop.f32.mrf.mxu0 }
 0x5a9   : > { %v1580_v14 = vadd.f32 %v1579_v0, %v1475_v2  ;;  %v5437_v57 = vadd.f32 %v1578_v11, %v5234_v42 }
 0x5aa   : > { %v1583_v54 = vpop.f32.mrf.mxu0 }
 0x5ab   : > { %v1584_v10 = vadd.f32 %v1583_v54, %v1480_v49  ;;  %v5440_v3 = vadd.f32 %v1580_v14, %v5237_v17  ;;  %v4480_v20 = vpack.i.bf16 %v5437_v57, %v5451_v4  ;;  %v1649_v6 = vpack.c.bf16 %v5437_v57, %v5451_v4 }
 0x5ac   : > { %v1585_v61 = vpop.f32.mrf.mxu0 }
 0x5ad   : > { %v1586_v34 = vadd.f32 %v1585_v61, %v1480_v49  ;;  %v5431_v33 = vadd.f32 %v1584_v10, %v5228_v15 }
 0x5ae   : > { %v1587_v12 = vpop.f32.mrf.mxu0 }
 0x5af   : > { %v1588_v27 = vadd.f32 %v1587_v12, %v1485_v25  ;;  %v5443_v35 = vadd.f32 %v1586_v34, %v5240_v18 }
 0x5b0   : > { %v1589_v21 = vpop.f32.mrf.mxu0 }
 0x5b1   : > { %v5434_v59 = vadd.f32 %v1588_v27, %v5231_v16  ;;  %v1590_v52 = vadd.f32 %v1589_v21, %v1485_v25  ;;  %v5454_v16 = vadd.f32 %v1576_v47, %v5251_v28 }
 0x5b2   : > { %v1593_v36 = vpop.f32.mrf.mxu0 }
 0x5b3   : > { %v5446_v22 = vadd.f32 %v1590_v52, %v5243_v19  ;;  %v4475_v15 = vpack.i.bf16 %v5434_v59, %v5431_v33  ;;  %v1651_v18 = vpack.c.bf16 %v5434_v59, %v5431_v33  ;;  %v1650_v19 = vpack.c.bf16 %v5440_v3, %v5454_v16 }
 0x5b4   : > { %v4490_v28 = vpack.i.bf16 %v5440_v3, %v5454_v16  ;;  %v5538_v24 = vpop.f32.mrf.mxu0 }
 0x5b5   : > { %4476 = vrot.lane.b32.xlu0 %v4475_v15, %s4925_s30  ;;  %v4485_v42 = vpack.i.bf16 %v5446_v22, %v5443_v35  ;;  %v1652_v17 = vpack.c.bf16 %v5446_v22, %v5443_v35 }
 0x5b6   : > { %v1596_v50 = vpop.f32.mrf.mxu0 }
 0x5b7   : > { %4486 = vrot.lane.b32.xlu1 %v4485_v42, %s4925_s30  ;;  %1714 = vmatprep.subr.bf16.mxu1 %v1652_v17 }
 0x5b8   : > { %1715 = vmatpush1.bf16.msra.mxu1 %v1651_v18 }
 0x5b9   : > { %1716 = vmatprep.subr.bf16.mxu1 %v1650_v19  ;;  %4481 = vrot.lane.b32.xlu0 %v4480_v20, %s4925_s30  ;;  %v5577_v20 = vpop.f32.mrf.mxu0 }
 0x5bb   : > { %4491 = vrot.lane.b32.xlu1 %v4490_v28, %s4925_s30  ;;  %v1601_v28 = vpop.f32.mrf.mxu0 }
 0x5bc   : > { %1717 = vmatpush1.bf16.msra.mxu1 %v1649_v6 }
 0x5bd   : > { %1682 = vrot.lane.b32.xlu0 %v5474_v56, %s4923_s27 }
 0x5bf   : > { %1684 = vrot.lane.b32.xlu1 %v5482_v30, %s4923_s27 }
 0x5c1   : > { %1686 = vrot.lane.b32.xlu0 %v5489_v7, %s4923_s27 }
 0x5c3   : > { %1688 = vrot.lane.b32.xlu1 %v5496_v37, %s4923_s27 }
 0x5c5   : > { %1901 = vperm.xlu0 %4433, %v4155_v44  }
 0x5c7   : > { %1906 = vperm.xlu1 %4434, %v4156_v40  }
 0x5c9   : > { %1891 = vperm.xlu0 %4433, %v4153_v39  }
 0x5cb   : > { %1896 = vperm.xlu1 %4434, %v4154_v62  }
 0x5cd   : > { %1881 = vperm.xlu0 %4433, %v4151_v46  }
 0x5cf   : > { %1886 = vperm.xlu1 %4434, %v4152_v8  }
 0x5d1   : > { %1871 = vperm.xlu0 %4433, %v4149_v41  }
 0x5d3   : > { %1876 = vperm.xlu1 %4434, %v4150_v48  }
 0x5d5   : > { %2023 = vperm.xlu0 %4433, %v4175_v9  }
 0x5d7   : > { %2028 = vperm.xlu1 %4434, %v4176_v43  }
 0x5d9   : > { %2013 = vperm.xlu0 %4433, %v4173_v45  }
 0x5db   : > { %2018 = vperm.xlu1 %4434, %v4174_v5  }
 0x627   : > { %v4477_v38 = vpop.permute.xlu0 %4476 }
 0x628   : > { %v4479_v23 = vunpack.i.h.bf16 %v4477_v38  ;;  %v4478_v55 = vunpack.i.l.bf16 %v4477_v38 }
 0x629   : > { %v4487_v51 = vpop.permute.xlu1 %4486 }
 0x62a   : > { %v4489_v53 = vunpack.i.h.bf16 %v4487_v51  ;;  %v4488_v25 = vunpack.i.l.bf16 %v4487_v51 }
 0x62b   : > { %v4482_v58 = vpop.permute.xlu0 %4481 }
 0x62c   : > { %v1643_v0 = vsel %vm1636_vm10, %v4488_v25, %v4478_v55  ;;  %v1644_v49 = vsel %vm1636_vm10, %v4489_v53, %v4479_v23  ;;  %v4484_v54 = vunpack.i.h.bf16 %v4482_v58  ;;  %v1639_v2 = vsel %vm1636_vm10, %v4478_v55, %v4488_v25 }
 0x62d   : > { %v4492_v61 = vpop.permute.xlu1 %4491  ;;  %v1640_v10 = vsel %vm1636_vm10, %v4479_v23, %v4489_v53  ;;  %v1647_v11 = vpack.c.bf16 %v1644_v49, %v1643_v0  ;;  %v4483_v12 = vunpack.i.l.bf16 %v4482_v58 }
 0x62e   : > { %v4494_v13 = vunpack.i.h.bf16 %v4492_v61  ;;  %v4493_v14 = vunpack.i.l.bf16 %v4492_v61  ;;  %v1648_v34 = vpack.c.bf16 %v1640_v10, %v1639_v2 }
 0x62f   : > { %v1683_v27 = vpop.permute.xlu0 %1682 }
 0x630   : > { %v1641_v31 = vsel %vm1636_vm10, %v4493_v14, %v4483_v12  ;;  %v1642_v21 = vsel %vm1636_vm10, %v4494_v13, %v4484_v54  ;;  %1799 = vmatprep.subr.bf16.mxu0 %v1648_v34  ;;  %4141 = vmatmul.mubr.msk.bf16.vlgmr.msra.gmra.mxu1 %vm604_vm8, %v1683_v27  ;;  %v1637_v47 = vsel %vm1636_vm10, %v4483_v12, %v4493_v14 }
 0x631   : > { %1800 = vmatpush1.bf16.msra.mxu0 %v1647_v11  ;;  %v1638_v52 = vsel %vm1636_vm10, %v4484_v54, %v4494_v13  ;;  %v1645_v15 = vpack.c.bf16 %v1642_v21, %v1641_v31  ;;  %1744 = vmatprep.mubr.bf16.mxu1 %v6340_v1  ;;  %v1685_v17 = vpop.permute.xlu1 %1684 }
 0x632   : > { %v1646_v42 = vpack.c.bf16 %v1638_v52, %v1637_v47 }
 0x633   : > { %v1687_v18 = vpop.permute.xlu0 %1686 }
 0x634   : > { %1801 = vmatprep.subr.bf16.mxu0 %v1646_v42 }
 0x635   : > { %1802 = vmatpush1.bf16.msra.mxu0 %v1645_v15  ;;  %v1689_v19 = vpop.permute.xlu1 %1688 }
 0x638   : > { %4145 = vmatmul.mubr.msk.bf16.vlgmr.msra.gmra.mxu0 %vm604_vm8, %v5474_v56  ;;  %4142 = vmatmul.mubr.msk.bf16.gmra.mxu1 %vm604_vm8, %v1685_v17  ;;  %v5579_v56 = vpop.f32.mrf.mxu0 }
 0x639   : > { %1829 = vmatprep.mubr.bf16.mxu0 %v6340_v1  ;;  %1754 = vmatprep.mubr.bf16.mxu1 %v6340_v1 }
 0x63a   : > { %v1604_v6 = vpop.f32.mrf.mxu0 }
 0x63c   : > { %v5587_v40 = vpop.f32.mrf.mxu0 }
 0x640   : > { %4146 = vmatmul.mubr.msk.bf16.gmra.mxu0 %vm604_vm8, %v5482_v30  ;;  %4143 = vmatmul.mubr.msk.bf16.gmra.mxu1 %vm604_vm8, %v1687_v18  ;;  %v1902_v23 = vpop.permute.xlu0 %1901 }
 0x641   : > { %1839 = vmatprep.mubr.bf16.mxu0 %v6340_v1  ;;  %1764 = vmatprep.mubr.bf16.mxu1 %v6340_v1 }
 0x642   : > { %v1907_v58 = vpop.permute.xlu1 %1906 }
 0x644   : > { %v1892_v61 = vpop.permute.xlu0 %1891 }
 0x646   : > { %v1897_v34 = vpop.permute.xlu1 %1896 }
 0x648   : > { %4147 = vmatmul.mubr.msk.bf16.gmra.mxu0 %vm604_vm8, %v5489_v7  ;;  %4144 = vmatmul.mubr.msk.bf16.gmra.mxu1 %vm604_vm8, %v1689_v19 }
 0x649   : > { %1849 = vmatprep.mubr.bf16.mxu0 %v6340_v1  ;;  %2115 = vmatprep.mubr.bf16.mxu1 %v6340_v1 }
 0x650   : > { %4148 = vmatmul.mubr.msk.bf16.gmra.mxu0 %vm604_vm8, %v5496_v37 }
 0x651   : > { %2277 = vmatprep.mubr.bf16.mxu0 %v6340_v1 }
 0x6f0   : > { %v5581_v30 = vpop.f32.mrf.mxu1 }
 0x6f2   : > { %v5583_v7 = vpop.f32.mrf.mxu1 }
 0x6f4   : > { %v5585_v44 = vpop.f32.mrf.mxu1 }
 0x6f6   : > { %v5589_v39 = vpop.f32.mrf.mxu1 }
 0x6f8   : > { %v5591_v62 = vpop.f32.mrf.mxu0  ;;  %v5593_v37 = vpop.f32.mrf.mxu1 }
 0x6fa   : > { %v1823_v46 = vpop.f32.mrf.mxu0  ;;  %v5595_v8 = vpop.f32.mrf.mxu1 }
 0x6fc   : > { %v5597_v41 = vpop.f32.mrf.mxu0  ;;  %v5599_v48 = vpop.f32.mrf.mxu1 }
 0x6fe   : > { %v1827_v9 = vpop.f32.mrf.mxu0  ;;  %v5601_v43 = vpop.f32.mrf.mxu1 }
 0x700   : > { %v1831_v45 = vpop.f32.mrf.mxu0  ;;  %v1756_v5 = vpop.f32.mrf.mxu1 }
 0x702   : > { %v1833_v36 = vpop.f32.mrf.mxu0  ;;  %v1758_v50 = vpop.f32.mrf.mxu1 }
 0x704   : > { %v1835_v38 = vpop.f32.mrf.mxu0  ;;  %v1760_v51 = vpop.f32.mrf.mxu1 }
 0x706   : > { %v1837_v55 = vpop.f32.mrf.mxu0  ;;  %v1762_v53 = vpop.f32.mrf.mxu1 }
 0x708   : > { %v1841_v25 = vpop.f32.mrf.mxu0  ;;  %v1766_v0 = vpop.f32.mrf.mxu1 }
 0x709   : > { %v1842_v27 = vadd.f32 %v1841_v25, %v1756_v5  ;;  %v1882_v25 = vpop.permute.xlu0 %1881 }
 0x70a   : > { %v1843_v49 = vpop.f32.mrf.mxu0  ;;  %v1768_v11 = vpop.f32.mrf.mxu1 }
 0x70b   : > { %v1844_v54 = vadd.f32 %v1843_v49, %v1758_v50  ;;  %v1917_v6 = vadd.f32 %v1892_v61, %v1842_v27  ;;  %v1828_v27 = vadd.f32 %v1827_v9, %v5589_v39 }
 0x70c   : > { %v1845_v2 = vpop.f32.mrf.mxu0  ;;  %v1770_v42 = vpop.f32.mrf.mxu1 }
 0x70d   : > { %v1918_v10 = vadd.f32 %v1892_v61, %v1844_v54  ;;  %v1846_v12 = vadd.f32 %v1845_v2, %v1760_v51  ;;  %v1824_v61 = vadd.f32 %v1823_v46, %v5583_v7 }
 0x70e   : > { %v1847_v13 = vpop.f32.mrf.mxu0  ;;  %v1772_v2 = vpop.f32.mrf.mxu1 }
 0x70f   : > { %v1848_v14 = vadd.f32 %v1847_v13, %v1762_v53  ;;  %v4158_v31 = vmul.f32 -1.442695, %v1918_v10  ;;  %v1919_v15 = vadd.f32 %v1897_v34, %v1846_v12  ;;  %v1887_v12 = vpop.permute.xlu1 %1886 }
 0x710   : > { %v1851_v21 = vpop.f32.mrf.mxu0 }
 0x711   : > { %v1920_v47 = vadd.f32 %v1897_v34, %v1848_v14  ;;  %v1852_v52 = vadd.f32 %v1851_v21, %v1766_v0  ;;  %4704 = vpow2.f32 %v4158_v31  ;;  %v4159_v53 = vmul.f32 -1.442695, %v1919_v15  ;;  %v1872_v21 = vpop.permute.xlu0 %1871 }
 0x712   : > { %v1853_v17 = vpop.f32.mrf.mxu0  ;;  %v4157_v14 = vmul.f32 -1.442695, %v1917_v6  ;;  %v1832_v31 = vadd.f32 %v1831_v45, %v5593_v37  ;;  %v1910_v15 = vadd.f32 %v1872_v21, %v1824_v61 }
 0x713   : > { %v4160_v18 = vmul.f32 -1.442695, %v1920_v47  ;;  %v1921_v19 = vadd.f32 %v1902_v23, %v1852_v52  ;;  %v1854_v28 = vadd.f32 %v1853_v17, %v1768_v11  ;;  %v1834_v47 = vadd.f32 %v1833_v36, %v5595_v8  ;;  %v1877_v52 = vpop.permute.xlu1 %1876 }
 0x714   : > { %v1855_v50 = vpop.f32.mrf.mxu0  ;;  %v1912_v17 = vadd.f32 %v1877_v52, %v1828_v27  ;;  %v1913_v7 = vadd.f32 %v1882_v25, %v1832_v31 }
 0x715   : > { %4706 = vpow2.f32 %v4160_v18  ;;  %v4161_v49 = vmul.f32 -1.442695, %v1921_v19  ;;  %v1922_v51 = vadd.f32 %v1902_v23, %v1854_v28  ;;  %v1856_v54 = vadd.f32 %v1855_v50, %v1770_v42 }
 0x716   : > { %v1857_v5 = vpop.f32.mrf.mxu0  ;;  %v1836_v42 = vadd.f32 %v1835_v38, %v5599_v48  ;;  %v1914_v18 = vadd.f32 %v1882_v25, %v1834_v47  ;;  %v1826_v48 = vadd.f32 %v5597_v41, %v5585_v44 }
 0x717   : > { %v4162_v10 = vmul.f32 -1.442695, %v1922_v51  ;;  %v1923_v13 = vadd.f32 %v1907_v58, %v1856_v54  ;;  %v1858_v0 = vadd.f32 %v1857_v5, %v1772_v2  ;;  %4708 = vpow2.f32 %v4161_v49 }
 0x718   : > { %v1915_v9 = vadd.f32 %v1887_v12, %v1836_v42  ;;  %v1822_v51 = vadd.f32 %v5591_v62, %v5581_v30 }
 0x719   : > { %4710 = vpow2.f32 %v4162_v10  ;;  %v4163_v34 = vmul.f32 -1.442695, %v1923_v13  ;;  %v1924_v11 = vadd.f32 %v1907_v58, %v1858_v0  ;;  %v1838_v58 = vadd.f32 %v1837_v55, %v5601_v43 }
 0x71a   : > { %4712 = vpow2.f32 %v4159_v53  ;;  %v1911_v53 = vadd.f32 %v1877_v52, %v1826_v48  ;;  %v1909_v44 = vadd.f32 %v1872_v21, %v1822_v51 }
 0x71b   : > { %4714 = vpow2.f32 %v4163_v34  ;;  %v4164_v23 = vmul.f32 -1.442695, %v1924_v11  ;;  %v1916_v37 = vadd.f32 %v1887_v12, %v1838_v58 }
 0x71c   : > { %4716 = vpow2.f32 %v4157_v14 }
 0x71d   : > { %4718 = vpow2.f32 %v4164_v23 }
 0x71e   : > { %v4705_v46 = vpop.eup %4704  ;;  %4720 = vtanh.f32 %v1910_v15 }
 0x71f   : > { %4722 = vtanh.f32 %v1912_v17  ;;  %v1958_v45 = vadd.f32 1.0, %v4705_v46 }
 0x720   : > { %4724 = vtanh.f32 %v1913_v7 }
 0x721   : > { %4726 = vtanh.f32 %v1914_v18 }
 0x722   : > { %v4707_v39 = vpop.eup %4706  ;;  %4728 = vtanh.f32 %v1915_v9 }
 0x723   : > { %v1960_v8 = vadd.f32 1.0, %v4707_v39  ;;  %4730 = vtanh.f32 %v1916_v37 }
 0x724   : > { %v4709_v19 = vpop.eup %4708  ;;  %4732 = vrcp.f32 %v1958_v45  ;;  %v4577_v45 = vld [vmem:[%s6333_s5 + $0x40] sm:$0xff]  }
 0x725   : > { %v1961_v55 = vadd.f32 1.0, %v4709_v19  ;;  %4734 = vrcp.f32 %v1960_v8  ;;  %v4578_v19 = vld [vmem:[%s6333_s5 + $0x48] sm:$0xff]   ;;  %v4583_v8 = vld [vmem:[%s6333_s5 + $0x50] sm:$0xff]  }
 0x726   : > { %v4711_v36 = vpop.eup %4710 }
 0x727   : > { %v4713_v28 = vpop.eup %4712  ;;  %v1962_v43 = vadd.f32 1.0, %v4711_v36 }
 0x728   : > { %v4715_v38 = vpop.eup %4714  ;;  %v1959_v54 = vadd.f32 1.0, %v4713_v28 }
 0x729   : > { %v4717_v6 = vpop.eup %4716  ;;  %v1963_v50 = vadd.f32 1.0, %v4715_v38  ;;  %4736 = vrcp.f32 %v1962_v43  ;;  %v2029_v43 = vpop.permute.xlu1 %2028  ;;  %v4584_v38 = vld [vmem:[%s6333_s5 + $0x58] sm:$0xff]  }
 0x72a   : > { %v4719_v49 = vpop.eup %4718  ;;  %v1957_v5 = vadd.f32 1.0, %v4717_v6  ;;  %v2024_v6 = vpop.permute.xlu0 %2023 }
 0x72b   : > { %4738 = vrcp.f32 %v1963_v50  ;;  %v1964_v2 = vadd.f32 1.0, %v4719_v49  ;;  %v4721_v41 = vpop.eup %4720 }
 0x72c   : > { %4740 = vrcp.f32 %v1961_v55  ;;  %v4723_v25 = vpop.eup %4722 }
 0x72d   : > { %4742 = vrcp.f32 %v1964_v2  ;;  %v4725_v10 = vpop.eup %4724  ;;  %v2019_v51 = vpop.permute.xlu1 %2018 }
 0x72e   : > { %4744 = vrcp.f32 %v1959_v54  ;;  %v4727_v13 = vpop.eup %4726 }
 0x72f   : > { %4746 = vtanh.f32 %v1911_v53  ;;  %v4729_v0 = vpop.eup %4728 }
 0x730   : > { %4748 = vrcp.f32 %v1957_v5  ;;  %v4731_v12 = vpop.eup %4730  ;;  %v2014_v5 = vpop.permute.xlu0 %2013 }
 0x731   : > { %4750 = vtanh.f32 %v1909_v44  ;;  %v4733_v30 = vpop.eup %4732 }
 0x732   : > { %v4735_v62 = vpop.eup %4734  ;;  %v1982_v58 = vmul.f32 %v4733_v30, %v4721_v41 }
 0x733   : > { %v1984_v47 = vmul.f32 %v4735_v62, %v4723_v25 }
 0x735   : > { %v1999_v39 = vpack.c.bf16 %v1984_v47, %v1982_v58  ;;  %v5692_v47 = vld [vmem:[%s6331_s3 + $0x70] sm:$0xff]   ;;  %v4214_v58 = vld [vmem:[%s6332_s4 + $0xe8] sm:$0xff] }
 0x736   : > { %v4737_v14 = vpop.eup %4736 }
 0x737   : > { %v1986_v31 = vmul.f32 %v4737_v14, %v4727_v13 }
 0x738   : > { %v4739_v34 = vpop.eup %4738 }
 0x739   : > { %v4741_v11 = vpop.eup %4740  ;;  %v1987_v27 = vmul.f32 %v4739_v34, %v4729_v0 }
 0x73a   : > { %v4743_v61 = vpop.eup %4742  ;;  %v1985_v15 = vmul.f32 %v4741_v11, %v4725_v10 }
 0x73b   : > { %v4745_v23 = vpop.eup %4744  ;;  %v1988_v21 = vmul.f32 %v4743_v61, %v4731_v12 }
 0x73c   : > { %v4747_v52 = vpop.eup %4746  ;;  %v2000_v7 = vpack.c.bf16 %v1987_v27, %v1985_v15  ;;  %v4215_v15 = vld [vmem:[%s6332_s4 + $0xf0] sm:$0xff] }
 0x73d   : > { %v4749_v42 = vpop.eup %4748  ;;  %v2001_v17 = vpack.c.bf16 %v1988_v21, %v1986_v31  ;;  %v1983_v46 = vmul.f32 %v4747_v52, %v4745_v23  ;;  %v5677_v23 = vld [vmem:[%s6331_s3 + $0x60] sm:$0xff]   ;;  %v5685_v21 = vld [vmem:[%s6331_s3 + $0x68] sm:$0xff]   ;;  %v5699_v52 = vld [vmem:[%s6331_s3 + $0x78] sm:$0xff]  }
 0x73e   : > { %v4751_v18 = vpop.eup %4750 }
 0x73f   : > { %2095 = vmatprep.subr.bf16.mxu1 %v2001_v17  ;;  %v1981_v9 = vmul.f32 %v4751_v18, %v4749_v42  ;;  %v4216_v42 = vld [vmem:[%s6332_s4 + $0xf8] sm:$0xff]  ;;  %v4213_v17 = vld [vmem:[%s6332_s4 + $0xe0] sm:$0xff] }
 0x740   : > { %2096 = vmatpush1.bf16.msra.mxu1 %v2000_v7  ;;  %v4211_v7 = vld [vmem:[%s6332_s4 + $0xd0] sm:$0xff]  ;;  %v4209_v18 = vld [vmem:[%s6332_s4 + $0xc0] sm:$0xff] }
 0x741   : > { %2097 = vmatprep.subr.bf16.mxu1 %v1999_v39  ;;  %v1998_v37 = vpack.c.bf16 %v1983_v46, %v1981_v9  ;;  %v4212_v46 = vld [vmem:[%s6332_s4 + $0xd8] sm:$0xff]  ;;  %v4210_v39 = vld [vmem:[%s6332_s4 + $0xc8] sm:$0xff]  ;;  %v4235_v9 = vld [vmem:[%s6334_s6 + $0xd0] sm:$0xff] }
 0x744   : > { %2098 = vmatpush1.bf16.msra.mxu1 %v1998_v37  ;;  %v4236_v37 = vld [vmem:[%s6334_s6 + $0xd8] sm:$0xff] }
 0x747   : > { %4185 = vmatmul.mubr.msk.bf16.vlgmr.msra.gmra.mxu1 %vm604_vm8, %v4577_v45  ;;  %v4233_v45 = vld [vmem:[%s6334_s6 + $0xc0] sm:$0xff] }
 0x748   : > { %2125 = vmatprep.mubr.bf16.mxu1 %v6340_v1 }
 0x74f   : > { %4186 = vmatmul.mubr.msk.bf16.gmra.mxu1 %vm604_vm8, %v4578_v19  ;;  %v4234_v19 = vld [vmem:[%s6334_s6 + $0xc8] sm:$0xff] }
 0x750   : > { %2135 = vmatprep.mubr.bf16.mxu1 %v6340_v1 }
 0x757   : > { %4187 = vmatmul.mubr.msk.bf16.gmra.mxu1 %vm604_vm8, %v4583_v8 }
 0x758   : > { %2143 = vmatprep.mubr.bf16.mxu1 %v6340_v1 }
 0x75f   : > { %4188 = vmatmul.mubr.msk.bf16.gmra.mxu1 %vm604_vm8, %v4584_v38 }
 0x760   : > { %2362 = vmatprep.mubr.bf16.mxu1 %v6340_v1 }
 0x807   : > { %v2117_v36 = vpop.f32.mrf.mxu1 }
 0x808   : > { %v2118_v10 = vadd.f32 %v2117_v36, %v2014_v5 }
 0x809   : > { %v2119_v28 = vpop.f32.mrf.mxu1 }
 0x80a   : > { %v2120_v0 = vadd.f32 %v2119_v28, %v2014_v5  ;;  %v5654_v27 = vadd.f32 %v2118_v10, %v5451_v4 }
 0x80b   : > { %v2121_v48 = vpop.f32.mrf.mxu1 }
 0x80c   : > { %v2122_v53 = vadd.f32 %v2121_v48, %v2019_v51 }
 0x80d   : > { %v2123_v55 = vpop.f32.mrf.mxu1 }
 0x80e   : > { %v2124_v44 = vadd.f32 %v2123_v55, %v2019_v51  ;;  %v5640_v14 = vadd.f32 %v2122_v53, %v5437_v57 }
 0x80f   : > { %v2127_v50 = vpop.f32.mrf.mxu1 }
 0x810   : > { %v2128_v54 = vadd.f32 %v2127_v50, %v2024_v6  ;;  %v5643_v34 = vadd.f32 %v2124_v44, %v5440_v3  ;;  %v4500_v4 = vpack.i.bf16 %v5640_v14, %v5654_v27  ;;  %v2192_v31 = vpack.c.bf16 %v5640_v14, %v5654_v27 }
 0x811   : > { %v2129_v49 = vpop.f32.mrf.mxu1 }
 0x812   : > { %v2130_v41 = vadd.f32 %v2129_v49, %v2024_v6  ;;  %v5634_v12 = vadd.f32 %v2128_v54, %v5431_v33 }
 0x813   : > { %v2131_v2 = vpop.f32.mrf.mxu1 }
 0x814   : > { %v2132_v25 = vadd.f32 %v2131_v2, %v2029_v43  ;;  %v5646_v11 = vadd.f32 %v2130_v41, %v5443_v35 }
 0x815   : > { %v2133_v13 = vpop.f32.mrf.mxu1 }
 0x816   : > { %v5637_v30 = vadd.f32 %v2132_v25, %v5434_v59  ;;  %v2134_v62 = vadd.f32 %v2133_v13, %v2029_v43  ;;  %v5657_v59 = vadd.f32 %v2120_v0, %v5454_v16 }
 0x817   : > { %v2137_v8 = vpop.f32.mrf.mxu1 }
 0x818   : > { %v5649_v61 = vadd.f32 %v2134_v62, %v5446_v22  ;;  %v4495_v33 = vpack.i.bf16 %v5637_v30, %v5634_v12  ;;  %v2194_v35 = vpack.c.bf16 %v5637_v30, %v5634_v12  ;;  %v2193_v22 = vpack.c.bf16 %v5643_v34, %v5657_v59 }
 0x819   : > { %v4510_v16 = vpack.i.bf16 %v5643_v34, %v5657_v59  ;;  %v5741_v36 = vpop.f32.mrf.mxu1 }
 0x81a   : > { %4496 = vrot.lane.b32.xlu0 %v4495_v33, %s4922_s22  ;;  %v4505_v57 = vpack.i.bf16 %v5649_v61, %v5646_v11  ;;  %v2195_v3 = vpack.c.bf16 %v5649_v61, %v5646_v11  ;;  %6343 = vst [vmem:[#allocation3_spill] sm:$0xff] %v5741_v36 }
 0x81b   : > { %v2140_v28 = vpop.f32.mrf.mxu1 }
 0x81c   : > { %4506 = vrot.lane.b32.xlu1 %v4505_v57, %s4922_s22  ;;  %2257 = vmatprep.subr.bf16.mxu0 %v2195_v3 }
 0x81d   : > { %2258 = vmatpush1.bf16.msra.mxu0 %v2194_v35 }
 0x81e   : > { %2259 = vmatprep.subr.bf16.mxu0 %v2193_v22  ;;  %4501 = vrot.lane.b32.xlu0 %v4500_v4, %s4922_s22 }
 0x820   : > { %4511 = vrot.lane.b32.xlu1 %v4510_v16, %s4922_s22 }
 0x821   : > { %2260 = vmatpush1.bf16.msra.mxu0 %v2192_v31 }
 0x822   : > { %2225 = vrot.lane.b32.xlu0 %v5677_v23, %s4923_s27 }
 0x824   : > { %2227 = vrot.lane.b32.xlu1 %v5685_v21, %s4923_s27 }
 0x826   : > { %2229 = vrot.lane.b32.xlu0 %v5692_v47, %s4923_s27 }
 0x828   : > { %2231 = vrot.lane.b32.xlu1 %v5699_v52, %s4923_s27 }
 0x82a   : > { %2444 = vperm.xlu0 %4433, %v4215_v15  }
 0x82c   : > { %2449 = vperm.xlu1 %4434, %v4216_v42  }
 0x82e   : > { %2434 = vperm.xlu0 %4433, %v4213_v17  }
 0x830   : > { %2439 = vperm.xlu1 %4434, %v4214_v58  }
 0x832   : > { %2424 = vperm.xlu0 %4433, %v4211_v7  }
 0x834   : > { %2429 = vperm.xlu1 %4434, %v4212_v46  }
 0x836   : > { %2414 = vperm.xlu0 %4433, %v4209_v18  }
 0x838   : > { %2419 = vperm.xlu1 %4434, %v4210_v39  }
 0x83a   : > { %2566 = vperm.xlu0 %4433, %v4235_v9  }
 0x83c   : > { %2571 = vperm.xlu1 %4434, %v4236_v37  }
 0x83e   : > { %2556 = vperm.xlu0 %4433, %v4233_v45  }
 0x840   : > { %2561 = vperm.xlu1 %4434, %v4234_v19  }
 0x88c   : > { %v4497_v48 = vpop.permute.xlu0 %4496 }
 0x88d   : > { %v4499_v38 = vunpack.i.h.bf16 %v4497_v48  ;;  %v4498_v55 = vunpack.i.l.bf16 %v4497_v48 }
 0x88e   : > { %v4507_v43 = vpop.permute.xlu1 %4506 }
 0x88f   : > { %v4509_v6 = vunpack.i.h.bf16 %v4507_v43  ;;  %v4508_v50 = vunpack.i.l.bf16 %v4507_v43 }
 0x890   : > { %v4502_v49 = vpop.permute.xlu0 %4501 }
 0x891   : > { %v2186_v51 = vsel %vm551_vm7, %v4508_v50, %v4498_v55  ;;  %v2187_v54 = vsel %vm551_vm7, %v4509_v6, %v4499_v38  ;;  %v4504_v2 = vunpack.i.h.bf16 %v4502_v49  ;;  %v2182_v44 = vsel %vm551_vm7, %v4498_v55, %v4508_v50 }
 0x892   : > { %v2190_v53 = vpack.c.bf16 %v2187_v54, %v2186_v51  ;;  %v4512_v5 = vpop.permute.xlu1 %4511  ;;  %v2183_v41 = vsel %vm551_vm7, %v4499_v38, %v4509_v6  ;;  %v4503_v25 = vunpack.i.l.bf16 %v4502_v49 }
 0x893   : > { %v4514_v10 = vunpack.i.h.bf16 %v4512_v5  ;;  %v4513_v13 = vunpack.i.l.bf16 %v4512_v5  ;;  %v2191_v0 = vpack.c.bf16 %v2183_v41, %v2182_v44 }
 0x894   : > { %v2226_v62 = vpop.permute.xlu0 %2225 }
 0x895   : > { %v2184_v33 = vsel %vm551_vm7, %v4513_v13, %v4503_v25  ;;  %v2185_v57 = vsel %vm551_vm7, %v4514_v10, %v4504_v2  ;;  %2342 = vmatprep.subr.bf16.mxu1 %v2191_v0  ;;  %4201 = vmatmul.mubr.msk.bf16.vlgmr.msra.gmra.mxu0 %vm604_vm8, %v2226_v62  ;;  %v2180_v3 = vsel %vm551_vm7, %v4503_v25, %v4513_v13 }
 0x896   : > { %v2188_v35 = vpack.c.bf16 %v2185_v57, %v2184_v33  ;;  %2343 = vmatpush1.bf16.msra.mxu1 %v2190_v53  ;;  %v2181_v22 = vsel %vm551_vm7, %v4504_v2, %v4514_v10  ;;  %2287 = vmatprep.mubr.bf16.mxu0 %v6340_v1  ;;  %v2228_v16 = vpop.permute.xlu1 %2227 }
 0x897   : > { %v2189_v4 = vpack.c.bf16 %v2181_v22, %v2180_v3 }
 0x898   : > { %v2230_v31 = vpop.permute.xlu0 %2229 }
 0x899   : > { %2344 = vmatprep.subr.bf16.mxu1 %v2189_v4 }
 0x89a   : > { %2345 = vmatpush1.bf16.msra.mxu1 %v2188_v35  ;;  %v2232_v15 = vpop.permute.xlu1 %2231 }
 0x89d   : > { %4205 = vmatmul.mubr.msk.bf16.vlgmr.msra.gmra.mxu1 %vm604_vm8, %v5677_v23  ;;  %4202 = vmatmul.mubr.msk.bf16.gmra.mxu0 %vm604_vm8, %v2228_v16  ;;  %v5779_v23 = vpop.f32.mrf.mxu1 }
 0x89e   : > { %2372 = vmatprep.mubr.bf16.mxu1 %v6340_v1  ;;  %2297 = vmatprep.mubr.bf16.mxu0 %v6340_v1 }
 0x8a5   : > { %4206 = vmatmul.mubr.msk.bf16.gmra.mxu1 %vm604_vm8, %v5685_v21  ;;  %4203 = vmatmul.mubr.msk.bf16.gmra.mxu0 %vm604_vm8, %v2230_v31  ;;  %v2145_v21 = vpop.f32.mrf.mxu1  ;;  %v2445_v49 = vpop.permute.xlu0 %2444 }
 0x8a6   : > { %2382 = vmatprep.mubr.bf16.mxu1 %v6340_v1  ;;  %2307 = vmatprep.mubr.bf16.mxu0 %v6340_v1 }
 0x8a7   : > { %v5781_v42 = vpop.f32.mrf.mxu1  ;;  %v2450_v2 = vpop.permute.xlu1 %2449 }
 0x8a9   : > { %v2148_v17 = vpop.f32.mrf.mxu1  ;;  %v2435_v25 = vpop.permute.xlu0 %2434 }
 0x8ab   : > { %v5789_v46 = vpop.f32.mrf.mxu1  ;;  %v2440_v3 = vpop.permute.xlu1 %2439 }
 0x8ac   : > { %6344 = vst [vmem:[#allocation4_spill] sm:$0xff] %v5789_v46 }
 0x8ad   : > { %4207 = vmatmul.mubr.msk.bf16.gmra.mxu1 %vm604_vm8, %v5692_v47  ;;  %4204 = vmatmul.mubr.msk.bf16.gmra.mxu0 %vm604_vm8, %v2232_v15 }
 0x8ae   : > { %2392 = vmatprep.mubr.bf16.mxu1 %v6340_v1  ;;  %2658 = vmatprep.mubr.bf16.mxu0 %v6340_v1 }
 0x8b5   : > { %4208 = vmatmul.mubr.msk.bf16.gmra.mxu1 %vm604_vm8, %v5699_v52 }
 0x8b6   : > { %2820 = vmatprep.mubr.bf16.mxu1 %v6340_v1 }
 0x955   : > { %v5783_v58 = vpop.f32.mrf.mxu0 }
 0x957   : > { %v5785_v47 = vpop.f32.mrf.mxu0 }
 0x959   : > { %v5787_v7 = vpop.f32.mrf.mxu0 }
 0x95b   : > { %v5791_v18 = vpop.f32.mrf.mxu0 }
 0x95d   : > { %v5793_v39 = vpop.f32.mrf.mxu1  ;;  %v5795_v52 = vpop.f32.mrf.mxu0 }
 0x95f   : > { %v2366_v9 = vpop.f32.mrf.mxu1  ;;  %v5797_v37 = vpop.f32.mrf.mxu0 }
 0x961   : > { %v5799_v45 = vpop.f32.mrf.mxu1  ;;  %v5801_v19 = vpop.f32.mrf.mxu0 }
 0x963   : > { %v2370_v8 = vpop.f32.mrf.mxu1  ;;  %v5803_v28 = vpop.f32.mrf.mxu0 }
 0x965   : > { %v2374_v48 = vpop.f32.mrf.mxu1  ;;  %v2299_v43 = vpop.f32.mrf.mxu0 }
 0x967   : > { %v2376_v38 = vpop.f32.mrf.mxu1  ;;  %v2301_v55 = vpop.f32.mrf.mxu0 }
 0x969   : > { %v2378_v6 = vpop.f32.mrf.mxu1  ;;  %v2303_v50 = vpop.f32.mrf.mxu0 }
 0x96b   : > { %v2380_v51 = vpop.f32.mrf.mxu1  ;;  %v2305_v54 = vpop.f32.mrf.mxu0 }
 0x96d   : > { %v2384_v53 = vpop.f32.mrf.mxu1  ;;  %v2309_v5 = vpop.f32.mrf.mxu0 }
 0x96e   : > { %v2385_v35 = vadd.f32 %v2384_v53, %v2299_v43  ;;  %v2425_v53 = vpop.permute.xlu0 %2424 }
 0x96f   : > { %v2386_v44 = vpop.f32.mrf.mxu1  ;;  %v2311_v0 = vpop.f32.mrf.mxu0 }
 0x970   : > { %v2387_v41 = vadd.f32 %v2386_v44, %v2301_v55  ;;  %v2460_v55 = vadd.f32 %v2435_v25, %v2385_v35  ;;  %v2377_v35 = vadd.f32 %v2376_v38, %v5797_v37 }
 0x971   : > { %v2388_v10 = vpop.f32.mrf.mxu1  ;;  %v2313_v21 = vpop.f32.mrf.mxu0 }
 0x972   : > { %v2461_v13 = vadd.f32 %v2435_v25, %v2387_v41  ;;  %v2389_v62 = vadd.f32 %v2388_v10, %v2303_v50  ;;  %v2367_v25 = vadd.f32 %v2366_v9, %v5785_v47 }
 0x973   : > { %v2390_v33 = vpop.f32.mrf.mxu1 }
 0x974   : > { %v2391_v57 = vadd.f32 %v2390_v33, %v2305_v54  ;;  %v4218_v22 = vmul.f32 -1.442695, %v2461_v13  ;;  %v2462_v15 = vadd.f32 %v2440_v3, %v2389_v62  ;;  %v2315_v33 = vpop.f32.mrf.mxu0  ;;  %v2430_v62 = vpop.permute.xlu1 %2429 }
 0x975   : > { %v2394_v4 = vpop.f32.mrf.mxu1 }
 0x976   : > { %v2463_v16 = vadd.f32 %v2440_v3, %v2391_v57  ;;  %v2395_v31 = vadd.f32 %v2394_v4, %v2309_v5  ;;  %4752 = vpow2.f32 %v4218_v22  ;;  %v4219_v54 = vmul.f32 -1.442695, %v2462_v15 }
 0x977   : > { %v2396_v17 = vpop.f32.mrf.mxu1  ;;  %v4217_v3 = vmul.f32 -1.442695, %v2460_v55 }
 0x978   : > { %v4220_v1 = vmul.f32 -1.442695, %v2463_v16  ;;  %v2464_v36 = vadd.f32 %v2445_v49, %v2395_v31  ;;  %v2397_v63 = vadd.f32 %v2396_v17, %v2311_v0  ;;  %v2420_v22 = vpop.permute.xlu1 %2419  ;;  %v2379_v31 = vadd.f32 %v2378_v6, %v5801_v19 }
 0x979   : > { %v2398_v44 = vpop.f32.mrf.mxu1  ;;  %v2369_v19 = vadd.f32 %v5799_v45, %v5787_v7 }
 0x97a   : > { %4754 = vpow2.f32 %v4220_v1  ;;  %v4221_v41 = vmul.f32 -1.442695, %v2464_v36  ;;  %v2465_v50 = vadd.f32 %v2445_v49, %v2397_v63  ;;  %v2399_v10 = vadd.f32 %v2398_v44, %v2313_v21  ;;  %v2415_v49 = vpop.permute.xlu0 %2414 }
 0x97b   : > { %v2400_v43 = vpop.f32.mrf.mxu1  ;;  %v2371_v1 = vadd.f32 %v2370_v8, %v5791_v18  ;;  %v2375_v36 = vadd.f32 %v2374_v48, %v5795_v52  ;;  %v2453_v16 = vadd.f32 %v2415_v49, %v2367_v25  ;;  %v2457_v21 = vadd.f32 %v2425_v53, %v2377_v35 }
 0x97c   : > { %v4222_v13 = vmul.f32 -1.442695, %v2465_v50  ;;  %v2466_v57 = vadd.f32 %v2450_v2, %v2399_v10  ;;  %v2401_v5 = vadd.f32 %v2400_v43, %v2315_v33  ;;  %4756 = vpow2.f32 %v4221_v41 }
 0x97d   : > { %v2455_v15 = vadd.f32 %v2420_v22, %v2371_v1  ;;  %v2456_v47 = vadd.f32 %v2425_v53, %v2375_v36  ;;  %v2458_v8 = vadd.f32 %v2430_v62, %v2379_v31  ;;  %v2365_v10 = vadd.f32 %v5793_v39, %v5783_v58 }
 0x97e   : > { %4758 = vpow2.f32 %v4222_v13  ;;  %v4223_v4 = vmul.f32 -1.442695, %v2466_v57  ;;  %v2467_v0 = vadd.f32 %v2450_v2, %v2401_v5  ;;  %v2381_v2 = vadd.f32 %v2380_v51, %v5803_v28 }
 0x97f   : > { %4760 = vpow2.f32 %v4219_v54  ;;  %v2454_v33 = vadd.f32 %v2420_v22, %v2369_v19  ;;  %v2452_v7 = vadd.f32 %v2415_v49, %v2365_v10 }
 0x980   : > { %4762 = vpow2.f32 %v4223_v4  ;;  %v4224_v63 = vmul.f32 -1.442695, %v2467_v0  ;;  %v2459_v52 = vadd.f32 %v2430_v62, %v2381_v2 }
 0x981   : > { %4764 = vpow2.f32 %v4217_v3 }
 0x982   : > { %4766 = vpow2.f32 %v4224_v63 }
 0x983   : > { %v4753_v9 = vpop.eup %4752  ;;  %4768 = vtanh.f32 %v2453_v16 }
 0x984   : > { %4770 = vtanh.f32 %v2455_v15  ;;  %v2501_v48 = vadd.f32 1.0, %v4753_v9 }
 0x985   : > { %4772 = vtanh.f32 %v2456_v47 }
 0x986   : > { %4774 = vtanh.f32 %v2457_v21 }
 0x987   : > { %v4755_v18 = vpop.eup %4754  ;;  %4776 = vtanh.f32 %v2458_v8 }
 0x988   : > { %v2503_v37 = vadd.f32 1.0, %v4755_v18  ;;  %4778 = vtanh.f32 %v2459_v52 }
 0x989   : > { %v4757_v17 = vpop.eup %4756  ;;  %4780 = vrcp.f32 %v2501_v48 }
 0x98a   : > { %v2504_v51 = vadd.f32 1.0, %v4757_v17  ;;  %4782 = vrcp.f32 %v2503_v37  ;;  %v4585_v17 = vld [vmem:[%s6333_s5 + $0x60] sm:$0xff]   ;;  %v6345_v37 = vmov 0  }
 0x98b   : > { %v4759_v38 = vpop.eup %4758 }
 0x98c   : > { %v4761_v55 = vpop.eup %4760  ;;  %v2505_v28 = vadd.f32 1.0, %v4759_v38  ;;  %v4586_v38 = vld [vmem:[%s6333_s5 + $0x68] sm:$0xff]  }
 0x98d   : > { %v4763_v6 = vpop.eup %4762  ;;  %v2502_v54 = vadd.f32 1.0, %v4761_v55  ;;  %v4591_v55 = vld [vmem:[%s6333_s5 + $0x70] sm:$0xff]  }
 0x98e   : > { %v4765_v44 = vpop.eup %4764  ;;  %v2506_v41 = vadd.f32 1.0, %v4763_v6  ;;  %4784 = vrcp.f32 %v2505_v28 }
 0x98f   : > { %v4767_v50 = vpop.eup %4766  ;;  %v2500_v53 = vadd.f32 1.0, %v4765_v44  ;;  %v4592_v44 = vld [vmem:[%s6333_s5 + $0x78] sm:$0xff]  }
 0x990   : > { %4786 = vrcp.f32 %v2506_v41  ;;  %v2507_v43 = vadd.f32 1.0, %v4767_v50  ;;  %v4769_v45 = vpop.eup %4768  ;;  %v2567_v50 = vpop.permute.xlu0 %2566 }
 0x991   : > { %4788 = vrcp.f32 %v2504_v51  ;;  %v4771_v13 = vpop.eup %4770  ;;  %v2572_v51 = vpop.permute.xlu1 %2571 }
 0x992   : > { %4790 = vrcp.f32 %v2507_v43  ;;  %v4773_v57 = vpop.eup %4772 }
 0x993   : > { %4792 = vrcp.f32 %v2502_v54  ;;  %v4775_v5 = vpop.eup %4774 }
 0x994   : > { %4794 = vtanh.f32 %v2454_v33  ;;  %v4777_v62 = vpop.eup %4776 }
 0x995   : > { %4796 = vrcp.f32 %v2500_v53  ;;  %v4779_v3 = vpop.eup %4778  ;;  %v2562_v33 = vpop.permute.xlu1 %2561 }
 0x996   : > { %4798 = vtanh.f32 %v2452_v7  ;;  %v4781_v58 = vpop.eup %4780 }
 0x997   : > { %v4783_v39 = vpop.eup %4782  ;;  %v2525_v47 = vmul.f32 %v4781_v58, %v4769_v45  ;;  %v2557_v45 = vpop.permute.xlu0 %2556 }
 0x998   : > { %v2527_v22 = vmul.f32 %v4783_v39, %v4771_v13 }
 0x99a   : > { %v2542_v8 = vpack.c.bf16 %v2527_v22, %v2525_v47  ;;  %v4276_v47 = vld [vmem:[%s6332_s4 + $0x138] sm:$0xff] }
 0x99b   : > { %v4785_v4 = vpop.eup %4784 }
 0x99c   : > { %v2529_v35 = vmul.f32 %v4785_v4, %v4775_v5 }
 0x99d   : > { %v4787_v0 = vpop.eup %4786 }
 0x99e   : > { %v4789_v25 = vpop.eup %4788  ;;  %v2530_v63 = vmul.f32 %v4787_v0, %v4777_v62 }
 0x99f   : > { %v4791_v1 = vpop.eup %4790  ;;  %v2528_v31 = vmul.f32 %v4789_v25, %v4773_v57 }
 0x9a0   : > { %v4793_v36 = vpop.eup %4792  ;;  %v2531_v49 = vmul.f32 %v4791_v1, %v4779_v3 }
 0x9a1   : > { %v4795_v16 = vpop.eup %4794  ;;  %v2543_v9 = vpack.c.bf16 %v2530_v63, %v2528_v31  ;;  %v5894_v31 = vld [vmem:[%s6331_s3 + $0x90] sm:$0xff]  }
 0x9a2   : > { %v4797_v15 = vpop.eup %4796  ;;  %v2544_v2 = vpack.c.bf16 %v2531_v49, %v2529_v35  ;;  %v2526_v21 = vmul.f32 %v4795_v16, %v4793_v36  ;;  %v5879_v49 = vld [vmem:[%s6331_s3 + $0x80] sm:$0xff]   ;;  %v5887_v16 = vld [vmem:[%s6331_s3 + $0x88] sm:$0xff]  }
 0x9a3   : > { %v4799_v18 = vpop.eup %4798 }
 0x9a4   : > { %2638 = vmatprep.subr.bf16.mxu0 %v2544_v2  ;;  %v2524_v52 = vmul.f32 %v4799_v18, %v4797_v15  ;;  %v5901_v15 = vld [vmem:[%s6331_s3 + $0x98] sm:$0xff]   ;;  %v4275_v2 = vld [vmem:[%s6332_s4 + $0x130] sm:$0xff] }
 0x9a5   : > { %2639 = vmatpush1.bf16.msra.mxu0 %v2543_v9  ;;  %v4273_v9 = vld [vmem:[%s6332_s4 + $0x120] sm:$0xff]  ;;  %v4271_v18 = vld [vmem:[%s6332_s4 + $0x110] sm:$0xff] }
 0x9a6   : > { %2640 = vmatprep.subr.bf16.mxu0 %v2542_v8  ;;  %v2541_v48 = vpack.c.bf16 %v2526_v21, %v2524_v52  ;;  %v4274_v21 = vld [vmem:[%s6332_s4 + $0x128] sm:$0xff]  ;;  %v4272_v8 = vld [vmem:[%s6332_s4 + $0x118] sm:$0xff]  ;;  %v4269_v52 = vld [vmem:[%s6332_s4 + $0x100] sm:$0xff] }
 0x9a9   : > { %2641 = vmatpush1.bf16.msra.mxu0 %v2541_v48  ;;  %v4270_v48 = vld [vmem:[%s6332_s4 + $0x108] sm:$0xff] }
 0x9ac   : > { %4245 = vmatmul.mubr.msk.bf16.vlgmr.msra.gmra.mxu0 %vm604_vm8, %v4585_v17  ;;  %v4295_v17 = vld [vmem:[%s6334_s6 + $0x110] sm:$0xff] }
 0x9ad   : > { %2668 = vmatprep.mubr.bf16.mxu0 %v6345_v37 }
 0x9b4   : > { %4246 = vmatmul.mubr.msk.bf16.gmra.mxu0 %vm604_vm8, %v4586_v38  ;;  %v4296_v38 = vld [vmem:[%s6334_s6 + $0x118] sm:$0xff] }
 0x9b5   : > { %2678 = vmatprep.mubr.bf16.mxu0 %v6345_v37 }
 0x9bc   : > { %4247 = vmatmul.mubr.msk.bf16.gmra.mxu0 %vm604_vm8, %v4591_v55  ;;  %v4293_v55 = vld [vmem:[%s6334_s6 + $0x100] sm:$0xff] }
 0x9bd   : > { %2686 = vmatprep.mubr.bf16.mxu0 %v6345_v37 }
 0x9c4   : > { %4248 = vmatmul.mubr.msk.bf16.gmra.mxu0 %vm604_vm8, %v4592_v44 }
 0x9c5   : > { %2905 = vmatprep.mubr.bf16.mxu0 %v6345_v37 }
 0xa6c   : > { %v2660_v19 = vpop.f32.mrf.mxu0 }
 0xa6d   : > { %v2661_v62 = vadd.f32 %v2660_v19, %v2557_v45  ;;  %v4294_v19 = vld [vmem:[%s6334_s6 + $0x108] sm:$0xff] }
 0xa6e   : > { %v2662_v28 = vpop.f32.mrf.mxu0 }
 0xa6f   : > { %v2663_v58 = vadd.f32 %v2662_v28, %v2557_v45  ;;  %v5856_v35 = vadd.f32 %v2661_v62, %v5654_v27 }
 0xa70   : > { %v2664_v6 = vpop.f32.mrf.mxu0 }
 0xa71   : > { %v2665_v53 = vadd.f32 %v2664_v6, %v2562_v33 }
 0xa72   : > { %v2666_v41 = vpop.f32.mrf.mxu0 }
 0xa73   : > { %v2667_v13 = vadd.f32 %v2666_v41, %v2562_v33  ;;  %v5842_v25 = vadd.f32 %v2665_v53, %v5640_v14 }
 0xa74   : > { %v2670_v10 = vpop.f32.mrf.mxu0 }
 0xa75   : > { %v2671_v43 = vadd.f32 %v2670_v10, %v2567_v50  ;;  %v5845_v1 = vadd.f32 %v2667_v13, %v5643_v34  ;;  %v4520_v27 = vpack.i.bf16 %v5842_v25, %v5856_v35  ;;  %v2735_v22 = vpack.c.bf16 %v5842_v25, %v5856_v35 }
 0xa76   : > { %v2672_v54 = vpop.f32.mrf.mxu0 }
 0xa77   : > { %v2673_v57 = vadd.f32 %v2672_v54, %v2567_v50  ;;  %v5836_v39 = vadd.f32 %v2671_v43, %v5634_v12 }
 0xa78   : > { %v2674_v7 = vpop.f32.mrf.mxu0 }
 0xa79   : > { %v2675_v5 = vadd.f32 %v2674_v7, %v2572_v51  ;;  %v5848_v63 = vadd.f32 %v2673_v57, %v5646_v11 }
 0xa7a   : > { %v2676_v3 = vpop.f32.mrf.mxu0 }
 0xa7b   : > { %v5839_v4 = vadd.f32 %v2675_v5, %v5637_v30  ;;  %v2677_v0 = vadd.f32 %v2676_v3, %v2572_v51  ;;  %v5859_v30 = vadd.f32 %v2663_v58, %v5657_v59 }
 0xa7c   : > { %v2680_v28 = vpop.f32.mrf.mxu0 }
 0xa7d   : > { %v5851_v36 = vadd.f32 %v2677_v0, %v5649_v61  ;;  %v4515_v12 = vpack.i.bf16 %v5839_v4, %v5836_v39  ;;  %v2737_v11 = vpack.c.bf16 %v5839_v4, %v5836_v39  ;;  %v2736_v61 = vpack.c.bf16 %v5845_v1, %v5859_v30 }
 0xa7e   : > { %v4530_v59 = vpack.i.bf16 %v5845_v1, %v5859_v30  ;;  %v5943_v6 = vpop.f32.mrf.mxu0 }
 0xa7f   : > { %4516 = vrot.lane.b32.xlu0 %v4515_v12, %s4924_s24  ;;  %v4525_v14 = vpack.i.bf16 %v5851_v36, %v5848_v63  ;;  %v2738_v34 = vpack.c.bf16 %v5851_v36, %v5848_v63  ;;  %6346 = vst [vmem:[#allocation5_spill] sm:$0xff] %v5943_v6 }
 0xa80   : > { %v2683_v51 = vpop.f32.mrf.mxu0 }
 0xa81   : > { %4526 = vrot.lane.b32.xlu1 %v4525_v14, %s4924_s24  ;;  %2800 = vmatprep.subr.bf16.mxu1 %v2738_v34 }
 0xa82   : > { %2801 = vmatpush1.bf16.msra.mxu1 %v2737_v11 }
 0xa83   : > { %2802 = vmatprep.subr.bf16.mxu1 %v2736_v61  ;;  %4521 = vrot.lane.b32.xlu0 %v4520_v27, %s4924_s24 }
 0xa85   : > { %4531 = vrot.lane.b32.xlu1 %v4530_v59, %s4924_s24 }
 0xa86   : > { %2803 = vmatpush1.bf16.msra.mxu1 %v2735_v22 }
 0xa87   : > { %2768 = vrot.lane.b32.xlu0 %v5879_v49, %s4923_s27 }
 0xa89   : > { %2770 = vrot.lane.b32.xlu1 %v5887_v16, %s4923_s27 }
 0xa8b   : > { %2772 = vrot.lane.b32.xlu0 %v5894_v31, %s4923_s27 }
 0xa8d   : > { %2774 = vrot.lane.b32.xlu1 %v5901_v15, %s4923_s27 }
 0xa8f   : > { %2987 = vperm.xlu0 %4433, %v4275_v2  }
 0xa91   : > { %2992 = vperm.xlu1 %4434, %v4276_v47  }
 0xa93   : > { %2977 = vperm.xlu0 %4433, %v4273_v9  }
 0xa95   : > { %2982 = vperm.xlu1 %4434, %v4274_v21  }
 0xa97   : > { %2967 = vperm.xlu0 %4433, %v4271_v18  }
 0xa99   : > { %2972 = vperm.xlu1 %4434, %v4272_v8  }
 0xa9b   : > { %2957 = vperm.xlu0 %4433, %v4269_v52  }
 0xa9d   : > { %2962 = vperm.xlu1 %4434, %v4270_v48  }
 0xa9f   : > { %3109 = vperm.xlu0 %4433, %v4295_v17  }
 0xaa1   : > { %3114 = vperm.xlu1 %4434, %v4296_v38  }
 0xaa3   : > { %3099 = vperm.xlu0 %4433, %v4293_v55  }
 0xaa5   : > { %3104 = vperm.xlu1 %4434, %v4294_v19  }
 0xaf1   : > { %v4517_v44 = vpop.permute.xlu0 %4516 }
 0xaf2   : > { %v4519_v50 = vunpack.i.h.bf16 %v4517_v44  ;;  %v4518_v10 = vunpack.i.l.bf16 %v4517_v44 }
 0xaf3   : > { %v4527_v41 = vpop.permute.xlu1 %4526 }
 0xaf4   : > { %v4529_v54 = vunpack.i.h.bf16 %v4527_v41  ;;  %v4528_v33 = vunpack.i.l.bf16 %v4527_v41 }
 0xaf5   : > { %v4522_v43 = vpop.permute.xlu0 %4521 }
 0xaf6   : > { %v2729_v53 = vsel %vm1092_vm9, %v4528_v33, %v4518_v10  ;;  %v2730_v7 = vsel %vm1092_vm9, %v4529_v54, %v4519_v50  ;;  %v4524_v13 = vunpack.i.h.bf16 %v4522_v43  ;;  %v2725_v5 = vsel %vm1092_vm9, %v4518_v10, %v4528_v33 }
 0xaf7   : > { %v2733_v45 = vpack.c.bf16 %v2730_v7, %v2729_v53  ;;  %v4532_v57 = vpop.permute.xlu1 %4531  ;;  %v2726_v62 = vsel %vm1092_vm9, %v4519_v50, %v4529_v54  ;;  %v4523_v3 = vunpack.i.l.bf16 %v4522_v43 }
 0xaf8   : > { %v4534_v58 = vunpack.i.h.bf16 %v4532_v57  ;;  %v4533_v0 = vunpack.i.l.bf16 %v4532_v57  ;;  %v2734_v12 = vpack.c.bf16 %v2726_v62, %v2725_v5 }
 0xaf9   : > { %v2769_v14 = vpop.permute.xlu0 %2768 }
 0xafa   : > { %v2727_v34 = vsel %vm1092_vm9, %v4533_v0, %v4523_v3  ;;  %v2728_v11 = vsel %vm1092_vm9, %v4534_v58, %v4524_v13  ;;  %2885 = vmatprep.subr.bf16.mxu0 %v2734_v12  ;;  %4261 = vmatmul.mubr.msk.bf16.vlgmr.msra.gmra.mxu1 %vm604_vm8, %v2769_v14  ;;  %v2723_v61 = vsel %vm1092_vm9, %v4523_v3, %v4533_v0 }
 0xafb   : > { %v2731_v27 = vpack.c.bf16 %v2728_v11, %v2727_v34  ;;  %2886 = vmatpush1.bf16.msra.mxu0 %v2733_v45  ;;  %v2724_v59 = vsel %vm1092_vm9, %v4524_v13, %v4534_v58  ;;  %2830 = vmatprep.mubr.bf16.mxu1 %v6345_v37  ;;  %v2771_v2 = vpop.permute.xlu1 %2770 }
 0xafc   : > { %v2732_v22 = vpack.c.bf16 %v2724_v59, %v2723_v61 }
 0xafd   : > { %v2773_v47 = vpop.permute.xlu0 %2772 }
 0xafe   : > { %2887 = vmatprep.subr.bf16.mxu0 %v2732_v22 }
 0xaff   : > { %2888 = vmatpush1.bf16.msra.mxu0 %v2731_v27  ;;  %v2775_v9 = vpop.permute.xlu1 %2774 }
 0xb02   : > { %4265 = vmatmul.mubr.msk.bf16.vlgmr.msra.gmra.mxu0 %vm604_vm8, %v5879_v49  ;;  %4262 = vmatmul.mubr.msk.bf16.gmra.mxu1 %vm604_vm8, %v2771_v2  ;;  %v5981_v49 = vpop.f32.mrf.mxu0 }
 0xb03   : > { %2915 = vmatprep.mubr.bf16.mxu0 %v6345_v37  ;;  %2840 = vmatprep.mubr.bf16.mxu1 %v6345_v37  ;;  %6347 = vst [vmem:[#allocation6_spill] sm:$0xff] %v5981_v49 }
 0xb0a   : > { %4266 = vmatmul.mubr.msk.bf16.gmra.mxu0 %vm604_vm8, %v5887_v16  ;;  %4263 = vmatmul.mubr.msk.bf16.gmra.mxu1 %vm604_vm8, %v2773_v47  ;;  %v2688_v16 = vpop.f32.mrf.mxu0  ;;  %v2988_v7 = vpop.permute.xlu0 %2987 }
 0xb0b   : > { %2925 = vmatprep.mubr.bf16.mxu0 %v6345_v37  ;;  %2850 = vmatprep.mubr.bf16.mxu1 %v6345_v37 }
 0xb0c   : > { %v5983_v21 = vpop.f32.mrf.mxu0  ;;  %v2993_v5 = vpop.permute.xlu1 %2992 }
 0xb0d   : > { %6348 = vst [vmem:[#allocation7_spill] sm:$0xff] %v5983_v21 }
 0xb0e   : > { %v2691_v18 = vpop.f32.mrf.mxu0  ;;  %v2978_v0 = vpop.permute.xlu0 %2977 }
 0xb10   : > { %v5991_v48 = vpop.f32.mrf.mxu0  ;;  %v2983_v59 = vpop.permute.xlu1 %2982 }
 0xb11   : > { %6349 = vst [vmem:[#allocation8_spill] sm:$0xff] %v5991_v48 }
 0xb12   : > { %4267 = vmatmul.mubr.msk.bf16.gmra.mxu0 %vm604_vm8, %v5894_v31  ;;  %4264 = vmatmul.mubr.msk.bf16.gmra.mxu1 %vm604_vm8, %v2775_v9 }
 0xb13   : > { %2935 = vmatprep.mubr.bf16.mxu0 %v6345_v37  ;;  %3201 = vmatprep.mubr.bf16.mxu1 %v6345_v37 }
 0xb1a   : > { %4268 = vmatmul.mubr.msk.bf16.gmra.mxu0 %vm604_vm8, %v5901_v15 }
 0xb1b   : > { %3363 = vmatprep.mubr.bf16.mxu0 %v6345_v37 }
 0xbba   : > { %v5985_v8 = vpop.f32.mrf.mxu1 }
 0xbbc   : > { %v5987_v31 = vpop.f32.mrf.mxu1 }
 0xbbe   : > { %v5989_v52 = vpop.f32.mrf.mxu1 }
 0xbc0   : > { %v5993_v17 = vpop.f32.mrf.mxu1 }
 0xbc2   : > { %v5995_v38 = vpop.f32.mrf.mxu0  ;;  %v5997_v15 = vpop.f32.mrf.mxu1 }
 0xbc4   : > { %v2909_v55 = vpop.f32.mrf.mxu0  ;;  %v5999_v19 = vpop.f32.mrf.mxu1 }
 0xbc6   : > { %v6001_v28 = vpop.f32.mrf.mxu0  ;;  %v6003_v51 = vpop.f32.mrf.mxu1 }
 0xbc8   : > { %v2913_v44 = vpop.f32.mrf.mxu0  ;;  %v6005_v41 = vpop.f32.mrf.mxu1 }
 0xbca   : > { %v2917_v50 = vpop.f32.mrf.mxu0  ;;  %v2842_v10 = vpop.f32.mrf.mxu1 }
 0xbcc   : > { %v2919_v54 = vpop.f32.mrf.mxu0  ;;  %v2844_v33 = vpop.f32.mrf.mxu1 }
 0xbce   : > { %v2921_v43 = vpop.f32.mrf.mxu0  ;;  %v2846_v53 = vpop.f32.mrf.mxu1 }
 0xbd0   : > { %v2923_v45 = vpop.f32.mrf.mxu0  ;;  %v2848_v13 = vpop.f32.mrf.mxu1 }
 0xbd2   : > { %v2927_v57 = vpop.f32.mrf.mxu0  ;;  %v2852_v62 = vpop.f32.mrf.mxu1 }
 0xbd3   : > { %v2928_v22 = vadd.f32 %v2927_v57, %v2842_v10  ;;  %v2968_v57 = vpop.permute.xlu0 %2967 }
 0xbd4   : > { %v2929_v3 = vpop.f32.mrf.mxu0  ;;  %v2854_v34 = vpop.f32.mrf.mxu1 }
 0xbd5   : > { %v2930_v58 = vadd.f32 %v2929_v3, %v2844_v33  ;;  %v3003_v33 = vadd.f32 %v2978_v0, %v2928_v22 }
 0xbd6   : > { %v2931_v12 = vpop.f32.mrf.mxu0  ;;  %v2856_v6 = vpop.f32.mrf.mxu1 }
 0xbd7   : > { %v3004_v14 = vadd.f32 %v2978_v0, %v2930_v58  ;;  %v2932_v11 = vadd.f32 %v2931_v12, %v2846_v53  ;;  %v2910_v0 = vadd.f32 %v2909_v55, %v5987_v31 }
 0xbd8   : > { %v2933_v61 = vpop.f32.mrf.mxu0 }
 0xbd9   : > { %v2934_v27 = vadd.f32 %v2933_v61, %v2848_v13  ;;  %v4278_v2 = vmul.f32 -1.442695, %v3004_v14  ;;  %v3005_v18 = vadd.f32 %v2983_v59, %v2932_v11  ;;  %v2858_v61 = vpop.f32.mrf.mxu1  ;;  %v2973_v11 = vpop.permute.xlu1 %2972 }
 0xbda   : > { %v2937_v47 = vpop.f32.mrf.mxu0 }
 0xbdb   : > { %v3006_v9 = vadd.f32 %v2983_v59, %v2934_v27  ;;  %v2938_v16 = vadd.f32 %v2937_v47, %v2852_v62  ;;  %4800 = vpow2.f32 %v4278_v2  ;;  %v4279_v13 = vmul.f32 -1.442695, %v3005_v18 }
 0xbdc   : > { %v2939_v48 = vpop.f32.mrf.mxu0  ;;  %v4277_v59 = vmul.f32 -1.442695, %v3003_v33  ;;  %v2922_v2 = vadd.f32 %v2921_v43, %v6003_v51  ;;  %v2912_v51 = vadd.f32 %v6001_v28, %v5989_v52 }
 0xbdd   : > { %v4280_v49 = vmul.f32 -1.442695, %v3006_v9  ;;  %v3007_v21 = vadd.f32 %v2988_v7, %v2938_v16  ;;  %v2940_v46 = vadd.f32 %v2939_v48, %v2854_v34  ;;  %v2963_v34 = vpop.permute.xlu1 %2962 }
 0xbde   : > { %v2941_v3 = vpop.f32.mrf.mxu0 }
 0xbdf   : > { %4802 = vpow2.f32 %v4280_v49  ;;  %v4281_v58 = vmul.f32 -1.442695, %v3007_v21  ;;  %v3008_v53 = vadd.f32 %v2988_v7, %v2940_v46  ;;  %v2942_v12 = vadd.f32 %v2941_v3, %v2856_v6  ;;  %v2958_v21 = vpop.permute.xlu0 %2957 }
 0xbe0   : > { %v2943_v10 = vpop.f32.mrf.mxu0  ;;  %v2914_v49 = vadd.f32 %v2913_v44, %v5993_v17  ;;  %v2918_v6 = vadd.f32 %v2917_v50, %v5997_v15  ;;  %v2920_v7 = vadd.f32 %v2919_v54, %v5999_v19  ;;  %v2996_v22 = vadd.f32 %v2958_v21, %v2910_v0 }
 0xbe1   : > { %v4282_v14 = vmul.f32 -1.442695, %v3008_v53  ;;  %v3009_v27 = vadd.f32 %v2993_v5, %v2942_v12  ;;  %v2944_v62 = vadd.f32 %v2943_v10, %v2858_v61  ;;  %4804 = vpow2.f32 %v4281_v58 }
 0xbe2   : > { %v2998_v9 = vadd.f32 %v2963_v34, %v2914_v49  ;;  %v2999_v31 = vadd.f32 %v2968_v57, %v2918_v6  ;;  %v3000_v16 = vadd.f32 %v2968_v57, %v2920_v7  ;;  %v3001_v44 = vadd.f32 %v2973_v11, %v2922_v2 }
 0xbe3   : > { %4806 = vpow2.f32 %v4282_v14  ;;  %v4283_v47 = vmul.f32 -1.442695, %v3009_v27  ;;  %v3010_v48 = vadd.f32 %v2993_v5, %v2944_v62  ;;  %v2924_v5 = vadd.f32 %v2923_v45, %v6005_v41 }
 0xbe4   : > { %4808 = vpow2.f32 %v4279_v13  ;;  %v2908_v12 = vadd.f32 %v5995_v38, %v5985_v8  ;;  %v2997_v61 = vadd.f32 %v2963_v34, %v2912_v51 }
 0xbe5   : > { %4810 = vpow2.f32 %v4283_v47  ;;  %v4284_v46 = vmul.f32 -1.442695, %v3010_v48  ;;  %v3002_v15 = vadd.f32 %v2973_v11, %v2924_v5 }
 0xbe6   : > { %4812 = vpow2.f32 %v4277_v59  ;;  %v2995_v52 = vadd.f32 %v2958_v21, %v2908_v12 }
 0xbe7   : > { %4814 = vpow2.f32 %v4284_v46 }
 0xbe8   : > { %v4801_v55 = vpop.eup %4800  ;;  %4816 = vtanh.f32 %v2996_v22 }
 0xbe9   : > { %4818 = vtanh.f32 %v2998_v9  ;;  %v3044_v50 = vadd.f32 1.0, %v4801_v55 }
 0xbea   : > { %4820 = vtanh.f32 %v2999_v31 }
 0xbeb   : > { %4822 = vtanh.f32 %v3000_v16 }
 0xbec   : > { %v4803_v17 = vpop.eup %4802  ;;  %4824 = vtanh.f32 %v3001_v44 }
 0xbed   : > { %v3046_v19 = vadd.f32 1.0, %v4803_v17  ;;  %4826 = vtanh.f32 %v3002_v15 }
 0xbee   : > { %v4805_v18 = vpop.eup %4804  ;;  %4828 = vrcp.f32 %v3044_v50 }
 0xbef   : > { %v3047_v45 = vadd.f32 1.0, %v4805_v18  ;;  %4830 = vrcp.f32 %v3046_v19  ;;  %v4593_v18 = vld [vmem:[%s6333_s5 + $0x80] sm:$0xff]   ;;  %v4594_v19 = vld [vmem:[%s6333_s5 + $0x88] sm:$0xff]  }
 0xbf0   : > { %v4807_v54 = vpop.eup %4806 }
 0xbf1   : > { %v4809_v33 = vpop.eup %4808  ;;  %v3048_v41 = vadd.f32 1.0, %v4807_v54  ;;  %v4595_v54 = vld [vmem:[%s6333_s5 + $0x90] sm:$0xff]  }
 0xbf2   : > { %v4811_v43 = vpop.eup %4810  ;;  %v3045_v13 = vadd.f32 1.0, %v4809_v33  ;;  %v4596_v33 = vld [vmem:[%s6333_s5 + $0x98] sm:$0xff]  }
 0xbf3   : > { %v4813_v3 = vpop.eup %4812  ;;  %v3049_v58 = vadd.f32 1.0, %v4811_v43  ;;  %4832 = vrcp.f32 %v3048_v41 }
 0xbf4   : > { %v4815_v53 = vpop.eup %4814  ;;  %v3043_v57 = vadd.f32 1.0, %v4813_v3 }
 0xbf5   : > { %4834 = vrcp.f32 %v3049_v58  ;;  %v3050_v10 = vadd.f32 1.0, %v4815_v53  ;;  %v4817_v28 = vpop.eup %4816  ;;  %v3110_v58 = vpop.permute.xlu0 %3109 }
 0xbf6   : > { %4836 = vrcp.f32 %v3047_v45  ;;  %v4819_v14 = vpop.eup %4818  ;;  %v3115_v45 = vpop.permute.xlu1 %3114 }
 0xbf7   : > { %4838 = vrcp.f32 %v3050_v10  ;;  %v4821_v27 = vpop.eup %4820 }
 0xbf8   : > { %4840 = vrcp.f32 %v3045_v13  ;;  %v4823_v62 = vpop.eup %4822 }
 0xbf9   : > { %4842 = vtanh.f32 %v2997_v61  ;;  %v4825_v11 = vpop.eup %4824 }
 0xbfa   : > { %4844 = vrcp.f32 %v3043_v57  ;;  %v4827_v59 = vpop.eup %4826  ;;  %v3105_v13 = vpop.permute.xlu1 %3104 }
 0xbfb   : > { %4846 = vtanh.f32 %v2995_v52  ;;  %v4829_v8 = vpop.eup %4828  ;;  %v3100_v52 = vpop.permute.xlu0 %3099 }
 0xbfc   : > { %v4831_v38 = vpop.eup %4830  ;;  %v3068_v31 = vmul.f32 %v4829_v8, %v4817_v28 }
 0xbfd   : > { %v3070_v34 = vmul.f32 %v4831_v38, %v4819_v14 }
 0xbff   : > { %v3085_v44 = vpack.c.bf16 %v3070_v34, %v3068_v31  ;;  %v4336_v31 = vld [vmem:[%s6332_s4 + $0x178] sm:$0xff] }
 0xc00   : > { %v4833_v47 = vpop.eup %4832 }
 0xc01   : > { %v3072_v7 = vmul.f32 %v4833_v47, %v4823_v62 }
 0xc02   : > { %v4835_v48 = vpop.eup %4834 }
 0xc03   : > { %v4837_v0 = vpop.eup %4836  ;;  %v3073_v46 = vmul.f32 %v4835_v48, %v4825_v11 }
 0xc04   : > { %v4839_v49 = vpop.eup %4838  ;;  %v3071_v2 = vmul.f32 %v4837_v0, %v4821_v27 }
 0xc05   : > { %v4841_v6 = vpop.eup %4840  ;;  %v3074_v21 = vmul.f32 %v4839_v49, %v4827_v59 }
 0xc06   : > { %v4843_v22 = vpop.eup %4842  ;;  %v3086_v55 = vpack.c.bf16 %v3073_v46, %v3071_v2 }
 0xc07   : > { %v4845_v9 = vpop.eup %4844  ;;  %v3087_v5 = vpack.c.bf16 %v3074_v21, %v3072_v7  ;;  %v3069_v16 = vmul.f32 %v4843_v22, %v4841_v6 }
 0xc08   : > { %v4847_v17 = vpop.eup %4846 }
 0xc09   : > { %3181 = vmatprep.subr.bf16.mxu1 %v3087_v5  ;;  %v3067_v15 = vmul.f32 %v4847_v17, %v4845_v9  ;;  %v6071_v9 = vld [vmem:[%s6331_s3 + $0xb8] sm:$0xff]   ;;  %v4335_v5 = vld [vmem:[%s6332_s4 + $0x170] sm:$0xff] }
 0xc0a   : > { %3182 = vmatpush1.bf16.msra.mxu1 %v3086_v55  ;;  %v4333_v55 = vld [vmem:[%s6332_s4 + $0x160] sm:$0xff]  ;;  %v4331_v17 = vld [vmem:[%s6332_s4 + $0x150] sm:$0xff] }
 0xc0b   : > { %3183 = vmatprep.subr.bf16.mxu1 %v3085_v44  ;;  %v3084_v50 = vpack.c.bf16 %v3069_v16, %v3067_v15  ;;  %v4334_v16 = vld [vmem:[%s6332_s4 + $0x168] sm:$0xff]  ;;  %v4332_v44 = vld [vmem:[%s6332_s4 + $0x158] sm:$0xff]  ;;  %v4329_v15 = vld [vmem:[%s6332_s4 + $0x140] sm:$0xff] }
 0xc0e   : > { %3184 = vmatpush1.bf16.msra.mxu1 %v3084_v50  ;;  %v4330_v50 = vld [vmem:[%s6332_s4 + $0x148] sm:$0xff] }
 0xc11   : > { %4305 = vmatmul.mubr.msk.bf16.vlgmr.msra.gmra.mxu1 %vm604_vm8, %v4593_v18  ;;  %v921_v18 = vld [vmem:[%s6334_s6 + $0x30] sm:$0xff] }
 0xc12   : > { %3211 = vmatprep.mubr.bf16.mxu1 %v6345_v37 }
 0xc19   : > { %4306 = vmatmul.mubr.msk.bf16.gmra.mxu1 %vm604_vm8, %v4594_v19  ;;  %v922_v19 = vld [vmem:[%s6334_s6 + $0x38] sm:$0xff] }
 0xc1a   : > { %3221 = vmatprep.mubr.bf16.mxu1 %v6345_v37 }
 0xc21   : > { %4307 = vmatmul.mubr.msk.bf16.gmra.mxu1 %vm604_vm8, %v4595_v54  ;;  %v4119_v54 = vld [vmem:[%s6334_s6 + $0x70] sm:$0xff] }
 0xc22   : > { %3229 = vmatprep.mubr.bf16.mxu1 %v6345_v37 }
 0xc29   : > { %4308 = vmatmul.mubr.msk.bf16.gmra.mxu1 %vm604_vm8, %v4596_v33  ;;  %v4120_v33 = vld [vmem:[%s6334_s6 + $0x78] sm:$0xff] }
 0xc2a   : > { %3448 = vmatprep.mubr.bf16.mxu1 %v6345_v37 }
 0xcd1   : > { %v3203_v51 = vpop.f32.mrf.mxu1 }
 0xcd2   : > { %v3204_v62 = vadd.f32 %v3203_v51, %v3100_v52  ;;  %v4179_v51 = vld [vmem:[%s6334_s6 + $0xb0] sm:$0xff] }
 0xcd3   : > { %v3205_v41 = vpop.f32.mrf.mxu1 }
 0xcd4   : > { %v3206_v59 = vadd.f32 %v3205_v41, %v3100_v52  ;;  %v3238_v21 = vadd.f32 %v3204_v62, %v5856_v35  ;;  %v6057_v35 = vld [vmem:[%s6331_s3 + $0xa8] sm:$0xff]   ;;  %v4180_v41 = vld [vmem:[%s6334_s6 + $0xb8] sm:$0xff]  ;;  %v4177_v52 = vld [vmem:[%s6334_s6 + $0xa0] sm:$0xff] }
 0xcd5   : > { %v3207_v43 = vpop.f32.mrf.mxu1  ;;  %v4299_v62 = vld [vmem:[%s6334_s6 + $0x130] sm:$0xff] }
 0xcd6   : > { %v3208_v10 = vadd.f32 %v3207_v43, %v3105_v13  ;;  %v3239_v34 = vadd.f32 %v3206_v59, %v5859_v30  ;;  %v6064_v30 = vld [vmem:[%s6331_s3 + $0xb0] sm:$0xff]   ;;  %v919_v43 = vld [vmem:[%s6334_s6 + $0x20] sm:$0xff] }
 0xcd7   : > { %v3209_v3 = vpop.f32.mrf.mxu1  ;;  %v4237_v59 = vld [vmem:[%s6334_s6 + $0xe0] sm:$0xff] }
 0xcd8   : > { %v3210_v28 = vadd.f32 %v3209_v3, %v3105_v13  ;;  %v3240_v48 = vadd.f32 %v3208_v10, %v5842_v25  ;;  %v4117_v3 = vld [vmem:[%s6334_s6 + $0x60] sm:$0xff]  ;;  %v4239_v13 = vld [vmem:[%s6334_s6 + $0xf0] sm:$0xff]  ;;  %v4240_v10 = vld [vmem:[%s6334_s6 + $0xf8] sm:$0xff] }
 0xcd9   : > { %v3213_v53 = vpop.f32.mrf.mxu1 }
 0xcda   : > { %v3214_v61 = vadd.f32 %v3213_v53, %v3110_v58  ;;  %v3241_v49 = vadd.f32 %v3210_v28, %v5845_v1  ;;  %v4540_v2 = vpack.i.bf16 %v3240_v48, %v3238_v21  ;;  %v4118_v53 = vld [vmem:[%s6334_s6 + $0x68] sm:$0xff] }
 0xcdb   : > { %v3215_v12 = vpop.f32.mrf.mxu1 }
 0xcdc   : > { %v3216_v14 = vadd.f32 %v3215_v12, %v3110_v58  ;;  %v3242_v8 = vadd.f32 %v3214_v61, %v5836_v39  ;;  %v3279_v25 = vpack.c.bf16 %v3241_v49, %v3239_v34  ;;  %v4550_v1 = vpack.i.bf16 %v3241_v49, %v3239_v34  ;;  %v4357_v49 = vld [vmem:[%s6334_s6 + $0x160] sm:$0xff]  ;;  %v3784_v34 = vld [vmem:[%s6336_s8 + $0x8] sm:$0xff] }
 0xcdd   : > { %v3217_v57 = vpop.f32.mrf.mxu1 }
 0xcde   : > { %v3218_v27 = vadd.f32 %v3217_v57, %v3115_v45  ;;  %v3243_v46 = vadd.f32 %v3216_v14, %v5848_v63  ;;  %v6051_v63 = vld [vmem:[%s6331_s3 + $0xa0] sm:$0xff]   ;;  %v4178_v14 = vld [vmem:[%s6334_s6 + $0xa8] sm:$0xff] }
 0xcdf   : > { %v3219_v11 = vpop.f32.mrf.mxu1 }
 0xce0   : > { %v3244_v38 = vadd.f32 %v3218_v27, %v5839_v4  ;;  %v3220_v47 = vadd.f32 %v3219_v11, %v3115_v45  ;;  %v920_v45 = vld [vmem:[%s6334_s6 + $0x28] sm:$0xff]  ;;  %v4300_v11 = vld [vmem:[%s6334_s6 + $0x138] sm:$0xff] }
 0xce1   : > { %v3223_v0 = vpop.f32.mrf.mxu1 }
 0xce2   : > { %v4535_v6 = vpack.i.bf16 %v3244_v38, %v3242_v8  ;;  %v3245_v7 = vadd.f32 %v3220_v47, %v5851_v36  ;;  %v3280_v4 = vpack.c.bf16 %v3244_v38, %v3242_v8  ;;  %v3278_v36 = vpack.c.bf16 %v3240_v48, %v3238_v21  ;;  %v4238_v8 = vld [vmem:[%s6334_s6 + $0xe8] sm:$0xff]  ;;  %v4359_v38 = vld [vmem:[%s6334_s6 + $0x170] sm:$0xff]  ;;  %v4360_v47 = vld [vmem:[%s6334_s6 + $0x178] sm:$0xff] }
 0xce3   : > { %v6128_v58 = vpop.f32.mrf.mxu1  ;;  %v4297_v48 = vld [vmem:[%s6334_s6 + $0x120] sm:$0xff]  ;;  %v4298_v0 = vld [vmem:[%s6334_s6 + $0x128] sm:$0xff] }
 0xce4   : > { %v4545_v22 = vpack.i.bf16 %v3245_v7, %v3243_v46  ;;  %4536 = vrot.lane.b32.xlu0 %v4535_v6, %s4925_s30  ;;  %v3281_v39 = vpack.c.bf16 %v3245_v7, %v3243_v46  ;;  %v4358_v46 = vld [vmem:[%s6334_s6 + $0x168] sm:$0xff]  ;;  %v3785_v6 = vld [vmem:[%s6336_s8 + $0x10] sm:$0xff]  ;;  %v3786_v7 = vld [vmem:[%s6336_s8 + $0x18] sm:$0xff] }
 0xce5   : > { %v3226_v12 = vpop.f32.mrf.mxu1  ;;  %v3783_v21 = vld [vmem:[%s6336_s8] sm:$0xff] }
 0xce6   : > { %4546 = vrot.lane.b32.xlu1 %v4545_v22, %s4925_s30  ;;  %3343 = vmatprep.subr.bf16.mxu0 %v3281_v39  ;;  %v3880_v22 = vld [vmem:[%s6338_s10] sm:$0xff]  ;;  %v3881_v39 = vld [vmem:[%s6338_s10 + $0x8] sm:$0xff] }
 0xce7   : > { %3344 = vmatpush1.bf16.msra.mxu0 %v3280_v4  ;;  %v6136_v61 = vpop.f32.mrf.mxu1 }
 0xce8   : > { %3345 = vmatprep.subr.bf16.mxu0 %v3279_v25  ;;  %4541 = vrot.lane.b32.xlu0 %v4540_v2, %s4925_s30 }
 0xce9   : > { %v3231_v57 = vpop.f32.mrf.mxu1 }
 0xcea   : > { %4551 = vrot.lane.b32.xlu1 %v4550_v1, %s4925_s30  ;;  %s4377_s30 = sshll.u32 %s6362_s17, 4 }
 0xceb   : > { %3346 = vmatpush1.bf16.msra.mxu0 %v3278_v36  ;;  %v6144_v28 = vpop.f32.mrf.mxu1  ;;  %s403_s28 = scalar_lea.vmem %s6339_s11, %s4377_s30 }
 0xcec   : > { %3311 = vrot.lane.b32.xlu0 %v6051_v63, %s4923_s27 }
 0xced   : > { %v3234_v27 = vpop.f32.mrf.mxu1 }
 0xcee   : > { %3313 = vrot.lane.b32.xlu1 %v6057_v35, %s4923_s27 }
 0xcf0   : > { %3315 = vrot.lane.b32.xlu0 %v6064_v30, %s4923_s27 }
 0xcf2   : > { %3317 = vrot.lane.b32.xlu1 %v6071_v9, %s4923_s27 }
 0xcf4   : > { %3530 = vperm.xlu0 %4433, %v4335_v5  }
 0xcf6   : > { %3535 = vperm.xlu1 %4434, %v4336_v31  }
 0xcf8   : > { %3520 = vperm.xlu0 %4433, %v4333_v55  }
 0xcfa   : > { %3525 = vperm.xlu1 %4434, %v4334_v16  }
 0xcfc   : > { %3510 = vperm.xlu0 %4433, %v4331_v17  }
 0xcfe   : > { %3515 = vperm.xlu1 %4434, %v4332_v44  }
 0xd00   : > { %3500 = vperm.xlu0 %4433, %v4329_v15  }
 0xd02   : > { %3505 = vperm.xlu1 %4434, %v4330_v50  }
 0xd04   : > { %955 = vperm.xlu0 %4433, %v921_v18  }
 0xd06   : > { %960 = vperm.xlu1 %4434, %v922_v19  }
 0xd08   : > { %1499 = vperm.xlu0 %4433, %v4119_v54  }
 0xd0a   : > { %1504 = vperm.xlu1 %4434, %v4120_v33  }
 0xd0c   : > { %2043 = vperm.xlu0 %4433, %v4179_v51  }
 0xd0e   : > { %2048 = vperm.xlu1 %4434, %v4180_v41  }
 0xd10   : > { %945 = vperm.xlu0 %4433, %v919_v43  }
 0xd12   : > { %950 = vperm.xlu1 %4434, %v920_v45  }
 0xd14   : > { %1489 = vperm.xlu0 %4433, %v4117_v3  }
 0xd16   : > { %1494 = vperm.xlu1 %4434, %v4118_v53  }
 0xd18   : > { %2586 = vperm.xlu0 %4433, %v4239_v13  }
 0xd1a   : > { %2591 = vperm.xlu1 %4434, %v4240_v10  }
 0xd1c   : > { %2033 = vperm.xlu0 %4433, %v4177_v52  }
 0xd1e   : > { %2038 = vperm.xlu1 %4434, %v4178_v14   ;;  %v6238_v14 = vpop.f32.mrf.mxu1 }
 0xd20   : > { %3129 = vperm.xlu0 %4433, %v4299_v62  }
 0xd22   : > { %3134 = vperm.xlu1 %4434, %v4300_v11  }
 0xd24   : > { %2576 = vperm.xlu0 %4433, %v4237_v59  }
 0xd26   : > { %2581 = vperm.xlu1 %4434, %v4238_v8  }
 0xd28   : > { %3668 = vperm.xlu0 %4433, %v4359_v38  }
 0xd2a   : > { %3673 = vperm.xlu1 %4434, %v4360_v47  }
 0xd2c   : > { %3119 = vperm.xlu0 %4433, %v4297_v48  }
 0xd2e   : > { %3124 = vperm.xlu1 %4434, %v4298_v0  }
 0xd30   : > { %3658 = vperm.xlu0 %4433, %v4357_v49  }
 0xd32   : > { %3663 = vperm.xlu1 %4434, %v4358_v46  }
 0xd34   : > { %3799 = vperm.xlu0 %4433, %v3785_v6  }
 0xd36   : > { %3804 = vperm.xlu1 %4434, %v3786_v7  }
 0xd38   : > { %3789 = vperm.xlu0 %4433, %v3783_v21  }
 0xd3a   : > { %3794 = vperm.xlu1 %4434, %v3784_v34  }
 0xd3c   : > { %3884 = vperm.xlu0 %4433, %v3880_v22  }
 0xd3e   : > { %3889 = vperm.xlu1 %4434, %v3881_v39  }
 0xd56   : > { %v4537_v4 = vpop.permute.xlu0 %4536 }
 0xd57   : > { %v4539_v25 = vunpack.i.h.bf16 %v4537_v4  ;;  %v4538_v1 = vunpack.i.l.bf16 %v4537_v4 }
 0xd58   : > { %v4547_v2 = vpop.permute.xlu1 %4546 }
 0xd59   : > { %v4549_v36 = vunpack.i.h.bf16 %v4547_v2  ;;  %v4548_v5 = vunpack.i.l.bf16 %v4547_v2 }
 0xd5a   : > { %v4542_v31 = vpop.permute.xlu0 %4541 }
 0xd5b   : > { %v3272_v55 = vsel %vm1636_vm10, %v4548_v5, %v4538_v1  ;;  %v3273_v16 = vsel %vm1636_vm10, %v4549_v36, %v4539_v25  ;;  %v4544_v44 = vunpack.i.h.bf16 %v4542_v31  ;;  %v3268_v50 = vsel %vm1636_vm10, %v4538_v1, %v4548_v5 }
 0xd5c   : > { %v3276_v17 = vpack.c.bf16 %v3273_v16, %v3272_v55  ;;  %v4552_v15 = vpop.permute.xlu1 %4551  ;;  %v3269_v18 = vsel %vm1636_vm10, %v4539_v25, %v4549_v36  ;;  %v4543_v19 = vunpack.i.l.bf16 %v4542_v31 }
 0xd5d   : > { %v4554_v54 = vunpack.i.h.bf16 %v4552_v15  ;;  %v4553_v33 = vunpack.i.l.bf16 %v4552_v15  ;;  %v3277_v51 = vpack.c.bf16 %v3269_v18, %v3268_v50 }
 0xd5e   : > { %v3312_v41 = vpop.permute.xlu0 %3311 }
 0xd5f   : > { %v3270_v43 = vsel %vm1636_vm10, %v4553_v33, %v4543_v19  ;;  %v3271_v45 = vsel %vm1636_vm10, %v4554_v54, %v4544_v44  ;;  %3428 = vmatprep.subr.bf16.mxu1 %v3277_v51  ;;  %4321 = vmatmul.mubr.msk.bf16.vlgmr.msra.gmra.mxu0 %vm604_vm8, %v3312_v41  ;;  %v3266_v3 = vsel %vm1636_vm10, %v4543_v19, %v4553_v33 }
 0xd60   : > { %v3274_v53 = vpack.c.bf16 %v3271_v45, %v3270_v43  ;;  %3429 = vmatpush1.bf16.msra.mxu1 %v3276_v17  ;;  %v3267_v12 = vsel %vm1636_vm10, %v4544_v44, %v4554_v54  ;;  %3373 = vmatprep.mubr.bf16.mxu0 %v6345_v37  ;;  %v3314_v10 = vpop.permute.xlu1 %3313 }
 0xd61   : > { %v3275_v13 = vpack.c.bf16 %v3267_v12, %v3266_v3 }
 0xd62   : > { %v3316_v57 = vpop.permute.xlu0 %3315 }
 0xd63   : > { %3430 = vmatprep.subr.bf16.mxu1 %v3275_v13 }
 0xd64   : > { %3431 = vmatpush1.bf16.msra.mxu1 %v3274_v53  ;;  %v3318_v60 = vpop.permute.xlu1 %3317 }
 0xd67   : > { %4325 = vmatmul.mubr.msk.bf16.vlgmr.msra.gmra.mxu1 %vm604_vm8, %v6051_v63  ;;  %4322 = vmatmul.mubr.msk.bf16.gmra.mxu0 %vm604_vm8, %v3314_v10 }
 0xd68   : > { %3458 = vmatprep.mubr.bf16.mxu1 %v6345_v37  ;;  %3383 = vmatprep.mubr.bf16.mxu0 %v6345_v37 }
 0xd6f   : > { %4326 = vmatmul.mubr.msk.bf16.gmra.mxu1 %vm604_vm8, %v6057_v35  ;;  %4323 = vmatmul.mubr.msk.bf16.gmra.mxu0 %vm604_vm8, %v3316_v57  ;;  %v3531_v21 = vpop.permute.xlu0 %3530 }
 0xd70   : > { %3468 = vmatprep.mubr.bf16.mxu1 %v6345_v37  ;;  %3393 = vmatprep.mubr.bf16.mxu0 %v6345_v37 }
 0xd71   : > { %v3536_v4 = vpop.permute.xlu1 %3535 }
 0xd73   : > { %v3521_v36 = vpop.permute.xlu0 %3520 }
 0xd75   : > { %v3526_v15 = vpop.permute.xlu1 %3525 }
 0xd77   : > { %4327 = vmatmul.mubr.msk.bf16.gmra.mxu1 %vm604_vm8, %v6064_v30  ;;  %4324 = vmatmul.mubr.msk.bf16.gmra.mxu0 %vm604_vm8, %v3318_v60 }
 0xd78   : > { %3478 = vmatprep.mubr.bf16.mxu1 %v6345_v37  ;;  %3740 = vmatprep.mubr.bf16.mxu0 %v6345_v37 }
 0xd7f   : > { %4328 = vmatmul.mubr.msk.bf16.gmra.mxu1 %vm604_vm8, %v6071_v9 }
 0xe1f   : > { %v6232_v63 = vpop.f32.mrf.mxu0 }
 0xe21   : > { %v6234_v35 = vpop.f32.mrf.mxu0 }
 0xe23   : > { %v6236_v52 = vpop.f32.mrf.mxu0 }
 0xe25   : > { %v6240_v27 = vpop.f32.mrf.mxu0 }
 0xe27   : > { %v6242_v30 = vpop.f32.mrf.mxu1  ;;  %v6244_v62 = vpop.f32.mrf.mxu0 }
 0xe29   : > { %v3452_v11 = vpop.f32.mrf.mxu1  ;;  %v6246_v59 = vpop.f32.mrf.mxu0 }
 0xe2b   : > { %v6248_v8 = vpop.f32.mrf.mxu1  ;;  %v6250_v9 = vpop.f32.mrf.mxu0 }
 0xe2d   : > { %v3456_v38 = vpop.f32.mrf.mxu1  ;;  %v6252_v47 = vpop.f32.mrf.mxu0 }
 0xe2f   : > { %v3460_v48 = vpop.f32.mrf.mxu1  ;;  %v3385_v0 = vpop.f32.mrf.mxu0 }
 0xe31   : > { %v3462_v49 = vpop.f32.mrf.mxu1  ;;  %v3387_v46 = vpop.f32.mrf.mxu0 }
 0xe33   : > { %v3464_v6 = vpop.f32.mrf.mxu1  ;;  %v3389_v7 = vpop.f32.mrf.mxu0 }
 0xe35   : > { %v3466_v34 = vpop.f32.mrf.mxu1  ;;  %v3391_v22 = vpop.f32.mrf.mxu0 }
 0xe37   : > { %v3470_v39 = vpop.f32.mrf.mxu1  ;;  %v3395_v2 = vpop.f32.mrf.mxu0 }
 0xe38   : > { %v3471_v50 = vadd.f32 %v3470_v39, %v3385_v0 }
 0xe39   : > { %v3472_v25 = vpop.f32.mrf.mxu1  ;;  %v3397_v55 = vpop.f32.mrf.mxu0 }
 0xe3a   : > { %v3473_v1 = vadd.f32 %v3472_v25, %v3387_v46  ;;  %v3546_v12 = vadd.f32 %v3521_v36, %v3471_v50 }
 0xe3b   : > { %v3474_v5 = vpop.f32.mrf.mxu1  ;;  %v3399_v41 = vpop.f32.mrf.mxu0 }
 0xe3c   : > { %v3547_v31 = vadd.f32 %v3521_v36, %v3473_v1  ;;  %v3475_v16 = vadd.f32 %v3474_v5, %v3389_v7  ;;  %v3516_v1 = vpop.permute.xlu1 %3515  ;;  %v4337_v5 = vmul.f32 -1.442695, %v3546_v12  ;;  %v3453_v36 = vadd.f32 %v3452_v11, %v6234_v35 }
 0xe3d   : > { %v3476_v17 = vpop.f32.mrf.mxu1  ;;  %v3401_v7 = vpop.f32.mrf.mxu0 }
 0xe3e   : > { %v3477_v44 = vadd.f32 %v3476_v17, %v3391_v22  ;;  %v4338_v18 = vmul.f32 -1.442695, %v3547_v31  ;;  %v3548_v51 = vadd.f32 %v3526_v15, %v3475_v16  ;;  %v3511_v22 = vpop.permute.xlu0 %3510  ;;  %v3457_v16 = vadd.f32 %v3456_v38, %v6240_v27 }
 0xe3f   : > { %v3480_v19 = vpop.f32.mrf.mxu1  ;;  %v3461_v17 = vadd.f32 %v3460_v48, %v6244_v62 }
 0xe40   : > { %v3549_v54 = vadd.f32 %v3526_v15, %v3477_v44  ;;  %v3481_v33 = vadd.f32 %v3480_v19, %v3395_v2  ;;  %4848 = vpow2.f32 %v4338_v18  ;;  %v4339_v46 = vmul.f32 -1.442695, %v3548_v51  ;;  %v3506_v50 = vpop.permute.xlu1 %3505 }
 0xe41   : > { %v3482_v43 = vpop.f32.mrf.mxu1  ;;  %v3463_v15 = vadd.f32 %v3462_v49, %v6246_v59  ;;  %v3465_v19 = vadd.f32 %v3464_v6, %v6250_v9  ;;  %v3542_v35 = vadd.f32 %v3511_v22, %v3461_v17  ;;  %v3455_v9 = vadd.f32 %v6248_v8, %v6236_v52 }
 0xe42   : > { %v4340_v45 = vmul.f32 -1.442695, %v3549_v54  ;;  %v3550_v3 = vadd.f32 %v3531_v21, %v3481_v33  ;;  %v3483_v53 = vadd.f32 %v3482_v43, %v3397_v55  ;;  %v3501_v44 = vpop.permute.xlu0 %3500  ;;  %v3541_v54 = vadd.f32 %v3506_v50, %v3457_v16 }
 0xe43   : > { %v3484_v13 = vpop.f32.mrf.mxu1  ;;  %v3539_v18 = vadd.f32 %v3501_v44, %v3453_v36  ;;  %v3543_v33 = vadd.f32 %v3511_v22, %v3463_v15  ;;  %v3544_v38 = vadd.f32 %v3516_v1, %v3465_v19 }
 0xe44   : > { %4850 = vpow2.f32 %v4340_v45  ;;  %v4341_v10 = vmul.f32 -1.442695, %v3550_v3  ;;  %v3551_v57 = vadd.f32 %v3531_v21, %v3483_v53  ;;  %v3485_v60 = vadd.f32 %v3484_v13, %v3399_v41 }
 0xe45   : > { %v3486_v0 = vpop.f32.mrf.mxu1  ;;  %v3451_v53 = vadd.f32 %v6242_v30, %v6232_v63  ;;  %v3540_v13 = vadd.f32 %v3506_v50, %v3455_v9 }
 0xe46   : > { %v4342_v39 = vmul.f32 -1.442695, %v3551_v57  ;;  %v3552_v25 = vadd.f32 %v3536_v4, %v3485_v60  ;;  %v3487_v2 = vadd.f32 %v3486_v0, %v3401_v7  ;;  %4852 = vpow2.f32 %v4341_v10 }
 0xe47   : > { %v3538_v52 = vadd.f32 %v3501_v44, %v3451_v53 }
 0xe48   : > { %4854 = vpow2.f32 %v4342_v39  ;;  %v4343_v31 = vmul.f32 -1.442695, %v3552_v25  ;;  %v3553_v55 = vadd.f32 %v3536_v4, %v3487_v2  ;;  %v3467_v4 = vadd.f32 %v3466_v34, %v6252_v47 }
 0xe49   : > { %4856 = vpow2.f32 %v4339_v46 }
 0xe4a   : > { %4858 = vpow2.f32 %v4343_v31  ;;  %v4344_v21 = vmul.f32 -1.442695, %v3553_v55  ;;  %v3545_v62 = vadd.f32 %v3516_v1, %v3467_v4 }
 0xe4b   : > { %4860 = vpow2.f32 %v4337_v5 }
 0xe4c   : > { %4862 = vpow2.f32 %v4344_v21 }
 0xe4d   : > { %v4849_v11 = vpop.eup %4848  ;;  %4864 = vtanh.f32 %v3539_v18 }
 0xe4e   : > { %4866 = vtanh.f32 %v3541_v54  ;;  %v3587_v48 = vadd.f32 1.0, %v4849_v11 }
 0xe4f   : > { %4868 = vtanh.f32 %v3542_v35 }
 0xe50   : > { %4870 = vtanh.f32 %v3543_v33  ;;  %v4601_v33 = vld [vmem:[%s6333_s5 + $0xa0] sm:$0xff]  }
 0xe51   : > { %v4851_v27 = vpop.eup %4850  ;;  %4872 = vtanh.f32 %v3544_v38  ;;  %v4603_v38 = vld [vmem:[%s6333_s5 + $0xb0] sm:$0xff]  }
 0xe52   : > { %v3589_v59 = vadd.f32 1.0, %v4851_v27  ;;  %4874 = vtanh.f32 %v3545_v62  ;;  %v4602_v27 = vld [vmem:[%s6333_s5 + $0xa8] sm:$0xff]   ;;  %v4604_v62 = vld [vmem:[%s6333_s5 + $0xb8] sm:$0xff]  }
 0xe53   : > { %v4853_v51 = vpop.eup %4852  ;;  %4876 = vrcp.f32 %v3587_v48  ;;  %v4605_v48 = vld [vmem:[%s6335_s7] sm:$0xff]  }
 0xe54   : > { %v3590_v34 = vadd.f32 1.0, %v4853_v51  ;;  %4878 = vrcp.f32 %v3589_v59  ;;  %4389 = vmatprep.mubr.msk.bf16.mxu1 %vm604_vm8, %v4605_v48  ;;  %v961_v51 = vpop.permute.xlu1 %960  ;;  %v956_v59 = vpop.permute.xlu0 %955 }
 0xe55   : > { %v4855_v49 = vpop.eup %4854 }
 0xe56   : > { %v4857_v41 = vpop.eup %4856  ;;  %v3591_v47 = vadd.f32 1.0, %v4855_v49 }
 0xe57   : > { %v4859_v6 = vpop.eup %4858  ;;  %v3588_v12 = vadd.f32 1.0, %v4857_v41 }
 0xe58   : > { %v4861_v43 = vpop.eup %4860  ;;  %v3592_v45 = vadd.f32 1.0, %v4859_v6  ;;  %4880 = vrcp.f32 %v3591_v47  ;;  %v1505_v49 = vpop.permute.xlu1 %1504 }
 0xe59   : > { %v4863_v3 = vpop.eup %4862  ;;  %v3586_v57 = vadd.f32 1.0, %v4861_v43  ;;  %v1500_v41 = vpop.permute.xlu0 %1499 }
 0xe5a   : > { %4882 = vrcp.f32 %v3592_v45  ;;  %v3593_v10 = vadd.f32 1.0, %v4863_v3  ;;  %v4865_v8 = vpop.eup %4864 }
 0xe5b   : > { %4884 = vrcp.f32 %v3590_v34  ;;  %v4867_v60 = vpop.eup %4866 }
 0xe5c   : > { %4886 = vrcp.f32 %v3593_v10  ;;  %v4869_v46 = vpop.eup %4868  ;;  %v2049_v9 = vpop.permute.xlu1 %2048 }
 0xe5d   : > { %4888 = vrcp.f32 %v3588_v12  ;;  %v4871_v7 = vpop.eup %4870  ;;  %v2044_v47 = vpop.permute.xlu0 %2043 }
 0xe5e   : > { %4890 = vtanh.f32 %v3540_v13  ;;  %v4873_v0 = vpop.eup %4872 }
 0xe5f   : > { %4892 = vrcp.f32 %v3586_v57  ;;  %v4875_v22 = vpop.eup %4874 }
 0xe60   : > { %4894 = vtanh.f32 %v3538_v52  ;;  %v4877_v63 = vpop.eup %4876  ;;  %v951_v6 = vpop.permute.xlu1 %950 }
 0xe61   : > { %v4879_v30 = vpop.eup %4878  ;;  %v3611_v50 = vmul.f32 %v4877_v63, %v4865_v8 }
 0xe62   : > { %v3613_v16 = vmul.f32 %v4879_v30, %v4867_v60 }
 0xe64   : > { %v3628_v4 = vpack.c.bf16 %v3613_v16, %v3611_v50  ;;  %v1495_v34 = vpop.permute.xlu1 %1494  ;;  %v2147_v16 = vadd.f32 %v5781_v42, %v2044_v47 }
 0xe65   : > { %v4881_v39 = vpop.eup %4880 }
 0xe66   : > { %v3615_v55 = vmul.f32 %v4881_v39, %v4871_v7 }
 0xe67   : > { %v4883_v25 = vpop.eup %4882 }
 0xe68   : > { %v4885_v2 = vpop.eup %4884  ;;  %v3616_v5 = vmul.f32 %v4883_v25, %v4873_v0  ;;  %v2592_v45 = vpop.permute.xlu1 %2591 }
 0xe69   : > { %v4887_v1 = vpop.eup %4886  ;;  %v3614_v17 = vmul.f32 %v4885_v2, %v4869_v46 }
 0xe6a   : > { %v4889_v31 = vpop.eup %4888  ;;  %v3617_v36 = vmul.f32 %v4887_v1, %v4875_v22  ;;  %v1603_v1 = vadd.f32 %v5579_v56, %v1500_v41  ;;  %v6356_v41 = vld [vmem:[#allocation5_spill] sm:$0xff] }
 0xe6b   : > { %v4891_v21 = vpop.eup %4890  ;;  %v3629_v18 = vpack.c.bf16 %v3616_v5, %v3614_v17 }
 0xe6c   : > { %v4893_v44 = vpop.eup %4892  ;;  %v3630_v15 = vpack.c.bf16 %v3617_v36, %v3615_v55  ;;  %v3612_v19 = vmul.f32 %v4891_v21, %v4889_v31  ;;  %v2039_v53 = vpop.permute.xlu1 %2038  ;;  %v1059_v31 = vadd.f32 %v5376_v32, %v956_v59  ;;  %v1598_v55 = vadd.f32 %v5577_v20, %v1495_v34  ;;  %v6351_v32 = vld [vmem:[#allocation2_spill] sm:$0xff]  ;;  %v6352_v20 = vld [vmem:[#allocation7_spill] sm:$0xff] }
 0xe6d   : > { %v4895_v54 = vpop.eup %4894  ;;  %v1606_v36 = vadd.f32 %v5587_v40, %v1505_v49  ;;  %v2142_v56 = vadd.f32 %v5779_v23, %v2039_v53  ;;  %v6353_v40 = vld [vmem:[#allocation3_spill] sm:$0xff] }
 0xe6e   : > { %3720 = vmatprep.subr.bf16.mxu0 %v3630_v15  ;;  %v3610_v35 = vmul.f32 %v4895_v54, %v4893_v44  ;;  %v1062_v15 = vadd.f32 %v5384_v26, %v961_v51  ;;  %v1618_v50 = vadd.f32 %v1603_v1, %v1059_v31  ;;  %v6355_v51 = vld [vmem:[#allocation8_spill] sm:$0xff] }
 0xe6f   : > { %3721 = vmatpush1.bf16.msra.mxu0 %v3629_v18  ;;  %v1054_v18 = vadd.f32 %v5374_v29, %v951_v6  ;;  %v2693_v29 = vadd.f32 %v6355_v51, %v2592_v45 }
 0xe70   : > { %3722 = vmatprep.subr.bf16.mxu0 %v3628_v4  ;;  %v3627_v11 = vpack.c.bf16 %v3612_v19, %v3610_v35  ;;  %v3135_v10 = vpop.permute.xlu1 %3134  ;;  %v6350_v19 = vld [vmem:[#allocation4_spill] sm:$0xff]  ;;  %v2162_v26 = vadd.f32 %v2147_v16, %v1618_v50 }
 0xe71   : > { %v2150_v54 = vadd.f32 %v6350_v19, %v2049_v9 }
 0xe73   : > { %3723 = vmatpush1.bf16.msra.mxu0 %v3627_v11 }
 0xe74   : > { %v2582_v46 = vpop.permute.xlu1 %2581 }
 0xe76   : > { %4365 = vmatmul.mubr.msk.bf16.vlgmr.msra.gmra.mxu0 %vm604_vm8, %v4601_v33 }
 0xe77   : > { %3746 = vmatprep.mubr.bf16.mxu0 %v6345_v37 }
 0xe78   : > { %v3674_v30 = vpop.permute.xlu1 %3673 }
 0xe7c   : > { %v3125_v17 = vpop.permute.xlu1 %3124 }
 0xe7d   : > { %v3228_v47 = vadd.f32 %v6136_v61, %v3125_v17 }
 0xe7e   : > { %4366 = vmatmul.mubr.msk.bf16.gmra.mxu0 %vm604_vm8, %v4602_v27  ;;  %v6354_v27 = vld [vmem:[#allocation6_spill] sm:$0xff] }
 0xe7f   : > { %3752 = vmatprep.mubr.bf16.mxu0 %v6345_v37 }
 0xe86   : > { %4367 = vmatmul.mubr.msk.bf16.gmra.mxu0 %vm604_vm8, %v4603_v38  ;;  %v2685_v38 = vadd.f32 %v6354_v27, %v2582_v46  ;;  %v4607_v27 = vld [vmem:[%s6337_s9] sm:$0xff]  }
 0xe87   : > { %3760 = vmatprep.mubr.bf16.mxu0 %v6345_v37  ;;  %v946_v37 = vpop.permute.xlu0 %945 }
 0xe88   : > { %v1051_v4 = vadd.f32 %v6351_v32, %v946_v37 }
 0xe8b   : > { %v1490_v43 = vpop.permute.xlu0 %1489 }
 0xe8c   : > { %v1595_v21 = vadd.f32 %v5538_v24, %v1490_v43  ;;  %v1617_v24 = vadd.f32 %v1598_v55, %v1054_v18  ;;  %v3236_v43 = vadd.f32 %v6238_v14, %v3135_v10 }
 0xe8e   : > { %4368 = vmatmul.mubr.msk.bf16.gmra.mxu0 %vm604_vm8, %v4604_v62  ;;  %v1619_v62 = vadd.f32 %v1606_v36, %v1062_v15  ;;  %v1616_v48 = vadd.f32 %v1595_v21, %v1051_v4  ;;  %v2161_v23 = vadd.f32 %v2142_v56, %v1617_v24  ;;  %v4926_v21 = vmov 0.0  }
 0xe8f   : > { %v2587_v3 = vpop.permute.xlu0 %2586 }
 0xe90   : > { %v2690_v35 = vadd.f32 %v6352_v20, %v2587_v3  ;;  %v2163_v6 = vadd.f32 %v2150_v54, %v1619_v62  ;;  %v3664_v3 = vpop.permute.xlu1 %3663 }
 0xe92   : > { %v2705_v37 = vadd.f32 %v2690_v35, %v2162_v26 }
 0xe93   : > { %v2034_v12 = vpop.permute.xlu0 %2033 }
 0xe94   : > { %v2139_v11 = vadd.f32 %v6353_v40, %v2034_v12  ;;  %v2704_v12 = vadd.f32 %v2685_v38, %v2161_v23  ;;  %v3805_v17 = vpop.permute.xlu1 %3804 }
 0xe96   : > { %v2160_v34 = vadd.f32 %v2139_v11, %v1616_v48 }
 0xe97   : > { %v3130_v52 = vpop.permute.xlu0 %3129 }
 0xe98   : > { %v3233_v49 = vadd.f32 %v6144_v28, %v3130_v52  ;;  %v3795_v54 = vpop.permute.xlu1 %3794 }
 0xe9a   : > { %v3248_v28 = vadd.f32 %v3233_v49, %v2705_v37 }
 0xe9b   : > { %v2577_v0 = vpop.permute.xlu0 %2576 }
 0xe9c   : > { %v2682_v9 = vadd.f32 %v6356_v41, %v2577_v0  ;;  %v3890_v51 = vpop.permute.xlu1 %3889 }
 0xe9e   : > { %v2703_v52 = vadd.f32 %v2682_v9, %v2160_v34 }
 0xe9f   : > { %v3669_v25 = vpop.permute.xlu0 %3668 }
 0xea3   : > { %v3120_v42 = vpop.permute.xlu0 %3119 }
 0xf36   : > { %v3742_v13 = vpop.f32.mrf.mxu0 }
 0xf37   : > { %v3225_v13 = vadd.f32 %v6128_v58, %v3120_v42 }
 0xf38   : > { %v3743_v57 = vpop.f32.mrf.mxu0 }
 0xf3a   : > { %v3744_v8 = vpop.f32.mrf.mxu0 }
 0xf3b   : > { %v2706_v8 = vadd.f32 %v2693_v29, %v2163_v6 }
 0xf3c   : > { %v3745_v60 = vpop.f32.mrf.mxu0 }
 0xf3d   : > { %v3659_v60 = vpop.permute.xlu0 %3658  ;;  %v3249_v61 = vadd.f32 %v3236_v43, %v2706_v8 }
 0xf3e   : > { %v3748_v7 = vpop.f32.mrf.mxu0 }
 0xf3f   : > { %v3247_v7 = vadd.f32 %v3228_v47, %v2704_v12 }
 0xf40   : > { %v3749_v22 = vpop.f32.mrf.mxu0 }
 0xf42   : > { %v3750_v63 = vpop.f32.mrf.mxu0 }
 0xf43   : > { %v3246_v63 = vadd.f32 %v3225_v13, %v2703_v52 }
 0xf44   : > { %v3751_v39 = vpop.f32.mrf.mxu0 }
 0xf46   : > { %v3754_v2 = vpop.f32.mrf.mxu0 }
 0xf48   : > { %v3755_v5 = vpop.f32.mrf.mxu0 }
 0xf49   : > { %v3756_v0 = vadd.f32 %v3755_v5, %v3659_v60  ;;  %v4606_v5 = vld [vmem:[%s6335_s7 + $0x8] sm:$0xff]  }
 0xf4a   : > { %v3757_v44 = vpop.f32.mrf.mxu0 }
 0xf4b   : > { %v3769_v10 = vadd.f32 %v3756_v0, %v3246_v63 }
 0xf4c   : > { %v3758_v33 = vpop.f32.mrf.mxu0 }
 0xf4d   : > { %v3759_v57 = vadd.f32 %v3758_v33, %v3664_v3  ;;  %v3773_v36 = vmax.f32 %v3769_v10, 0.0 }
 0xf4e   : > { %v3762_v59 = vpop.f32.mrf.mxu0 }
 0xf4f   : > { %v3770_v39 = vadd.f32 %v3759_v57, %v3247_v7 }
 0xf50   : > { %v3763_v53 = vpop.f32.mrf.mxu0 }
 0xf51   : > { %v3764_v45 = vadd.f32 %v3763_v53, %v3669_v25  ;;  %v3774_v31 = vmax.f32 %v3770_v39, 0.0 }
 0xf52   : > { %v3765_v46 = vpop.f32.mrf.mxu0 }
 0xf53   : > { %v3771_v2 = vadd.f32 %v3764_v45, %v3248_v28  ;;  %v3777_v16 = vpack.c.bf16 %v3774_v31, %v3773_v36 }
 0xf54   : > { %v3766_v22 = vpop.f32.mrf.mxu0 }
 0xf55   : > { %v3767_v14 = vadd.f32 %v3766_v22, %v3674_v30  ;;  %v3775_v55 = vmax.f32 %v3771_v2, 0.0  ;;  %v3800_v30 = vpop.permute.xlu0 %3799 }
 0xf57   : > { %v3772_v1 = vadd.f32 %v3767_v14, %v3249_v61 }
 0xf59   : > { %v3776_v58 = vmax.f32 %v3772_v1, 0.0  ;;  %v3790_v56 = vpop.permute.xlu0 %3789 }
 0xf5b   : > { %v3778_v25 = vpack.c.bf16 %v3776_v58, %v3775_v55 }
 0xf5d   : > { %4385 = vmatprep.subr.bf16.mxu1 %v3778_v25  ;;  %v3885_v38 = vpop.permute.xlu0 %3884 }
 0xf5e   : > { %4386 = vmatpush3.bf16.msra.mxu1 %v3778_v25 }
 0xf5f   : > { %4387 = vmatprep.subr.bf16.mxu1 %v3777_v16 }
 0xf62   : > { %4388 = vmatpush3.bf16.msra.mxu1 %v3777_v16 }
 0xf63   : > { %4393 = vmatprep.subr.bf16.mxu1 %v4926_v21 }
 0xf65   : > { %4390 = vmatmul.mubr.msk.bf16.vlgmr.msra.gmra.mxu1 %vm604_vm8, %v4606_v5 }
 0xf66   : > { %4397 = vmatprep.mubr.msk.bf16.mxu1 %vm4927_vm11, %v4926_v21 }
0x1025   : > { %v4391_v44 = vpop.f32.mrf.mxu1 }
0x1026   : > { %v3866_v50 = vadd.f32 %v4391_v44, %v3800_v30 }
0x1027   : > { %v3857_v15 = vpop.f32.mrf.mxu1 }
0x1028   : > { %v3874_v4 = vmax.f32 %v3866_v50, 0.0  ;;  %v3858_v20 = vadd.f32 %v3857_v15, %v3790_v56 }
0x1029   : > { %v4392_v18 = vpop.f32.mrf.mxu1 }
0x102a   : > { %v3869_v19 = vadd.f32 %v4392_v18, %v3805_v17  ;;  %v3872_v33 = vmax.f32 %v3858_v20, 0.0 }
0x102b   : > { %v3860_v32 = vpop.f32.mrf.mxu1 }
0x102c   : > { %v3875_v35 = vmax.f32 %v3869_v19, 0.0  ;;  %v3861_v40 = vadd.f32 %v3860_v32, %v3795_v54 }
0x102e   : > { %v3879_v11 = vpack.c.bf16 %v3875_v35, %v3874_v4  ;;  %v3873_v42 = vmax.f32 %v3861_v40, 0.0 }
0x1030   : > { %4394 = vmatpush3.bf16.msra.mxu1 %v3879_v11  ;;  %v3878_v24 = vpack.c.bf16 %v3873_v42, %v3872_v33 }
0x1031   : > { %4395 = vmatprep.subr.bf16.mxu1 %v4926_v21 }
0x1034   : > { %4396 = vmatpush3.bf16.msra.mxu1 %v3878_v24 }
0x1037   : > { %4398 = vmatmul.mubr.msk.bf16.vlgmr.msra.gmra.mxu1 %vm604_vm8, %v4607_v27 }
0x10f7   : > { %v3934_v62 = vpop.f32.mrf.mxu1 }
0x10f8   : > { %v3935_v26 = vadd.f32 %v3934_v62, %v3885_v38 }
0x10f9   : > { %v4399_v48 = vpop.f32.mrf.mxu1 }
0x10fa   : > { %3941 = vst [vmem:[%s403_s28] sm:$0xff] %v3935_v26 }
0x10fb   : > { %v3937_v29 = vpop.f32.mrf.mxu1 }
0x10fc   : > { %v3938_v59 = vadd.f32 %v3937_v29, %v3890_v51 }
0x10fd   : > { %v4400_v23 = vpop.f32.mrf.mxu1 }
0x10fe   : > { %3942 = vst [vmem:[%s403_s28 + $0x8] sm:$0xff] %v3938_v59 }
0x10ff PF: > { %s21_s19 = sadd.s32 1, %s4918_s19   ;;  %s6357_s17 = smov %s4914_s18 }
0x1100   : > { %p18_p5 = scmp.ge.s32.totalorder %s21_s19, 4   ;;  %s6358_s18 = smov %s6360_s20 }
0x1102   :  { %20 = sbr.rel (!%p18_p5) target bundleno = 2 (0x2), region = 115 }

</bundles_post_ra>
